<compile_context>
chip_gen: v6e
topology: v6e:2x2x1
jax: 0.10.0
libtpu: 0.0.40
codegen_flags: <defaults>
</compile_context>

<pallas_src>
import functools

import jax
import jax.numpy as jnp
from jax.experimental import pallas as pl
from jax.experimental.pallas import tpu as pltpu

_EPS = 1e-5
_AFFINE_TILE_M = 512      # large elementwise tiles (~85% of HBM roofline vs ~30% at 128)


def _round_up(v, m):
    return ((v + m - 1) // m) * m


def _pad_rows(a, tile):
    """Pad the leading (row) dim of a 2-D array up to a multiple of `tile`."""
    m = a.shape[0]
    m_pad = _round_up(m, tile)
    if m_pad == m:
        return a, m
    return jnp.pad(a, ((0, m_pad - m), (0, 0))), m


def _vmem_limit(needed_bytes):
    """Scoped-VMEM limit = per-step footprint + headroom, capped at physical VMEM."""
    cap = 64 * 1024 * 1024
    try:
        cap = int(pltpu.get_tpu_info().vmem_capacity_bytes)
    except Exception:
        pass
    return int(max(32 * 1024 * 1024, min(cap, int(needed_bytes) + (8 << 20))))


# ----------------------------- Pallas kernels ------------------------------ #

def _conv_im2col_kernel(x_ref, w_ref, cmap_ref, mrow_ref, o_ref, slab_ref, *,
                        k, padding, H, W, apply_relu):
    """Fused BN + kxk stride-1 'same' conv + bias + ReLU for one image.

    x_ref:    (1, HW, C)       bf16 activation rows (single HBM read per image)
    w_ref:    (k*k*C, np_out)  bf16 BN-folded im2col weights (grid-invariant)
    cmap_ref: (HW, np_out)     f32  bias + per-position BN shift constants
    mrow_ref: (HW, k*k)        f32  per-tap border-validity masks
    o_ref:    (1, HW, np_out)  f32  output (lane-dense padded channels)
    slab_ref: (HW, k*k*C)      bf16 VMEM im2col scratch slab
    """
    C = x_ref.shape[2]
    # Row shifts / masking are done on the narrow C-wide operand in f32 (robust
    # sublane relayout), then cast to bf16 for the single MXU matmul.
    x = x_ref[0].astype(jnp.float32)                        # (HW, C)
    for kh in range(k):                                     # static unrolled tap loop
        for kw in range(k):
            t = kh * k + kw
            dh, dw = kh - padding, kw - padding
            off = dh * W + dw
            x_t = x if off == 0 else jnp.concatenate([x[off:], x[:off]], axis=0)
            if dh == 0 and dw == 0:
                col = x_t                                   # center tap: mask is all ones
            else:
                m_t = mrow_ref[:, t:t + 1] > 0.5            # (HW, 1) bool
                # jnp.where (not multiply): exact zeros like the reference's padding.
                col = jnp.where(m_t, x_t, jnp.zeros_like(x_t))
            slab_ref[:, t * C:(t + 1) * C] = col.astype(jnp.bfloat16)
    acc = jnp.dot(slab_ref[...], w_ref[...], preferred_element_type=jnp.float32)
    acc = acc + cmap_ref[...]                               # bias + masked BN-shift map
    if apply_relu:
        acc = jnp.maximum(acc, 0.0)
    o_ref[0] = acc.astype(o_ref.dtype)


def _matmul_cmap_act_kernel(a_ref, w_ref, cmap_ref, o_ref, *, apply_relu):
    """Fallback (strided) path: one image's im2col rows x folded weights."""
    acc = jnp.dot(a_ref[0], w_ref[...], preferred_element_type=jnp.float32)
    acc = acc + cmap_ref[...]
    if apply_relu:
        acc = jnp.maximum(acc, 0.0)
    o_ref[0] = acc.astype(o_ref.dtype)


def _residual_bnsc_kernel(x_ref, scale_ref, shift_ref, o_ref, *, planes):
    """Fused residual: channel zero-pad / group-sum + bnsc affine in one pass.

    x_ref:  (tile, Cg) f32.  Cg < planes  -> zero-pad channels up to planes.
                             Cg >= planes -> Cg is a multiple of planes; fold by sum.
    scale/shift: (1, planes) f32.  o_ref: (tile, planes) f32.
    """
    cin = x_ref.shape[1]
    x = x_ref[...]
    if cin >= planes:
        acc = x[:, :planes]
        for j in range(1, cin // planes):
            acc = acc + x[:, j * planes:(j + 1) * planes]
        o_ref[...] = acc * scale_ref[...] + shift_ref[...]
    else:
        # zero-padded channels go through bnsc as 0*scale + shift == shift.
        o_ref[:, :cin] = x * scale_ref[:, :cin] + shift_ref[:, :cin]
        o_ref[:, cin:] = jnp.broadcast_to(shift_ref[:, cin:],
                                          (x_ref.shape[0], planes - cin))


# ------------------------------ conv wrappers ------------------------------ #

def _fold_bn_weights(conv_w, conv_b, scale1, shift1, np_out):
    """Fold BN (y = x*scale1 + shift1) into im2col weights / per-tap constants."""
    planes, C, k, _ = conv_w.shape
    wf = jnp.transpose(conv_w, (2, 3, 1, 0)).reshape(k * k, C, planes)     # [t, c, o]
    w_all = jnp.pad(wf * scale1[None, :, None],
                    ((0, 0), (0, 0), (0, np_out - planes)))
    w_all = w_all.reshape(k * k * C, np_out).astype(jnp.bfloat16)
    c_taps = jnp.pad((wf * shift1[None, :, None]).sum(axis=1),
                     ((0, 0), (0, np_out - planes))).astype(jnp.float32)   # (k*k, np_out)
    bias = jnp.pad(conv_b, (0, np_out - planes)).astype(jnp.float32)
    return w_all, c_taps, bias


def _fused_conv_bn_act(x_nhwc, conv_w, conv_b, scale1, shift1, *,
                       kernel_size, padding, apply_relu):
    """act(conv(bn(x))) for stride == 1 and 2*padding == kernel_size - 1."""
    N, H, W, C = x_nhwc.shape
    k = kernel_size
    HW = H * W
    planes = conv_w.shape[0]
    np_out = _round_up(planes, 128)          # lane-dense output channels

    w_all, c_taps, bias = _fold_bn_weights(conv_w, conv_b, scale1, shift1, np_out)

    # Per-tap validity masks over flattened (oh, ow) output rows (image-invariant):
    # tap (kh, kw) reads input pixel (oh + kh - p, ow + kw - p).
    rows = jnp.arange(HW, dtype=jnp.int32)
    oh, ow = rows // W, rows % W
    masks = []
    for kh in range(k):
        for kw in range(k):
            dh, dw = kh - padding, kw - padding
            masks.append(((oh + dh >= 0) & (oh + dh < H) &
                          (ow + dw >= 0) & (ow + dw < W)).astype(jnp.float32))
    mrow = jnp.stack(masks, axis=1)                                   # (HW, k*k)
    # Image-invariant constant map: bias + sum_t mask_t * c_t  (added once in-kernel).
    cmap = (mrow @ c_taps + bias[None, :]).astype(jnp.float32)        # (HW, np_out)

    x_rows = x_nhwc.reshape(N, HW, C).astype(jnp.bfloat16)            # bf16 HBM operand

    vmem_bytes = (2 * HW * C * 2 + 2 * HW * np_out * 4                # x / out (dbl-buf)
                  + 2 * (k * k * C * np_out * 2 + HW * np_out * 4 + HW * 128 * 4)
                  + HW * k * k * C * 2 + HW * np_out * 4)             # slab + matmul result

    kernel = functools.partial(_conv_im2col_kernel, k=k, padding=padding,
                               H=H, W=W, apply_relu=apply_relu)
    # TODO(synk): on v7x add an HW row-tile grid axis (with +-padding*W halo rows)
    # and single-buffer the grid-invariant operands (pl.Buffered(1)) for very large
    # feature maps; not needed at these shapes.
    out = pl.pallas_call(
        kernel,
        out_shape=jax.ShapeDtypeStruct((N, HW, np_out), jnp.float32),
        grid=(N,),
        in_specs=[
            pl.BlockSpec((1, HW, C), lambda n: (n, 0, 0)),            # activation, once/image
            pl.BlockSpec((k * k * C, np_out), lambda n: (0, 0)),      # folded weights
            pl.BlockSpec((HW, np_out), lambda n: (0, 0)),             # const map (bias+shift)
            pl.BlockSpec((HW, k * k), lambda n: (0, 0)),              # compact per-tap masks
        ],
        out_specs=pl.BlockSpec((1, HW, np_out), lambda n: (n, 0, 0)),
        scratch_shapes=[pltpu.VMEM((HW, k * k * C), jnp.bfloat16)],   # im2col slab
        compiler_params=pltpu.CompilerParams(
            dimension_semantics=("parallel",),
            vmem_limit_bytes=_vmem_limit(vmem_bytes)),
    )(x_rows, w_all, cmap, mrow)
    # TODO(synk): emit bf16 with channels kept padded to 128 and consume that NHWC
    # layout in the next layer to halve writeback and drop this slice.
    return out[:, :, :planes].reshape(N, H, W, planes)


def _fallback_conv_bn_act(x_nhwc, conv_w, conv_b, scale1, shift1, *,
                          kernel_size, stride, padding, apply_relu):
    """Strided / non-'same' conv: BN folded into im2col weights + const map."""
    N, H, W, C = x_nhwc.shape
    k = kernel_size
    planes = conv_w.shape[0]
    np_out = _round_up(planes, 128)
    OH = (H + 2 * padding - k) // stride + 1
    OW = (W + 2 * padding - k) // stride + 1
    OHW = OH * OW

    w_all, c_taps, bias = _fold_bn_weights(conv_w, conv_b, scale1, shift1, np_out)

    rows = jnp.arange(OHW, dtype=jnp.int32)
    oh, ow = rows // OW, rows % OW
    masks = []
    for kh in range(k):
        for kw in range(k):
            ih = oh * stride + kh - padding
            iw = ow * stride + kw - padding
            masks.append(((ih >= 0) & (ih < H) & (iw >= 0) & (iw < W)).astype(jnp.float32))
    mrow = jnp.stack(masks, axis=1)
    cmap = (mrow @ c_taps + bias[None, :]).astype(jnp.float32)        # (OHW, np_out)

    # TODO(synk): build the strided im2col slab in-kernel (manual DMA gather) and add
    # K / row grid axes with an f32 VMEM accumulator for very large k*k*C.
    xp = jnp.pad(x_nhwc.astype(jnp.bfloat16),
                 ((0, 0), (padding, padding), (padding, padding), (0, 0)))
    patches = []
    for kh in range(k):
        for kw in range(k):
            patches.append(xp[:, kh:kh + stride * OH:stride, kw:kw + stride * OW:stride, :])
    a_mat = jnp.concatenate(patches, axis=-1).reshape(N, OHW, k * k * C)

    vmem_bytes = (2 * OHW * k * k * C * 2 + 2 * OHW * np_out * 4
                  + 2 * (k * k * C * np_out * 2 + OHW * np_out * 4) + OHW * np_out * 4)
    out = pl.pallas_call(
        functools.partial(_matmul_cmap_act_kernel, apply_relu=apply_relu),
        out_shape=jax.ShapeDtypeStruct((N, OHW, np_out), jnp.float32),
        grid=(N,),
        in_specs=[
            pl.BlockSpec((1, OHW, k * k * C), lambda n: (n, 0, 0)),
            pl.BlockSpec((k * k * C, np_out), lambda n: (0, 0)),
            pl.BlockSpec((OHW, np_out), lambda n: (0, 0)),
        ],
        out_specs=pl.BlockSpec((1, OHW, np_out), lambda n: (n, 0, 0)),
        compiler_params=pltpu.CompilerParams(
            dimension_semantics=("parallel",),
            vmem_limit_bytes=_vmem_limit(vmem_bytes)),
    )(a_mat, w_all, cmap)
    return out[:, :, :planes].reshape(N, OH, OW, planes)


# ----------------------------- residual wrapper ----------------------------- #

def _residual_branch(params, x_nhwc, *, in_planes, planes, kernel_size, stride,
                     padding, scbn):
    N = x_nhwc.shape[0]
    if stride == 1:
        res = x_nhwc
    else:
        # AvgPool2d(..., divisor_override=1) == windowed SUM pool.
        # TODO(synk): the sum-pool stays in XLA (reduce_window), not a Pallas kernel.
        if kernel_size != 1:
            pk, ps, pp = kernel_size, stride, padding
        else:
            pk, ps, pp = stride, stride, 0
        res = jax.lax.reduce_window(
            x_nhwc, 0.0, jax.lax.add,
            (1, pk, pk, 1), (1, ps, ps, 1),
            [(0, 0), (pp, pp), (pp, pp), (0, 0)])
    RH, RW = res.shape[1], res.shape[2]

    need_bnsc = scbn or in_planes != planes or stride != 1
    if not need_bnsc:
        return res                                   # in_planes == planes, stride == 1

    M = N * RH * RW
    res_rows = res.reshape(M, in_planes)
    if in_planes > planes and in_planes % planes != 0:
        # small channel zero-pad so the in-kernel group-sum sees full groups
        res_rows = jnp.pad(res_rows, ((0, 0), (0, planes - in_planes % planes)))
    Cg = res_rows.shape[1]

    scale2 = params["bnsc_gamma"] / jnp.sqrt(params["bnsc_var"] + _EPS)
    shift2 = params["bnsc_beta"] - params["bnsc_mean"] * scale2

    tile = min(_AFFINE_TILE_M, _round_up(M, 8))
    res_p, m = _pad_rows(res_rows, tile)
    Mp = res_p.shape[0]
    out = pl.pallas_call(
        functools.partial(_residual_bnsc_kernel, planes=planes),
        out_shape=jax.ShapeDtypeStruct((Mp, planes), jnp.float32),
        grid=(Mp // tile,),
        in_specs=[
            pl.BlockSpec((tile, Cg), lambda i: (i, 0)),
            pl.BlockSpec((1, planes), lambda i: (0, 0)),
            pl.BlockSpec((1, planes), lambda i: (0, 0)),
        ],
        out_specs=pl.BlockSpec((tile, planes), lambda i: (i, 0)),
        compiler_params=pltpu.CompilerParams(
            dimension_semantics=("parallel",),
            vmem_limit_bytes=_vmem_limit(2 * tile * (Cg + planes) * 4 + (1 << 20))),
    )(res_p,
      scale2.reshape(1, planes).astype(jnp.float32),
      shift2.reshape(1, planes).astype(jnp.float32))
    return out[:m].reshape(N, RH, RW, planes)


# ------------------------------ SRConv module ------------------------------ #

def init_srconv_params(key, in_planes, planes, kernel_size, groups=1):
    ks = jax.random.split(key, 10)
    cin_g = in_planes // groups
    return {
        # nn.Conv2d is constructed WITHOUT passing bias=..., so it has a bias.
        "conv_w": 0.1 * jax.random.normal(
            ks[0], (planes, cin_g, kernel_size, kernel_size), jnp.float32),
        "conv_b": 0.1 * jax.random.normal(ks[1], (planes,), jnp.float32),
        # BatchNorm2d(in_planes)
        "bn_gamma": jax.random.uniform(ks[2], (in_planes,), jnp.float32, 0.5, 1.5),
        "bn_beta": 0.1 * jax.random.normal(ks[3], (in_planes,), jnp.float32),
        "bn_mean": 0.1 * jax.random.normal(ks[4], (in_planes,), jnp.float32),
        "bn_var": jax.random.uniform(ks[5], (in_planes,), jnp.float32, 0.5, 1.5),
        # BatchNorm2d(planes) -- bnsc
        "bnsc_gamma": jax.random.uniform(ks[6], (planes,), jnp.float32, 0.5, 1.5),
        "bnsc_beta": 0.1 * jax.random.normal(ks[7], (planes,), jnp.float32),
        "bnsc_mean": 0.1 * jax.random.normal(ks[8], (planes,), jnp.float32),
        "bnsc_var": jax.random.uniform(ks[9], (planes,), jnp.float32, 0.5, 1.5),
    }


def srconv_forward(params, x, *, in_planes, planes, kernel_size=3, stride=1,
                   padding=0, groups=1, apply_relu=True, scbn=True):
    # matches: `if not isinstance(x, Tensor): x = x[0] + x[1]`
    if isinstance(x, (list, tuple)):
        x = x[0] + x[1]
    assert groups == 1  # TODO(synk): grouped conv not implemented in the kernel path.

    N, C, H, W = x.shape
    assert C == in_planes
    # TODO(synk): keep NHWC (channels padded to 128) between layers to drop these
    # NCHW<->NHWC transposes at every module boundary.
    x_nhwc = jnp.transpose(x, (0, 2, 3, 1))

    scale1 = params["bn_gamma"] / jnp.sqrt(params["bn_var"] + _EPS)
    shift1 = params["bn_beta"] - params["bn_mean"] * scale1

    # ---- out = act(conv(bn(x))), BN folded into the conv ----
    if stride == 1 and 2 * padding == kernel_size - 1:
        out_nhwc = _fused_conv_bn_act(
            x_nhwc, params["conv_w"], params["conv_b"], scale1, shift1,
            kernel_size=kernel_size, padding=padding, apply_relu=apply_relu)
    else:
        out_nhwc = _fallback_conv_bn_act(
            x_nhwc, params["conv_w"], params["conv_b"], scale1, shift1,
            kernel_size=kernel_size, stride=stride, padding=padding,
            apply_relu=apply_relu)

    # ---- residual branch (pool + pad/fold + bnsc fused into one Pallas pass) ----
    res_nhwc = _residual_branch(
        params, x_nhwc, in_planes=in_planes, planes=planes,
        kernel_size=kernel_size, stride=stride, padding=padding, scbn=scbn)

    return [jnp.transpose(out_nhwc, (0, 3, 1, 2)),
            jnp.transpose(res_nhwc, (0, 3, 1, 2))]


# ---------------------------- pure-JAX references --------------------------- #

def _reference(params, x, *, in_planes, planes, kernel_size, stride, padding, scbn):
    assert stride == 1
    b = lambda v: v[None, :, None, None]
    N, _, H, W = x.shape
    xb = (x - b(params["bn_mean"])) / jnp.sqrt(b(params["bn_var"]) + _EPS)
    xb = xb * b(params["bn_gamma"]) + b(params["bn_beta"])
    conv = jax.lax.conv_general_dilated(
        xb, params["conv_w"], (stride, stride),
        [(padding, padding), (padding, padding)],
        dimension_numbers=("NCHW", "OIHW", "NCHW"),
        precision=jax.lax.Precision.HIGHEST)
    out = jnp.maximum(conv + b(params["conv_b"]), 0.0)
    res = x
    if in_planes < planes:
        res = jnp.pad(res, ((0, 0), (0, planes - in_planes), (0, 0), (0, 0)))
    elif in_planes > planes:
        chan_pad = planes - in_planes % planes
        if chan_pad != planes:
            res = jnp.pad(res, ((0, 0), (0, chan_pad), (0, 0), (0, 0)))
        g = res.shape[1] // planes
        res = res.reshape(N, g, planes, H, W).sum(axis=1)
    if scbn or in_planes != planes or stride != 1:
        res = (res - b(params["bnsc_mean"])) / jnp.sqrt(b(params["bnsc_var"]) + _EPS)
        res = res * b(params["bnsc_gamma"]) + b(params["bnsc_beta"])
    return out, res


def _bf16_matched_conv_ref(params, x, *, kernel_size, stride, padding,
                           apply_relu=True):
    """Conv-branch reference with the SAME bf16 rounding of x and folded weights."""
    scale1 = params["bn_gamma"] / jnp.sqrt(params["bn_var"] + _EPS)
    shift1 = params["bn_beta"] - params["bn_mean"] * scale1
    xq = x.astype(jnp.bfloat16).astype(jnp.float32)
    wq = (params["conv_w"] * scale1[None, :, None, None]).astype(
        jnp.bfloat16).astype(jnp.float32)
    conv1 = jax.lax.conv_general_dilated(
        xq, wq, (stride, stride), [(padding, padding), (padding, padding)],
        dimension_numbers=("NCHW", "OIHW", "NCHW"),
        precision=jax.lax.Precision.HIGHEST)
    shift_img = jnp.broadcast_to(shift1[None, :, None, None], x.shape)
    conv2 = jax.lax.conv_general_dilated(
        shift_img, params["conv_w"], (stride, stride),
        [(padding, padding), (padding, padding)],
        dimension_numbers=("NCHW", "OIHW", "NCHW"),
        precision=jax.lax.Precision.HIGHEST)
    out = conv1 + conv2 + params["conv_b"][None, :, None, None]
    return jnp.maximum(out, 0.0) if apply_relu else out


def _run_case(key, *, in_planes, planes, kernel_size, stride, padding, scbn):
    kp, kx = jax.random.split(key)
    params = init_srconv_params(kp, in_planes, planes, kernel_size)
    x = jax.random.normal(kx, (2, in_planes, 16, 16), jnp.float32)

    out, res = srconv_forward(
        params, x, in_planes=in_planes, planes=planes, kernel_size=kernel_size,
        stride=stride, padding=padding, groups=1, apply_relu=True, scbn=scbn)
    out = jax.block_until_ready(out)
    res = jax.block_until_ready(res)

    N, _, H, W = x.shape
    assert out.shape == (N, planes, H, W) and res.shape == (N, planes, H, W)

    ref_out, ref_res = _reference(
        params, x, in_planes=in_planes, planes=planes, kernel_size=kernel_size,
        stride=stride, padding=padding, scbn=scbn)
    matched_out = _bf16_matched_conv_ref(
        params, x, kernel_size=kernel_size, stride=stride, padding=padding)

    # Residual branch is pure f32 -> tight tolerance.
    assert jnp.allclose(res, ref_res, atol=1e-4, rtol=1e-4)
    # Conv branch vs a reference applying identical bf16 rounding -> tight.
    assert jnp.allclose(out, matched_out, atol=2e-3, rtol=2e-3)
    # Conv branch vs the pure-f32 reference -> bf16-level tolerance.
    assert jnp.allclose(out, ref_out, atol=3e-2, rtol=3e-2)


if __name__ == "__main__":
    key = jax.random.PRNGKey(0)
    k1, k2 = jax.random.split(key)
    # DenseNet growth case: in_planes < planes, 3x3 stride-1 "same" conv.
    _run_case(k1, in_planes=4, planes=8, kernel_size=3, stride=1, padding=1, scbn=True)
    # Channel-fold residual case: in_planes > planes.
    _run_case(k2, in_planes=8, planes=4, kernel_size=3, stride=1, padding=1, scbn=True)
    print("KERNEL_OK")
</pallas_src>

<mosaic_0001>
module attributes {stable_mosaic.version = 11 : i64} {
  func.func @_conv_im2col_kernel(%arg0: i32, %arg1: memref<1x256x4xbf16, #tpu.memory_space<vmem>>, %arg2: memref<36x128xbf16, #tpu.memory_space<vmem>>, %arg3: memref<256x128xf32, #tpu.memory_space<vmem>>, %arg4: memref<256x9xf32, #tpu.memory_space<vmem>>, %arg5: memref<1x256x128xf32, #tpu.memory_space<vmem>>, %arg6: memref<256x36xbf16, #tpu.memory_space<vmem>>) attributes {dimension_semantics = [#tpu.dimension_semantics<parallel>], iteration_bounds = array<i64: 2>, scalar_prefetch = 0 : i64, scratch_operands = 1 : i64, tpu.core_type = #tpu.core_type<tc>, window_params = [{transform_indices = @transform_0, window_bounds = array<i64: 1, 256, 4>}, {pipeline_mode = #tpu.pipeline_mode<synchronous>, transform_indices = @transform_1, window_bounds = array<i64: 36, 128>}, {pipeline_mode = #tpu.pipeline_mode<synchronous>, transform_indices = @transform_2, window_bounds = array<i64: 256, 128>}, {pipeline_mode = #tpu.pipeline_mode<synchronous>, transform_indices = @transform_3, window_bounds = array<i64: 256, 9>}, {transform_indices = @transform_4, window_bounds = array<i64: 1, 256, 128>}]} {
    %c0 = arith.constant 0 : index
    %c0_0 = arith.constant 0 : index
    %c0_1 = arith.constant 0 : index
    %0 = vector.load %arg1[%c0, %c0_0, %c0_1] : memref<1x256x4xbf16, #tpu.memory_space<vmem>>, vector<1x256x4xbf16>
    %1 = vector.shape_cast %0 : vector<1x256x4xbf16> to vector<256x4xbf16>
    %2 = arith.extf %1 : vector<256x4xbf16> to vector<256x4xf32>
    %3 = vector.extract_strided_slice %2 {offsets = [239, 0], sizes = [17, 4], strides = [1, 1]} : vector<256x4xf32> to vector<17x4xf32>
    %4 = vector.extract_strided_slice %2 {offsets = [0, 0], sizes = [239, 4], strides = [1, 1]} : vector<256x4xf32> to vector<239x4xf32>
    %5 = tpu.concatenate %3, %4 in 0 : vector<17x4xf32>, vector<239x4xf32> -> vector<256x4xf32>
    %c0_2 = arith.constant 0 : index
    %c0_3 = arith.constant 0 : index
    %6 = vector.load %arg4[%c0_2, %c0_3] : memref<256x9xf32, #tpu.memory_space<vmem>>, vector<256x1xf32>
    %cst = arith.constant 5.000000e-01 : f32
    %7 = vector.broadcast %cst : f32 to vector<256x1xf32>
    %8 = arith.cmpf ogt, %6, %7 : vector<256x1xf32>
    %cst_4 = arith.constant 0.000000e+00 : f32
    %9 = vector.broadcast %cst_4 : f32 to vector<256x4xf32>
    %10 = vector.shape_cast %8 : vector<256x1xi1> to vector<256x1xi1>
    %11 = vector.broadcast %10 : vector<256x1xi1> to vector<256x4xi1>
    %12 = arith.select %11, %5, %9 : vector<256x4xi1>, vector<256x4xf32>
    %13 = arith.truncf %12 : vector<256x4xf32> to vector<256x4xbf16>
    %c0_5 = arith.constant 0 : index
    %c0_6 = arith.constant 0 : index
    %14 = vector.load %arg6[%c0_5, %c0_6] : memref<256x36xbf16, #tpu.memory_space<vmem>>, vector<256x4xbf16>
    tpu.vector_store %arg6[%c0_5, %c0_6], %13 {strides = array<i32>} : memref<256x36xbf16, #tpu.memory_space<vmem>>, vector<256x4xbf16>,
    %15 = vector.extract_strided_slice %2 {offsets = [240, 0], sizes = [16, 4], strides = [1, 1]} : vector<256x4xf32> to vector<16x4xf32>
    %16 = vector.extract_strided_slice %2 {offsets = [0, 0], sizes = [240, 4], strides = [1, 1]} : vector<256x4xf32> to vector<240x4xf32>
    %17 = tpu.concatenate %15, %16 in 0 : vector<16x4xf32>, vector<240x4xf32> -> vector<256x4xf32>
    %c0_7 = arith.constant 0 : index
    %c1 = arith.constant 1 : index
    %18 = vector.load %arg4[%c0_7, %c1] : memref<256x9xf32, #tpu.memory_space<vmem>>, vector<256x1xf32>
    %cst_8 = arith.constant 5.000000e-01 : f32
    %19 = vector.broadcast %cst_8 : f32 to vector<256x1xf32>
    %20 = arith.cmpf ogt, %18, %19 : vector<256x1xf32>
    %cst_9 = arith.constant 0.000000e+00 : f32
    %21 = vector.broadcast %cst_9 : f32 to vector<256x4xf32>
    %22 = vector.shape_cast %20 : vector<256x1xi1> to vector<256x1xi1>
    %23 = vector.broadcast %22 : vector<256x1xi1> to vector<256x4xi1>
    %24 = arith.select %23, %17, %21 : vector<256x4xi1>, vector<256x4xf32>
    %25 = arith.truncf %24 : vector<256x4xf32> to vector<256x4xbf16>
    %c0_10 = arith.constant 0 : index
    %c4 = arith.constant 4 : index
    %26 = vector.load %arg6[%c0_10, %c4] : memref<256x36xbf16, #tpu.memory_space<vmem>>, vector<256x4xbf16>
    tpu.vector_store %arg6[%c0_10, %c4], %25 {strides = array<i32>} : memref<256x36xbf16, #tpu.memory_space<vmem>>, vector<256x4xbf16>,
    %27 = vector.extract_strided_slice %2 {offsets = [241, 0], sizes = [15, 4], strides = [1, 1]} : vector<256x4xf32> to vector<15x4xf32>
    %28 = vector.extract_strided_slice %2 {offsets = [0, 0], sizes = [241, 4], strides = [1, 1]} : vector<256x4xf32> to vector<241x4xf32>
    %29 = tpu.concatenate %27, %28 in 0 : vector<15x4xf32>, vector<241x4xf32> -> vector<256x4xf32>
    %c0_11 = arith.constant 0 : index
    %c2 = arith.constant 2 : index
    %30 = vector.load %arg4[%c0_11, %c2] : memref<256x9xf32, #tpu.memory_space<vmem>>, vector<256x1xf32>
    %cst_12 = arith.constant 5.000000e-01 : f32
    %31 = vector.broadcast %cst_12 : f32 to vector<256x1xf32>
    %32 = arith.cmpf ogt, %30, %31 : vector<256x1xf32>
    %cst_13 = arith.constant 0.000000e+00 : f32
    %33 = vector.broadcast %cst_13 : f32 to vector<256x4xf32>
    %34 = vector.shape_cast %32 : vector<256x1xi1> to vector<256x1xi1>
    %35 = vector.broadcast %34 : vector<256x1xi1> to vector<256x4xi1>
    %36 = arith.select %35, %29, %33 : vector<256x4xi1>, vector<256x4xf32>
    %37 = arith.truncf %36 : vector<256x4xf32> to vector<256x4xbf16>
    %c0_14 = arith.constant 0 : index
    %c8 = arith.constant 8 : index
    %38 = vector.load %arg6[%c0_14, %c8] : memref<256x36xbf16, #tpu.memory_space<vmem>>, vector<256x4xbf16>
    tpu.vector_store %arg6[%c0_14, %c8], %37 {strides = array<i32>} : memref<256x36xbf16, #tpu.memory_space<vmem>>, vector<256x4xbf16>,
    %39 = vector.extract_strided_slice %2 {offsets = [255, 0], sizes = [1, 4], strides = [1, 1]} : vector<256x4xf32> to vector<1x4xf32>
    %40 = vector.extract_strided_slice %2 {offsets = [0, 0], sizes = [255, 4], strides = [1, 1]} : vector<256x4xf32> to vector<255x4xf32>
    %41 = tpu.concatenate %39, %40 in 0 : vector<1x4xf32>, vector<255x4xf32> -> vector<256x4xf32>
    %c0_15 = arith.constant 0 : index
    %c3 = arith.constant 3 : index
    %42 = vector.load %arg4[%c0_15, %c3] : memref<256x9xf32, #tpu.memory_space<vmem>>, vector<256x1xf32>
    %cst_16 = arith.constant 5.000000e-01 : f32
    %43 = vector.broadcast %cst_16 : f32 to vector<256x1xf32>
    %44 = arith.cmpf ogt, %42, %43 : vector<256x1xf32>
    %cst_17 = arith.constant 0.000000e+00 : f32
    %45 = vector.broadcast %cst_17 : f32 to vector<256x4xf32>
    %46 = vector.shape_cast %44 : vector<256x1xi1> to vector<256x1xi1>
    %47 = vector.broadcast %46 : vector<256x1xi1> to vector<256x4xi1>
    %48 = arith.select %47, %41, %45 : vector<256x4xi1>, vector<256x4xf32>
    %49 = arith.truncf %48 : vector<256x4xf32> to vector<256x4xbf16>
    %c0_18 = arith.constant 0 : index
    %c12 = arith.constant 12 : index
    %50 = vector.load %arg6[%c0_18, %c12] : memref<256x36xbf16, #tpu.memory_space<vmem>>, vector<256x4xbf16>
    tpu.vector_store %arg6[%c0_18, %c12], %49 {strides = array<i32>} : memref<256x36xbf16, #tpu.memory_space<vmem>>, vector<256x4xbf16>,
    %51 = arith.truncf %2 : vector<256x4xf32> to vector<256x4xbf16>
    %c0_19 = arith.constant 0 : index
    %c16 = arith.constant 16 : index
    %52 = vector.load %arg6[%c0_19, %c16] : memref<256x36xbf16, #tpu.memory_space<vmem>>, vector<256x4xbf16>
    tpu.vector_store %arg6[%c0_19, %c16], %51 {strides = array<i32>} : memref<256x36xbf16, #tpu.memory_space<vmem>>, vector<256x4xbf16>,
    %53 = vector.extract_strided_slice %2 {offsets = [1, 0], sizes = [255, 4], strides = [1, 1]} : vector<256x4xf32> to vector<255x4xf32>
    %54 = vector.extract_strided_slice %2 {offsets = [0, 0], sizes = [1, 4], strides = [1, 1]} : vector<256x4xf32> to vector<1x4xf32>
    %55 = tpu.concatenate %53, %54 in 0 : vector<255x4xf32>, vector<1x4xf32> -> vector<256x4xf32>
    %c0_20 = arith.constant 0 : index
    %c5 = arith.constant 5 : index
    %56 = vector.load %arg4[%c0_20, %c5] : memref<256x9xf32, #tpu.memory_space<vmem>>, vector<256x1xf32>
    %cst_21 = arith.constant 5.000000e-01 : f32
    %57 = vector.broadcast %cst_21 : f32 to vector<256x1xf32>
    %58 = arith.cmpf ogt, %56, %57 : vector<256x1xf32>
    %cst_22 = arith.constant 0.000000e+00 : f32
    %59 = vector.broadcast %cst_22 : f32 to vector<256x4xf32>
    %60 = vector.shape_cast %58 : vector<256x1xi1> to vector<256x1xi1>
    %61 = vector.broadcast %60 : vector<256x1xi1> to vector<256x4xi1>
    %62 = arith.select %61, %55, %59 : vector<256x4xi1>, vector<256x4xf32>
    %63 = arith.truncf %62 : vector<256x4xf32> to vector<256x4xbf16>
    %c0_23 = arith.constant 0 : index
    %c20 = arith.constant 20 : index
    %64 = vector.load %arg6[%c0_23, %c20] : memref<256x36xbf16, #tpu.memory_space<vmem>>, vector<256x4xbf16>
    tpu.vector_store %arg6[%c0_23, %c20], %63 {strides = array<i32>} : memref<256x36xbf16, #tpu.memory_space<vmem>>, vector<256x4xbf16>,
    %65 = vector.extract_strided_slice %2 {offsets = [15, 0], sizes = [241, 4], strides = [1, 1]} : vector<256x4xf32> to vector<241x4xf32>
    %66 = vector.extract_strided_slice %2 {offsets = [0, 0], sizes = [15, 4], strides = [1, 1]} : vector<256x4xf32> to vector<15x4xf32>
    %67 = tpu.concatenate %65, %66 in 0 : vector<241x4xf32>, vector<15x4xf32> -> vector<256x4xf32>
    %c0_24 = arith.constant 0 : index
    %c6 = arith.constant 6 : index
    %68 = vector.load %arg4[%c0_24, %c6] : memref<256x9xf32, #tpu.memory_space<vmem>>, vector<256x1xf32>
    %cst_25 = arith.constant 5.000000e-01 : f32
    %69 = vector.broadcast %cst_25 : f32 to vector<256x1xf32>
    %70 = arith.cmpf ogt, %68, %69 : vector<256x1xf32>
    %cst_26 = arith.constant 0.000000e+00 : f32
    %71 = vector.broadcast %cst_26 : f32 to vector<256x4xf32>
    %72 = vector.shape_cast %70 : vector<256x1xi1> to vector<256x1xi1>
    %73 = vector.broadcast %72 : vector<256x1xi1> to vector<256x4xi1>
    %74 = arith.select %73, %67, %71 : vector<256x4xi1>, vector<256x4xf32>
    %75 = arith.truncf %74 : vector<256x4xf32> to vector<256x4xbf16>
    %c0_27 = arith.constant 0 : index
    %c24 = arith.constant 24 : index
    %76 = vector.load %arg6[%c0_27, %c24] : memref<256x36xbf16, #tpu.memory_space<vmem>>, vector<256x4xbf16>
    tpu.vector_store %arg6[%c0_27, %c24], %75 {strides = array<i32>} : memref<256x36xbf16, #tpu.memory_space<vmem>>, vector<256x4xbf16>,
    %77 = vector.extract_strided_slice %2 {offsets = [16, 0], sizes = [240, 4], strides = [1, 1]} : vector<256x4xf32> to vector<240x4xf32>
    %78 = vector.extract_strided_slice %2 {offsets = [0, 0], sizes = [16, 4], strides = [1, 1]} : vector<256x4xf32> to vector<16x4xf32>
    %79 = tpu.concatenate %77, %78 in 0 : vector<240x4xf32>, vector<16x4xf32> -> vector<256x4xf32>
    %c0_28 = arith.constant 0 : index
    %c7 = arith.constant 7 : index
    %80 = vector.load %arg4[%c0_28, %c7] : memref<256x9xf32, #tpu.memory_space<vmem>>, vector<256x1xf32>
    %cst_29 = arith.constant 5.000000e-01 : f32
    %81 = vector.broadcast %cst_29 : f32 to vector<256x1xf32>
    %82 = arith.cmpf ogt, %80, %81 : vector<256x1xf32>
    %cst_30 = arith.constant 0.000000e+00 : f32
    %83 = vector.broadcast %cst_30 : f32 to vector<256x4xf32>
    %84 = vector.shape_cast %82 : vector<256x1xi1> to vector<256x1xi1>
    %85 = vector.broadcast %84 : vector<256x1xi1> to vector<256x4xi1>
    %86 = arith.select %85, %79, %83 : vector<256x4xi1>, vector<256x4xf32>
    %87 = arith.truncf %86 : vector<256x4xf32> to vector<256x4xbf16>
    %c0_31 = arith.constant 0 : index
    %c28 = arith.constant 28 : index
    %88 = vector.load %arg6[%c0_31, %c28] : memref<256x36xbf16, #tpu.memory_space<vmem>>, vector<256x4xbf16>
    tpu.vector_store %arg6[%c0_31, %c28], %87 {strides = array<i32>} : memref<256x36xbf16, #tpu.memory_space<vmem>>, vector<256x4xbf16>,
    %89 = vector.extract_strided_slice %2 {offsets = [17, 0], sizes = [239, 4], strides = [1, 1]} : vector<256x4xf32> to vector<239x4xf32>
    %90 = vector.extract_strided_slice %2 {offsets = [0, 0], sizes = [17, 4], strides = [1, 1]} : vector<256x4xf32> to vector<17x4xf32>
    %91 = tpu.concatenate %89, %90 in 0 : vector<239x4xf32>, vector<17x4xf32> -> vector<256x4xf32>
    %c0_32 = arith.constant 0 : index
    %c8_33 = arith.constant 8 : index
    %92 = vector.load %arg4[%c0_32, %c8_33] : memref<256x9xf32, #tpu.memory_space<vmem>>, vector<256x1xf32>
    %cst_34 = arith.constant 5.000000e-01 : f32
    %93 = vector.broadcast %cst_34 : f32 to vector<256x1xf32>
    %94 = arith.cmpf ogt, %92, %93 : vector<256x1xf32>
    %cst_35 = arith.constant 0.000000e+00 : f32
    %95 = vector.broadcast %cst_35 : f32 to vector<256x4xf32>
    %96 = vector.shape_cast %94 : vector<256x1xi1> to vector<256x1xi1>
    %97 = vector.broadcast %96 : vector<256x1xi1> to vector<256x4xi1>
    %98 = arith.select %97, %91, %95 : vector<256x4xi1>, vector<256x4xf32>
    %99 = arith.truncf %98 : vector<256x4xf32> to vector<256x4xbf16>
    %c0_36 = arith.constant 0 : index
    %c32 = arith.constant 32 : index
    %100 = vector.load %arg6[%c0_36, %c32] : memref<256x36xbf16, #tpu.memory_space<vmem>>, vector<256x4xbf16>
    tpu.vector_store %arg6[%c0_36, %c32], %99 {strides = array<i32>} : memref<256x36xbf16, #tpu.memory_space<vmem>>, vector<256x4xbf16>,
    %c0_37 = arith.constant 0 : index
    %c0_38 = arith.constant 0 : index
    %101 = vector.load %arg6[%c0_37, %c0_38] : memref<256x36xbf16, #tpu.memory_space<vmem>>, vector<256x36xbf16>
    %c0_39 = arith.constant 0 : index
    %c0_40 = arith.constant 0 : index
    %102 = vector.load %arg2[%c0_39, %c0_40] : memref<36x128xbf16, #tpu.memory_space<vmem>>, vector<36x128xbf16>
    %cst_41 = arith.constant dense<0.000000e+00> : vector<256x128xf32>
    %103 = tpu.matmul %101, %102, %cst_41 {dimension_numbers = #tpu.dot_dimension_numbers<[1], [0], [0], [1], [0, 0, 1, 1], [], []>} : vector<256x36xbf16>, vector<36x128xbf16>, vector<256x128xf32> -> vector<256x128xf32>
    %c0_42 = arith.constant 0 : index
    %c0_43 = arith.constant 0 : index
    %104 = vector.load %arg3[%c0_42, %c0_43] : memref<256x128xf32, #tpu.memory_space<vmem>>, vector<256x128xf32>
    %105 = arith.addf %103, %104 : vector<256x128xf32>
    %cst_44 = arith.constant 0.000000e+00 : f32
    %106 = vector.broadcast %cst_44 : f32 to vector<256x128xf32>
    %107 = arith.maximumf %105, %106 : vector<256x128xf32>
    %c0_45 = arith.constant 0 : index
    %c0_46 = arith.constant 0 : index
    %c0_47 = arith.constant 0 : index
    %108 = vector.load %arg5[%c0_45, %c0_46, %c0_47] : memref<1x256x128xf32, #tpu.memory_space<vmem>>, vector<1x256x128xf32>
    %109 = vector.shape_cast %108 : vector<1x256x128xf32> to vector<256x128xf32>
    %110 = vector.shape_cast %107 : vector<256x128xf32> to vector<1x256x128xf32>
    tpu.vector_store %arg5[%c0_45, %c0_46, %c0_47], %110 {strides = array<i32>} : memref<1x256x128xf32, #tpu.memory_space<vmem>>, vector<1x256x128xf32>,
    return
  }
  func.func @transform_0(%arg0: i32) -> (i32, i32, i32) {
    %c0_i32 = arith.constant 0 : i32
    %c0_i32_0 = arith.constant 0 : i32
    %c0_i32_1 = arith.constant 0 : i32
    return %arg0, %c0_i32, %c0_i32_0 : i32, i32, i32
  }
  func.func @transform_1(%arg0: i32) -> (i32, i32) {
    %c0_i32 = arith.constant 0 : i32
    %c0_i32_0 = arith.constant 0 : i32
    %c0_i32_1 = arith.constant 0 : i32
    return %c0_i32, %c0_i32_0 : i32, i32
  }
  func.func @transform_2(%arg0: i32) -> (i32, i32) {
    %c0_i32 = arith.constant 0 : i32
    %c0_i32_0 = arith.constant 0 : i32
    %c0_i32_1 = arith.constant 0 : i32
    return %c0_i32, %c0_i32_0 : i32, i32
  }
  func.func @transform_3(%arg0: i32) -> (i32, i32) {
    %c0_i32 = arith.constant 0 : i32
    %c0_i32_0 = arith.constant 0 : i32
    %c0_i32_1 = arith.constant 0 : i32
    return %c0_i32, %c0_i32_0 : i32, i32
  }
  func.func @transform_4(%arg0: i32) -> (i32, i32, i32) {
    %c0_i32 = arith.constant 0 : i32
    %c0_i32_0 = arith.constant 0 : i32
    %c0_i32_1 = arith.constant 0 : i32
    return %arg0, %c0_i32, %c0_i32_0 : i32, i32, i32
  }
}

</mosaic_0001>

<bundles_post_ra>
// kernel: tpu_custom_call.1
= control target key start
LH: loop header
LB: loop body
LE: loop exit
PB: predicated region body
PF: predicated region fallthrough
CT: control target
= control target key end

     0   :  { %9 = vsyncpa [#allocation4], 0  ;;  %s8278_s0 = inlined_call_operand.vmem [shape: bf16[2,256,4], index: 0, kind: input, shape index: {}]   ;;  %s8279_s1 = inlined_call_operand.vmem [shape: bf16[36,128], index: 1, kind: input, shape index: {}]   ;;  %s8280_s2 = inlined_call_operand.vmem [shape: f32[256,128], index: 2, kind: input, shape index: {}]   ;;  %s8281_s3 = inlined_call_operand.vmem [shape: f32[256,9], index: 3, kind: input, shape index: {}]   ;;  %s8282_s4 = inlined_call_operand.hbm [shape: f32[2,256,128], index: 4, kind: output, shape index: {}]  }
   0x1   :  { %11 = vsyncpa [#allocation4 + $0x1], 0  ;;  %s5812_s15 = smov 0   ;;  %s5814_s16 = smov 0  }
   0x2   :  { %s5816_s17 = smov 0   ;;  %s5818_s18 = smov 0  }
   0x3 LB: > { %s5833_s19 = sadd.s32 4294967295, %s5767_s18   ;;  %s4952_s20 = sadd.s32 4294967294, %s5767_s18   ;;  %s5767_s18 = sphi %s5818_s18, %s8637_s18   ;;  %s5763_s17 = sphi %s5816_s17, %s8636_s17   ;;  %s5759_s16 = sphi %s5814_s16, %s8635_s16   ;;  %s5755_s15 = sphi %s5812_s15, %s8634_s15  }
   0x4   : > { %s5837_s21 = sadd.s32 1, %s5767_s18   ;;  %s113_s22 = sadd.s32 1, %s5763_s17 }
   0x5   : > { %s110_s23 = ssub.s32 %s5767_s18, %s5837_s21  ;;  %p123_p0 = scmp.ne.s32.totalorder %s5763_s17, %s5759_s16 }
   0x6   : > { %p111_p1 = scmp.eq.s32.totalorder %s110_s23, 0  ;;  %p124_p2 = scmp.eq.s32.totalorder %s5833_s19, 1 }
   0x7   : > { %p129_p3 = scmp.ne.s32.totalorder %s5759_s16, %s5755_s15  ;;  %p130_p4 = scmp.eq.s32.totalorder %s4952_s20, 1 }
   0x8   : > { %s5848_s24 = scalar_select %p111_p1, %s5763_s17, %s113_s22  }
   0x9   : > { %p5850_p5 = por %p124_p2, %p123_p0  ;;  %p5854_p6 = por %p130_p4, %p129_p3 }
   0xa   : > { %p4955_p7 = scmp.ge.s32.totalorder %s5767_s18, 1  ;;  %p165_p8 = scmp.lt.s32.totalorder %s5767_s18, 3 }
   0xc   : > { %p166_p9 = pnand %p4955_p7, %p165_p8 }
   0xe   : > { %169 = sbr.rel (%p166_p9) target bundleno = 1748 (0x6d4), region = 36 }
  0x13   : > { %v393_v0 = vld [vmem:[%s8281_s3 + $0x10] sm:$0xff]  ;;  %v391_v1 = vld [vmem:[%s8281_s3] sm:$0xff]  ;;  %v394_v2 = vld [vmem:[%s8281_s3 + $0x18] sm:$0xff]  ;;  %v8283_v3 = vmov 0   ;;  %p191_p10 = scmp.lt.s32.totalorder %s5833_s19, 1  ;;  %s5772_s28 = smov 4  }
  0x14   : > { %5635 = vset.pattern.permute.xlu1 %v8283_v3  ;;  %5634 = vset.pattern.permute.xlu0 %v8283_v3  ;;  %vm425_vm0 = vcmp.gt.f32.partialorder %v393_v0, 0.5  ;;  %vm423_vm1 = vcmp.gt.f32.partialorder %v391_v1, 0.5  ;;  %vm426_vm2 = vcmp.gt.f32.partialorder %v394_v2, 0.5  ;;  %v392_v4 = vld [vmem:[%s8281_s3 + $0x8] sm:$0xff]  ;;  %v395_v8 = vld [vmem:[%s8281_s3 + $0x20] sm:$0xff]  ;;  %v398_v11 = vld [vmem:[%s8281_s3 + $0x38] sm:$0xff] }
  0x15   : > { %v5875_v5 = vsel %vm425_vm0, 1, %v8283_v3  ;;  %v5878_v6 = vsel %vm423_vm1, 1, %v8283_v3  ;;  %vm424_vm3 = vcmp.gt.f32.partialorder %v392_v4, 0.5  ;;  %v396_v7 = vld [vmem:[%s8281_s3 + $0x28] sm:$0xff]  ;;  %v5889_v9 = vsel %vm426_vm2, 1, %v8283_v3  ;;  %v397_v12 = vld [vmem:[%s8281_s3 + $0x30] sm:$0xff] }
  0x16   : > { %494 = vperm.xlu1 %5635, %v5875_v5   ;;  %488 = vperm.xlu0 %5634, %v5878_v6   ;;  %v5892_v10 = vsel %vm424_vm3, 1, %v8283_v3  ;;  %vm428_vm4 = vcmp.gt.f32.partialorder %v396_v7, 0.5  ;;  %vm427_vm5 = vcmp.gt.f32.partialorder %v395_v8, 0.5  ;;  %vm430_vm6 = vcmp.gt.f32.partialorder %v398_v11, 0.5  ;;  %v400_v15 = vld [vmem:[%s8281_s3 + $0x48] sm:$0xff]  ;;  %v399_v16 = vld [vmem:[%s8281_s3 + $0x40] sm:$0xff] }
  0x17   : > { %v5903_v13 = vsel %vm428_vm4, 1, %v8283_v3  ;;  %v5906_v14 = vsel %vm427_vm5, 1, %v8283_v3  ;;  %vm429_vm7 = vcmp.gt.f32.partialorder %v397_v12, 0.5  ;;  %v5917_v17 = vsel %vm430_vm6, 1, %v8283_v3  ;;  %v402_v19 = vld [vmem:[%s8281_s3 + $0x58] sm:$0xff]  ;;  %v401_v20 = vld [vmem:[%s8281_s3 + $0x50] sm:$0xff] }
  0x18   : > { %v5920_v18 = vsel %vm429_vm7, 1, %v8283_v3  ;;  %vm432_vm8 = vcmp.gt.f32.partialorder %v400_v15, 0.5  ;;  %vm431_vm9 = vcmp.gt.f32.partialorder %v399_v16, 0.5  ;;  %vm434_vm10 = vcmp.gt.f32.partialorder %v402_v19, 0.5  ;;  %v404_v23 = vld [vmem:[%s8281_s3 + $0x68] sm:$0xff]  ;;  %v403_v24 = vld [vmem:[%s8281_s3 + $0x60] sm:$0xff] }
  0x19   : > { %v5931_v21 = vsel %vm432_vm8, 1, %v8283_v3  ;;  %v5934_v22 = vsel %vm431_vm9, 1, %v8283_v3  ;;  %vm433_vm11 = vcmp.gt.f32.partialorder %v401_v20, 0.5  ;;  %v5945_v25 = vsel %vm434_vm10, 1, %v8283_v3  ;;  %v406_v27 = vld [vmem:[%s8281_s3 + $0x78] sm:$0xff]  ;;  %v405_v28 = vld [vmem:[%s8281_s3 + $0x70] sm:$0xff] }
  0x1a   : > { %497 = vperm.xlu1 %5635, %v5889_v9   ;;  %491 = vperm.xlu0 %5634, %v5892_v10   ;;  %v5948_v26 = vsel %vm433_vm11, 1, %v8283_v3  ;;  %vm436_vm12 = vcmp.gt.f32.partialorder %v404_v23, 0.5  ;;  %vm435_vm13 = vcmp.gt.f32.partialorder %v403_v24, 0.5  ;;  %vm438_vm14 = vcmp.gt.f32.partialorder %v406_v27, 0.5  ;;  %v408_v31 = vld [vmem:[%s8281_s3 + $0x88] sm:$0xff]  ;;  %v407_v32 = vld [vmem:[%s8281_s3 + $0x80] sm:$0xff] }
  0x1b   : > { %v5959_v29 = vsel %vm436_vm12, 1, %v8283_v3  ;;  %v5962_v30 = vsel %vm435_vm13, 1, %v8283_v3  ;;  %vm437_vm15 = vcmp.gt.f32.partialorder %v405_v28, 0.5  ;;  %v5973_v33 = vsel %vm438_vm14, 1, %v8283_v3  ;;  %v410_v35 = vld [vmem:[%s8281_s3 + $0x98] sm:$0xff]  ;;  %v409_v36 = vld [vmem:[%s8281_s3 + $0x90] sm:$0xff] }
  0x1c   : > { %v5976_v34 = vsel %vm437_vm15, 1, %v8283_v3  ;;  %vm440_vm0 = vcmp.gt.f32.partialorder %v408_v31, 0.5  ;;  %vm439_vm1 = vcmp.gt.f32.partialorder %v407_v32, 0.5  ;;  %vm442_vm2 = vcmp.gt.f32.partialorder %v410_v35, 0.5  ;;  %v412_v39 = vld [vmem:[%s8281_s3 + $0xa8] sm:$0xff]  ;;  %v411_v40 = vld [vmem:[%s8281_s3 + $0xa0] sm:$0xff] }
  0x1d   : > { %v5987_v37 = vsel %vm440_vm0, 1, %v8283_v3  ;;  %v5990_v38 = vsel %vm439_vm1, 1, %v8283_v3  ;;  %vm441_vm3 = vcmp.gt.f32.partialorder %v409_v36, 0.5  ;;  %v6001_v41 = vsel %vm442_vm2, 1, %v8283_v3  ;;  %v414_v43 = vld [vmem:[%s8281_s3 + $0xb8] sm:$0xff]  ;;  %v413_v44 = vld [vmem:[%s8281_s3 + $0xb0] sm:$0xff] }
  0x1e   : > { %503 = vperm.xlu1 %5635, %v5903_v13   ;;  %500 = vperm.xlu0 %5634, %v5906_v14   ;;  %v6004_v42 = vsel %vm441_vm3, 1, %v8283_v3  ;;  %vm444_vm4 = vcmp.gt.f32.partialorder %v412_v39, 0.5  ;;  %vm443_vm5 = vcmp.gt.f32.partialorder %v411_v40, 0.5  ;;  %vm446_vm6 = vcmp.gt.f32.partialorder %v414_v43, 0.5  ;;  %v416_v47 = vld [vmem:[%s8281_s3 + $0xc8] sm:$0xff]  ;;  %v415_v48 = vld [vmem:[%s8281_s3 + $0xc0] sm:$0xff] }
  0x1f   : > { %v6015_v45 = vsel %vm444_vm4, 1, %v8283_v3  ;;  %v6018_v46 = vsel %vm443_vm5, 1, %v8283_v3  ;;  %vm445_vm7 = vcmp.gt.f32.partialorder %v413_v44, 0.5  ;;  %v6029_v49 = vsel %vm446_vm6, 1, %v8283_v3  ;;  %v418_v51 = vld [vmem:[%s8281_s3 + $0xd8] sm:$0xff]  ;;  %v417_v52 = vld [vmem:[%s8281_s3 + $0xd0] sm:$0xff] }
  0x20   : > { %v477_v50 = vsel %vm445_vm7, 1, %v8283_v3  ;;  %vm448_vm8 = vcmp.gt.f32.partialorder %v416_v47, 0.5  ;;  %vm447_vm9 = vcmp.gt.f32.partialorder %v415_v48, 0.5  ;;  %vm450_vm10 = vcmp.gt.f32.partialorder %v418_v51, 0.5  ;;  %v420_v55 = vld [vmem:[%s8281_s3 + $0xe8] sm:$0xff]  ;;  %v419_v56 = vld [vmem:[%s8281_s3 + $0xe0] sm:$0xff] }
  0x21   : > { %v480_v53 = vsel %vm448_vm8, 1, %v8283_v3  ;;  %v479_v54 = vsel %vm447_vm9, 1, %v8283_v3  ;;  %vm449_vm11 = vcmp.gt.f32.partialorder %v417_v52, 0.5  ;;  %v482_v57 = vsel %vm450_vm10, 1, %v8283_v3  ;;  %v422_v59 = vld [vmem:[%s8281_s3 + $0xf8] sm:$0xff]  ;;  %v421_v60 = vld [vmem:[%s8281_s3 + $0xf0] sm:$0xff] }
  0x22   : > { %509 = vperm.xlu1 %5635, %v5917_v17   ;;  %506 = vperm.xlu0 %5634, %v5920_v18   ;;  %v481_v58 = vsel %vm449_vm11, 1, %v8283_v3  ;;  %vm452_vm12 = vcmp.gt.f32.partialorder %v420_v55, 0.5  ;;  %vm451_vm13 = vcmp.gt.f32.partialorder %v419_v56, 0.5  ;;  %vm454_vm14 = vcmp.gt.f32.partialorder %v422_v59, 0.5  ;;  %s192_s14 = scalar_select %p191_p10, %s5833_s19, 1 }
  0x23   : > { %v6056_v61 = vsel %vm452_vm12, 1, %v8283_v3  ;;  %v483_v62 = vsel %vm451_vm13, 1, %v8283_v3  ;;  %vm453_vm15 = vcmp.gt.f32.partialorder %v421_v60, 0.5  ;;  %v6061_v63 = vsel %vm454_vm14, 1, %v8283_v3  ;;  %s5774_s29 = smov 8   ;;  %s5775_s30 = smov 12  }
  0x24   : > { %v6064_v0 = vsel %vm453_vm15, 1, %v8283_v3  ;;  %v5770_v1 = vmov 1   ;;  %s5255_s20 = sshll.u32 %s192_s14, 7  ;;  %vm264_vm0 = vcmask 1040384   ;;  %vm775_vm1 = vcmask 27648   ;;  %s5777_s5 = smov 16  }
  0x25   : > { %s6095_s27 = scalar_lea.vmem %s8278_s0, %s5255_s20  ;;  %s5779_s6 = smov 20  }
  0x26   : > { %515 = vperm.xlu1 %5635, %v5931_v21   ;;  %512 = vperm.xlu0 %5634, %v5934_v22   ;;  %v197_v2 = vld [vmem:[%s6095_s27] sm:$0xf]  ;;  %v228_v4 = vld [vmem:[%s6095_s27 + $0x7c] sm:$0xf]  ;;  %v198_v11 = vld [vmem:[%s6095_s27 + $0x4] sm:$0xf] }
  0x27   : > { %v6102_v7 = vunpack.c.l.bf16 %v197_v2  ;;  %v6104_v8 = vunpack.c.l.bf16 %v228_v4  ;;  %v199_v12 = vld [vmem:[%s6095_s27 + $0x8] sm:$0xf]  ;;  %v203_v35 = vld [vmem:[%s6095_s27 + $0x18] sm:$0xf]  ;;  %v205_v48 = vld [vmem:[%s6095_s27 + $0x20] sm:$0xf] }
  0x28   : > { %v6119_v19 = vunpack.c.l.bf16 %v199_v12  ;;  %v6156_v43 = vunpack.c.l.bf16 %v203_v35  ;;  %s5781_s7 = smov 24   ;;  %s5783_s8 = smov 28  }
  0x29   : > { %8416 = vst [vmem:[#allocation6_spill] sm:$0xff] %v6102_v7  ;;  %8417 = vst [vmem:[#allocation7_spill] sm:$0xff] %v6104_v8  ;;  %v268_v15 = vrot.slane %v6104_v8, 7  ;;  %v302_v16 = vrot.slane %v6102_v7, 7  ;;  %s5784_s9 = smov 32   ;;  %s5512_s10 = sshll.u32 %s5833_s19, 12 }
  0x2a   : > { %521 = vperm.xlu1 %5635, %v5945_v25   ;;  %518 = vperm.xlu0 %5634, %v5948_v26   ;;  %8421 = vst [vmem:[#allocation11_spill] sm:$0xff] %v6119_v19  ;;  %v305_v28 = vrot.slane %v6119_v19, 7  ;;  %8430 = vst [vmem:[#allocation20_spill] sm:$0xff] %v6156_v43  ;;  %s8229_s20 = scalar_lea.hbm %s8282_s4, %s5512_s10  ;;  %s5785_s23 = smov [#allocation3]  }
  0x2b   : > { %v6127_v23 = vsel %vm264_vm0, %v268_v15, %v302_v16 }
  0x2c   : > { %8423 = vst [vmem:[#allocation13_spill] sm:$0xff] %v6127_v23 }
  0x2e   : > { %527 = vperm.xlu1 %5635, %v5959_v29   ;;  %524 = vperm.xlu0 %5634, %v5962_v30  }
  0x32   : > { %533 = vperm.xlu1 %5635, %v5973_v33   ;;  %530 = vperm.xlu0 %5634, %v5976_v34  }
  0x36   : > { %539 = vperm.xlu1 %5635, %v5987_v37   ;;  %536 = vperm.xlu0 %5634, %v5990_v38  }
  0x3a   : > { %545 = vperm.xlu1 %5635, %v6001_v41   ;;  %542 = vperm.xlu0 %5634, %v6004_v42  }
  0x3e   : > { %551 = vperm.xlu1 %5635, %v6015_v45   ;;  %548 = vperm.xlu0 %5634, %v6018_v46  }
  0x42   : > { %557 = vperm.xlu1 %5635, %v6029_v49   ;;  %554 = vperm.xlu0 %5634, %v477_v50  }
  0x46   : > { %563 = vperm.xlu1 %5635, %v480_v53   ;;  %560 = vperm.xlu0 %5634, %v479_v54  }
  0x4a   : > { %569 = vperm.xlu1 %5635, %v482_v57   ;;  %566 = vperm.xlu0 %5634, %v481_v58  }
  0x4e   : > { %575 = vperm.xlu1 %5635, %v6056_v61   ;;  %572 = vperm.xlu0 %5634, %v483_v62  }
  0x52   : > { %581 = vperm.xlu1 %5635, %v6061_v63   ;;  %578 = vperm.xlu0 %5634, %v6064_v0  }
  0x56   : > { %5637 = vset.pattern.permute.xlu1 %v5770_v1  ;;  %5636 = vset.pattern.permute.xlu0 %v5770_v1 }
  0x57   : > { %908 = vperm.xlu1 %5637, %v5892_v10   ;;  %905 = vperm.xlu0 %5636, %v5878_v6   ;;  %v227_v6 = vld [vmem:[%s6095_s27 + $0x78] sm:$0xf] }
  0x58   : > { %v6108_v10 = vunpack.c.l.bf16 %v227_v6 }
  0x5a   : > { %8419 = vst [vmem:[#allocation9_spill] sm:$0xff] %v6108_v10 }
  0x5b   : > { %911 = vperm.xlu1 %5637, %v5875_v5   ;;  %914 = vperm.xlu0 %5636, %v5889_v9   ;;  %v226_v5 = vld [vmem:[%s6095_s27 + $0x74] sm:$0xf] }
  0x5c   : > { %v6106_v9 = vunpack.c.l.bf16 %v226_v5 }
  0x5e   : > { %8418 = vst [vmem:[#allocation8_spill] sm:$0xff] %v6106_v9 }
  0x5f   : > { %917 = vperm.xlu1 %5637, %v5906_v14   ;;  %920 = vperm.xlu0 %5636, %v5903_v13   ;;  %v6112_v13 = vunpack.c.l.bf16 %v198_v11  ;;  %v200_v14 = vld [vmem:[%s6095_s27 + $0xc] sm:$0xf] }
  0x60   : > { %v6121_v20 = vunpack.c.l.bf16 %v200_v14 }
  0x61   : > { %8420 = vst [vmem:[#allocation10_spill] sm:$0xff] %v6112_v13 }
  0x62   : > { %8422 = vst [vmem:[#allocation12_spill] sm:$0xff] %v6121_v20 }
  0x63   : > { %923 = vperm.xlu1 %5637, %v5920_v18   ;;  %926 = vperm.xlu0 %5636, %v5917_v17   ;;  %v8285_v17 = vrot.slane %v6106_v9, 7  ;;  %v266_v18 = vrot.slane %v6108_v10, 7 }
  0x65   : > { %v6132_v24 = vsel %vm264_vm0, %v8285_v17, %v266_v18 }
  0x66   : > { %8424 = vst [vmem:[#allocation14_spill] sm:$0xff] %v6132_v24 }
  0x67   : > { %929 = vperm.xlu1 %5637, %v5934_v22   ;;  %932 = vperm.xlu0 %5636, %v5931_v21   ;;  %v303_v21 = vrot.slane %v6112_v13, 7  ;;  %v201_v22 = vld [vmem:[%s6095_s27 + $0x10] sm:$0xf] }
  0x6b   : > { %935 = vperm.xlu1 %5637, %v5948_v26   ;;  %938 = vperm.xlu0 %5636, %v5945_v25   ;;  %v202_v25 = vld [vmem:[%s6095_s27 + $0x14] sm:$0xf] }
  0x6f   : > { %941 = vperm.xlu1 %5637, %v5962_v30   ;;  %944 = vperm.xlu0 %5636, %v5959_v29   ;;  %v307_v29 = vrot.slane %v6121_v20, 7  ;;  %v6137_v30 = vunpack.c.l.bf16 %v201_v22 }
  0x71   : > { %8425 = vst [vmem:[#allocation15_spill] sm:$0xff] %v6137_v30  ;;  %v6166_v52 = vsel %vm264_vm0, %v305_v28, %v307_v29 }
  0x72   : > { %8431 = vst [vmem:[#allocation21_spill] sm:$0xff] %v6166_v52 }
  0x73   : > { %947 = vperm.xlu1 %5637, %v5976_v34   ;;  %950 = vperm.xlu0 %5636, %v5973_v33   ;;  %v6144_v33 = vsel %vm264_vm0, %v302_v16, %v303_v21  ;;  %v6146_v34 = vunpack.c.l.bf16 %v202_v25 }
  0x74   : > { %8426 = vst [vmem:[#allocation16_spill] sm:$0xff] %v6144_v33 }
  0x75   : > { %8427 = vst [vmem:[#allocation17_spill] sm:$0xff] %v6146_v34  ;;  %v311_v47 = vrot.slane %v6146_v34, 7 }
  0x77   : > { %953 = vperm.xlu1 %5637, %v5990_v38   ;;  %956 = vperm.xlu0 %5636, %v5987_v37   ;;  %v6150_v38 = vsel %vm264_vm0, %v266_v18, %v268_v15 }
  0x78   : > { %8428 = vst [vmem:[#allocation18_spill] sm:$0xff] %v6150_v38 }
  0x7b   : > { %959 = vperm.xlu1 %5637, %v6004_v42   ;;  %962 = vperm.xlu0 %5636, %v6001_v41   ;;  %v204_v41 = vld [vmem:[%s6095_s27 + $0x1c] sm:$0xf]  ;;  %v6154_v42 = vsel %vm264_vm0, %v303_v21, %v305_v28  ;;  %v209_v28 = vld [vmem:[%s6095_s27 + $0x30] sm:$0xf] }
  0x7c   : > { %8429 = vst [vmem:[#allocation19_spill] sm:$0xff] %v6154_v42 }
  0x7f   : > { %965 = vperm.xlu1 %5637, %v6018_v46   ;;  %968 = vperm.xlu0 %5636, %v6015_v45   ;;  %v309_v46 = vrot.slane %v6137_v30, 7 }
  0x81   : > { %v6186_v4 = vsel %vm264_vm0, %v307_v29, %v309_v46  ;;  %v210_v29 = vld [vmem:[%s6095_s27 + $0x34] sm:$0xf] }
  0x82   : > { %8436 = vst [vmem:[#allocation26_spill] sm:$0xff] %v6186_v4 }
  0x83   : > { %971 = vperm.xlu1 %5637, %v477_v50   ;;  %974 = vperm.xlu0 %5636, %v6029_v49   ;;  %v5771_v49 = vmov 2  }
  0x87   : > { %977 = vperm.xlu1 %5637, %v479_v54   ;;  %980 = vperm.xlu0 %5636, %v480_v53   ;;  %v6168_v53 = vunpack.c.l.bf16 %v204_v41  ;;  %v206_v54 = vld [vmem:[%s6095_s27 + $0x24] sm:$0xf]  ;;  %v6215_v41 = vunpack.c.l.bf16 %v210_v29 }
  0x89   : > { %8432 = vst [vmem:[#allocation22_spill] sm:$0xff] %v6168_v53  ;;  %v315_v5 = vrot.slane %v6168_v53, 7  ;;  %8442 = vst [vmem:[#allocation32_spill] sm:$0xff] %v6215_v41 }
  0x8b   : > { %983 = vperm.xlu1 %5637, %v481_v58   ;;  %986 = vperm.xlu0 %5636, %v482_v57   ;;  %v313_v57 = vrot.slane %v6156_v43, 7  ;;  %v6172_v58 = vunpack.c.l.bf16 %v205_v48 }
  0x8d   : > { %8433 = vst [vmem:[#allocation23_spill] sm:$0xff] %v6172_v58  ;;  %v6198_v18 = vsel %vm264_vm0, %v311_v47, %v313_v57  ;;  %v317_v21 = vrot.slane %v6172_v58, 7 }
  0x8e   : > { %8439 = vst [vmem:[#allocation29_spill] sm:$0xff] %v6198_v18 }
  0x8f   : > { %989 = vperm.xlu1 %5637, %v483_v62   ;;  %992 = vperm.xlu0 %5636, %v6056_v61   ;;  %v6179_v61 = vsel %vm264_vm0, %v309_v46, %v311_v47  ;;  %v6181_v62 = vunpack.c.l.bf16 %v206_v54  ;;  %v6222_v48 = vsel %vm264_vm0, %v315_v5, %v317_v21 }
  0x90   : > { %8434 = vst [vmem:[#allocation24_spill] sm:$0xff] %v6179_v61  ;;  %8444 = vst [vmem:[#allocation34_spill] sm:$0xff] %v6222_v48 }
  0x91   : > { %v495_v26 = vpop.permute.xlu1 %494  ;;  %v489_v27 = vpop.permute.xlu0 %488  ;;  %8435 = vst [vmem:[#allocation25_spill] sm:$0xff] %v6181_v62 }
  0x92   : > { %vm585_vm2 = vcmp.eq.s32.totalorder %v495_v26, 1  ;;  %vm583_vm3 = vcmp.eq.s32.totalorder %v489_v27, 1  ;;  %v6202_v26 = vsel %vm264_vm0, %v313_v57, %v315_v5  ;;  %v319_v27 = vrot.slane %v6181_v62, 7 }
  0x93   : > { %v617_v31 = vsel %vm585_vm2, %v6127_v23, 0.0  ;;  %v615_v32 = vsel %vm583_vm3, %v6132_v24, 0.0  ;;  %995 = vperm.xlu1 %5637, %v6064_v0   ;;  %998 = vperm.xlu0 %5636, %v6061_v63   ;;  %v207_v63 = vld [vmem:[%s6095_s27 + $0x28] sm:$0xf]  ;;  %v208_v0 = vld [vmem:[%s6095_s27 + $0x2c] sm:$0xf] }
  0x94   : > { %v5258_v36 = vpack.c.bf16 %v617_v31, %v617_v31  ;;  %v5256_v37 = vpack.c.bf16 %v615_v32, %v615_v32  ;;  %v6189_v12 = vunpack.c.l.bf16 %v207_v63  ;;  %v6191_v14 = vunpack.c.l.bf16 %v208_v0  ;;  %8440 = vst [vmem:[#allocation30_spill] sm:$0xff] %v6202_v26  ;;  %v213_v63 = vld [vmem:[%s6095_s27 + $0x40] sm:$0xf] }
  0x95   : > { %v498_v39 = vpop.permute.xlu1 %497  ;;  %v492_v40 = vpop.permute.xlu0 %491  ;;  %v6219_v47 = vsel %vm264_vm0, %v317_v21, %v319_v27  ;;  %v6244_v21 = vunpack.c.l.bf16 %v213_v63 }
  0x96   : > { %vm586_vm4 = vcmp.eq.s32.totalorder %v498_v39, 1  ;;  %vm584_vm5 = vcmp.eq.s32.totalorder %v492_v40, 1  ;;  %776 = vst.msk [vmem:[#allocation2] sm:$0xf] %vm775_vm1, %v5256_v37  ;;  %778 = vst.msk [vmem:[#allocation2 + $0x8] sm:$0xf] %vm775_vm1, %v5258_v36  ;;  %v6213_v40 = vunpack.c.l.bf16 %v209_v28 }
  0x97   : > { %v618_v44 = vsel %vm586_vm4, %v6144_v33, 0.0  ;;  %v616_v45 = vsel %vm584_vm5, %v6150_v38, 0.0  ;;  %5638 = vset.pattern.permute.xlu1 %v5771_v49  ;;  %5639 = vset.pattern.permute.xlu0 %v5771_v49  ;;  %8437 = vst [vmem:[#allocation27_spill] sm:$0xff] %v6189_v12  ;;  %8438 = vst [vmem:[#allocation28_spill] sm:$0xff] %v6191_v14  ;;  %v321_v35 = vrot.slane %v6189_v12, 7  ;;  %v323_v36 = vrot.slane %v6191_v14, 7 }
  0x98   : > { %v5259_v50 = vpack.c.bf16 %v618_v44, %v618_v44  ;;  %v5257_v51 = vpack.c.bf16 %v616_v45, %v616_v45  ;;  %8441 = vst [vmem:[#allocation31_spill] sm:$0xff] %v6213_v40  ;;  %v211_v44 = vld [vmem:[%s6095_s27 + $0x38] sm:$0xf]  ;;  %8443 = vst [vmem:[#allocation33_spill] sm:$0xff] %v6219_v47 }
  0x99   : > { %v504_v55 = vpop.permute.xlu1 %503  ;;  %v501_v56 = vpop.permute.xlu0 %500  ;;  %v6226_v54 = vsel %vm264_vm0, %v319_v27, %v321_v35  ;;  %8449 = vst [vmem:[#allocation39_spill] sm:$0xff] %v6244_v21 }
  0x9a   : > { %vm588_vm6 = vcmp.eq.s32.totalorder %v504_v55, 1  ;;  %vm587_vm7 = vcmp.eq.s32.totalorder %v501_v56, 1  ;;  %777 = vst.msk [vmem:[#allocation2 + $0x4] sm:$0xf] %vm775_vm1, %v5257_v51  ;;  %779 = vst.msk [vmem:[#allocation2 + $0xc] sm:$0xf] %vm775_vm1, %v5259_v50  ;;  %v6228_v55 = vunpack.c.l.bf16 %v211_v44 }
  0x9b   : > { %v620_v59 = vsel %vm588_vm6, %v6166_v52, 0.0  ;;  %v619_v60 = vsel %vm587_vm7, %v6154_v42, 0.0  ;;  %v212_v51 = vld [vmem:[%s6095_s27 + $0x3c] sm:$0xf]  ;;  %8445 = vst [vmem:[#allocation35_spill] sm:$0xff] %v6226_v54 }
  0x9c   : > { %v5261_v1 = vpack.c.bf16 %v620_v59, %v620_v59  ;;  %v5260_v2 = vpack.c.bf16 %v619_v60, %v619_v60  ;;  %8446 = vst [vmem:[#allocation36_spill] sm:$0xff] %v6228_v55  ;;  %v325_v59 = vrot.slane %v6213_v40, 7  ;;  %v327_v60 = vrot.slane %v6215_v41, 7 }
  0x9d   : > { %v510_v6 = vpop.permute.xlu1 %509  ;;  %v507_v11 = vpop.permute.xlu0 %506  ;;  %v6240_v5 = vunpack.c.l.bf16 %v212_v51 }
  0x9e   : > { %vm590_vm8 = vcmp.eq.s32.totalorder %v510_v6, 1  ;;  %vm589_vm9 = vcmp.eq.s32.totalorder %v507_v11, 1  ;;  %780 = vst.msk [vmem:[#allocation2 + $0x10] sm:$0xf] %vm775_vm1, %v5260_v2  ;;  %781 = vst.msk [vmem:[#allocation2 + $0x14] sm:$0xf] %vm775_vm1, %v5261_v1  ;;  %v6238_v2 = vsel %vm264_vm0, %v321_v35, %v323_v36  ;;  %v6251_v27 = vsel %vm264_vm0, %v325_v59, %v327_v60 }
  0x9f   : > { %v622_v15 = vsel %vm590_vm8, %v6179_v61, 0.0  ;;  %v621_v16 = vsel %vm589_vm9, %v6186_v4, 0.0  ;;  %8447 = vst [vmem:[#allocation37_spill] sm:$0xff] %v6238_v2  ;;  %8448 = vst [vmem:[#allocation38_spill] sm:$0xff] %v6240_v5  ;;  %v214_v6 = vld [vmem:[%s6095_s27 + $0x44] sm:$0xf] }
  0xa0   : > { %v5263_v22 = vpack.c.bf16 %v622_v15, %v622_v15  ;;  %v5262_v25 = vpack.c.bf16 %v621_v16, %v621_v16  ;;  %v329_v16 = vrot.slane %v6228_v55, 7  ;;  %8450 = vst [vmem:[#allocation40_spill] sm:$0xff] %v6251_v27  ;;  %v6253_v28 = vunpack.c.l.bf16 %v214_v6 }
  0xa1   : > { %v516_v31 = vpop.permute.xlu1 %515  ;;  %v513_v32 = vpop.permute.xlu0 %512  ;;  %v331_v35 = vrot.slane %v6240_v5, 7 }
  0xa2   : > { %vm592_vm10 = vcmp.eq.s32.totalorder %v516_v31, 1  ;;  %vm591_vm11 = vcmp.eq.s32.totalorder %v513_v32, 1  ;;  %782 = vst.msk [vmem:[#allocation2 + $0x18] sm:$0xf] %vm775_vm1, %v5262_v25  ;;  %783 = vst.msk [vmem:[#allocation2 + $0x1c] sm:$0xf] %vm775_vm1, %v5263_v22  ;;  %v6256_v32 = vsel %vm264_vm0, %v323_v36, %v325_v59 }
  0xa3   : > { %v624_v37 = vsel %vm592_vm10, %v6202_v26, 0.0  ;;  %v623_v39 = vsel %vm591_vm11, %v6198_v18, 0.0  ;;  %8451 = vst [vmem:[#allocation41_spill] sm:$0xff] %v6253_v28  ;;  %8452 = vst [vmem:[#allocation42_spill] sm:$0xff] %v6256_v32  ;;  %v218_v59 = vld [vmem:[%s6095_s27 + $0x54] sm:$0xf] }
  0xa4   : > { %v5265_v45 = vpack.c.bf16 %v624_v37, %v624_v37  ;;  %v5264_v46 = vpack.c.bf16 %v623_v39, %v623_v39  ;;  %v215_v37 = vld [vmem:[%s6095_s27 + $0x48] sm:$0xf]  ;;  %v216_v39 = vld [vmem:[%s6095_s27 + $0x4c] sm:$0xf] }
  0xa5   : > { %v522_v49 = vpop.permute.xlu1 %521  ;;  %v519_v50 = vpop.permute.xlu0 %518  ;;  %v6269_v51 = vunpack.c.l.bf16 %v215_v37 }
  0xa6   : > { %vm594_vm12 = vcmp.eq.s32.totalorder %v522_v49, 1  ;;  %vm593_vm13 = vcmp.eq.s32.totalorder %v519_v50, 1  ;;  %784 = vst.msk [vmem:[#allocation2 + $0x20] sm:$0xf] %vm775_vm1, %v5264_v46  ;;  %785 = vst.msk [vmem:[#allocation2 + $0x24] sm:$0xf] %vm775_vm1, %v5265_v45  ;;  %v6262_v46 = vsel %vm264_vm0, %v327_v60, %v329_v16  ;;  %v6276_v60 = vsel %vm264_vm0, %v329_v16, %v331_v35 }
  0xa7   : > { %v626_v56 = vsel %vm594_vm12, %v6219_v47, 0.0  ;;  %v625_v57 = vsel %vm593_vm13, %v6222_v48, 0.0  ;;  %8453 = vst [vmem:[#allocation43_spill] sm:$0xff] %v6262_v46  ;;  %v333_v49 = vrot.slane %v6244_v21, 7  ;;  %8454 = vst [vmem:[#allocation44_spill] sm:$0xff] %v6269_v51 }
  0xa8   : > { %v5267_v0 = vpack.c.bf16 %v626_v56, %v626_v56  ;;  %v5266_v1 = vpack.c.bf16 %v625_v57, %v625_v57  ;;  %v6271_v56 = vunpack.c.l.bf16 %v216_v39  ;;  %v217_v57 = vld [vmem:[%s6095_s27 + $0x50] sm:$0xf]  ;;  %8456 = vst [vmem:[#allocation46_spill] sm:$0xff] %v6276_v60 }
  0xa9   : > { %v528_v11 = vpop.permute.xlu1 %527  ;;  %v525_v15 = vpop.permute.xlu0 %524 }
  0xaa   : > { %vm596_vm14 = vcmp.eq.s32.totalorder %v528_v11, 1  ;;  %vm595_vm15 = vcmp.eq.s32.totalorder %v525_v15, 1  ;;  %786 = vst.msk [vmem:[#allocation2 + $0x28] sm:$0xf] %vm775_vm1, %v5266_v1  ;;  %787 = vst.msk [vmem:[#allocation2 + $0x2c] sm:$0xf] %vm775_vm1, %v5267_v0  ;;  %v6279_v15 = vunpack.c.l.bf16 %v217_v57 }
  0xab   : > { %v628_v22 = vsel %vm596_vm14, %v6238_v2, 0.0  ;;  %v627_v25 = vsel %vm595_vm15, %v6226_v54, 0.0  ;;  %8455 = vst [vmem:[#allocation45_spill] sm:$0xff] %v6271_v56  ;;  %v335_v1 = vrot.slane %v6253_v28, 7  ;;  %v219_v57 = vld [vmem:[%s6095_s27 + $0x58] sm:$0xf] }
  0xac   : > { %v5269_v29 = vpack.c.bf16 %v628_v22, %v628_v22  ;;  %v5268_v31 = vpack.c.bf16 %v627_v25, %v627_v25  ;;  %8457 = vst [vmem:[#allocation47_spill] sm:$0xff] %v6279_v15  ;;  %v6281_v22 = vunpack.c.l.bf16 %v218_v59  ;;  %v220_v59 = vld [vmem:[%s6095_s27 + $0x5c] sm:$0xf]  ;;  %v6311_v3 = vunpack.c.l.bf16 %v219_v57 }
  0xad   : > { %v534_v44 = vpop.permute.xlu1 %533  ;;  %v531_v45 = vpop.permute.xlu0 %530  ;;  %v6313_v17 = vunpack.c.l.bf16 %v220_v59 }
  0xae   : > { %vm598_vm2 = vcmp.eq.s32.totalorder %v534_v44, 1  ;;  %vm597_vm3 = vcmp.eq.s32.totalorder %v531_v45, 1  ;;  %788 = vst.msk [vmem:[#allocation2 + $0x30] sm:$0xf] %vm775_vm1, %v5268_v31  ;;  %789 = vst.msk [vmem:[#allocation2 + $0x34] sm:$0xf] %vm775_vm1, %v5269_v29  ;;  %v6290_v44 = vsel %vm264_vm0, %v333_v49, %v335_v1  ;;  %v6293_v45 = vsel %vm264_vm0, %v331_v35, %v333_v49 }
  0xaf   : > { %v630_v36 = vsel %vm598_vm2, %v6251_v27, 0.0  ;;  %v629_v50 = vsel %vm597_vm3, %v6256_v32, 0.0  ;;  %8458 = vst [vmem:[#allocation48_spill] sm:$0xff] %v6281_v22  ;;  %v337_v29 = vrot.slane %v6269_v51, 7  ;;  %v339_v31 = vrot.slane %v6271_v56, 7  ;;  %8459 = vst [vmem:[#allocation49_spill] sm:$0xff] %v6290_v44 }
  0xb0   : > { %v5271_v63 = vpack.c.bf16 %v630_v36, %v630_v36  ;;  %v5270_v0 = vpack.c.bf16 %v629_v50, %v629_v50  ;;  %8460 = vst [vmem:[#allocation50_spill] sm:$0xff] %v6293_v45  ;;  %8463 = vst [vmem:[#allocation53_spill] sm:$0xff] %v6311_v3 }
  0xb1   : > { %v540_v6 = vpop.permute.xlu1 %539  ;;  %v537_v11 = vpop.permute.xlu0 %536  ;;  %v6304_v49 = vsel %vm264_vm0, %v337_v29, %v339_v31  ;;  %8464 = vst [vmem:[#allocation54_spill] sm:$0xff] %v6313_v17 }
  0xb2   : > { %vm600_vm4 = vcmp.eq.s32.totalorder %v540_v6, 1  ;;  %vm599_vm5 = vcmp.eq.s32.totalorder %v537_v11, 1  ;;  %790 = vst.msk [vmem:[#allocation2 + $0x38] sm:$0xf] %vm775_vm1, %v5270_v0  ;;  %791 = vst.msk [vmem:[#allocation2 + $0x3c] sm:$0xf] %vm775_vm1, %v5271_v63  ;;  %v6307_v11 = vsel %vm264_vm0, %v335_v1, %v337_v29 }
  0xb3   : > { %v632_v25 = vsel %vm600_vm4, %v6276_v60, 0.0  ;;  %v631_v16 = vsel %vm599_vm5, %v6262_v46, 0.0  ;;  %v341_v63 = vrot.slane %v6279_v15, 7  ;;  %v343_v0 = vrot.slane %v6281_v22, 7  ;;  %8461 = vst [vmem:[#allocation51_spill] sm:$0xff] %v6304_v49  ;;  %8462 = vst [vmem:[#allocation52_spill] sm:$0xff] %v6307_v11 }
  0xb4   : > { %v5273_v37 = vpack.c.bf16 %v632_v25, %v632_v25  ;;  %v5272_v39 = vpack.c.bf16 %v631_v16, %v631_v16  ;;  %v221_v25 = vld [vmem:[%s6095_s27 + $0x60] sm:$0xf]  ;;  %v222_v16 = vld [vmem:[%s6095_s27 + $0x64] sm:$0xf]  ;;  %v225_v60 = vld [vmem:[%s6095_s27 + $0x70] sm:$0xf] }
  0xb5   : > { %v546_v36 = vpop.permute.xlu1 %545  ;;  %v543_v50 = vpop.permute.xlu0 %542  ;;  %v6315_v24 = vunpack.c.l.bf16 %v221_v25  ;;  %v6317_v38 = vunpack.c.l.bf16 %v222_v16  ;;  %v6324_v57 = vsel %vm264_vm0, %v341_v63, %v343_v0  ;;  %v6327_v59 = vsel %vm264_vm0, %v339_v31, %v341_v63 }
  0xb6   : > { %vm602_vm6 = vcmp.eq.s32.totalorder %v546_v36, 1  ;;  %vm601_vm7 = vcmp.eq.s32.totalorder %v543_v50, 1  ;;  %792 = vst.msk [vmem:[#allocation2 + $0x40] sm:$0xf] %vm775_vm1, %v5272_v39  ;;  %793 = vst.msk [vmem:[#allocation2 + $0x44] sm:$0xf] %vm775_vm1, %v5273_v37 }
  0xb7   : > { %v634_v6 = vsel %vm602_vm6, %v6290_v44, 0.0  ;;  %v633_v35 = vsel %vm601_vm7, %v6293_v45, 0.0  ;;  %8465 = vst [vmem:[#allocation55_spill] sm:$0xff] %v6315_v24  ;;  %8466 = vst [vmem:[#allocation56_spill] sm:$0xff] %v6317_v38  ;;  %v345_v25 = vrot.slane %v6311_v3, 7  ;;  %v347_v16 = vrot.slane %v6313_v17, 7 }
  0xb8   : > { %v5275_v36 = vpack.c.bf16 %v634_v6, %v634_v6  ;;  %v5274_v50 = vpack.c.bf16 %v633_v35, %v633_v35  ;;  %8467 = vst [vmem:[#allocation57_spill] sm:$0xff] %v6324_v57  ;;  %8468 = vst [vmem:[#allocation58_spill] sm:$0xff] %v6327_v59 }
  0xb9   : > { %v552_v39 = vpop.permute.xlu1 %551  ;;  %v549_v37 = vpop.permute.xlu0 %548  ;;  %v6347_v44 = vsel %vm264_vm0, %v343_v0, %v345_v25 }
  0xba   : > { %vm604_vm8 = vcmp.eq.s32.totalorder %v552_v39, 1  ;;  %vm603_vm9 = vcmp.eq.s32.totalorder %v549_v37, 1  ;;  %794 = vst.msk [vmem:[#allocation2 + $0x48] sm:$0xf] %vm775_vm1, %v5274_v50  ;;  %795 = vst.msk [vmem:[#allocation2 + $0x4c] sm:$0xf] %vm775_vm1, %v5275_v36 }
  0xbb   : > { %v636_v1 = vsel %vm604_vm8, %v6304_v49, 0.0  ;;  %v635_v29 = vsel %vm603_vm9, %v6307_v11, 0.0  ;;  %v223_v39 = vld [vmem:[%s6095_s27 + $0x68] sm:$0xf]  ;;  %v224_v50 = vld [vmem:[%s6095_s27 + $0x6c] sm:$0xf] }
  0xbc   : > { %v5277_v6 = vpack.c.bf16 %v636_v1, %v636_v1  ;;  %v5276_v35 = vpack.c.bf16 %v635_v29, %v635_v29  ;;  %v349_v11 = vrot.slane %v6315_v24, 7  ;;  %v351_v49 = vrot.slane %v6317_v38, 7  ;;  %8472 = vst [vmem:[#allocation62_spill] sm:$0xff] %v6347_v44 }
  0xbd   : > { %v558_v37 = vpop.permute.xlu1 %557  ;;  %v555_v36 = vpop.permute.xlu0 %554  ;;  %v6339_v1 = vunpack.c.l.bf16 %v223_v39  ;;  %v6341_v29 = vunpack.c.l.bf16 %v224_v50 }
  0xbe   : > { %vm606_vm10 = vcmp.eq.s32.totalorder %v558_v37, 1  ;;  %vm605_vm11 = vcmp.eq.s32.totalorder %v555_v36, 1  ;;  %796 = vst.msk [vmem:[#allocation2 + $0x50] sm:$0xf] %vm775_vm1, %v5276_v35  ;;  %797 = vst.msk [vmem:[#allocation2 + $0x54] sm:$0xf] %vm775_vm1, %v5277_v6  ;;  %v6344_v36 = vsel %vm264_vm0, %v345_v25, %v347_v16  ;;  %v6351_v6 = vsel %vm264_vm0, %v349_v11, %v351_v49 }
  0xbf   : > { %v638_v31 = vsel %vm606_vm10, %v6324_v57, 0.0  ;;  %v637_v63 = vsel %vm605_vm11, %v6327_v59, 0.0  ;;  %8469 = vst [vmem:[#allocation59_spill] sm:$0xff] %v6339_v1  ;;  %8470 = vst [vmem:[#allocation60_spill] sm:$0xff] %v6341_v29  ;;  %v355_v0 = vrot.slane %v6341_v29, 7 }
  0xc0   : > { %v5279_v45 = vpack.c.bf16 %v638_v31, %v638_v31  ;;  %v5278_v37 = vpack.c.bf16 %v637_v63, %v637_v63  ;;  %8471 = vst [vmem:[#allocation61_spill] sm:$0xff] %v6344_v36  ;;  %8473 = vst [vmem:[#allocation63_spill] sm:$0xff] %v6351_v6  ;;  %v353_v31 = vrot.slane %v6339_v1, 7 }
  0xc1   : > { %v564_v46 = vpop.permute.xlu1 %563  ;;  %v561_v35 = vpop.permute.xlu0 %560 }
  0xc2   : > { %vm608_vm12 = vcmp.eq.s32.totalorder %v564_v46, 1  ;;  %vm607_vm13 = vcmp.eq.s32.totalorder %v561_v35, 1  ;;  %798 = vst.msk [vmem:[#allocation2 + $0x58] sm:$0xf] %vm775_vm1, %v5278_v37  ;;  %799 = vst.msk [vmem:[#allocation2 + $0x5c] sm:$0xf] %vm775_vm1, %v5279_v45  ;;  %v6360_v46 = vsel %vm264_vm0, %v347_v16, %v349_v11  ;;  %v6362_v35 = vunpack.c.l.bf16 %v225_v60 }
  0xc3   : > { %v640_v39 = vsel %vm608_vm12, %v6344_v36, 0.0  ;;  %v639_v50 = vsel %vm607_vm13, %v6347_v44, 0.0  ;;  %8474 = vst [vmem:[#allocation64_spill] sm:$0xff] %v6360_v46  ;;  %v6372_v60 = vsel %vm264_vm0, %v351_v49, %v353_v31 }
  0xc4   : > { %v5281_v25 = vpack.c.bf16 %v640_v39, %v640_v39  ;;  %v5280_v63 = vpack.c.bf16 %v639_v50, %v639_v50  ;;  %8475 = vst [vmem:[#allocation65_spill] sm:$0xff] %v6362_v35  ;;  %v6369_v39 = vsel %vm264_vm0, %v353_v31, %v355_v0  ;;  %8477 = vst [vmem:[#allocation67_spill] sm:$0xff] %v6372_v60  ;;  %v357_v16 = vrot.slane %v6362_v35, 7 }
  0xc5   : > { %v570_v59 = vpop.permute.xlu1 %569  ;;  %v567_v57 = vpop.permute.xlu0 %566  ;;  %8476 = vst [vmem:[#allocation66_spill] sm:$0xff] %v6369_v39 }
  0xc6   : > { %vm610_vm14 = vcmp.eq.s32.totalorder %v570_v59, 1  ;;  %vm609_vm15 = vcmp.eq.s32.totalorder %v567_v57, 1  ;;  %800 = vst.msk [vmem:[#allocation2 + $0x60] sm:$0xf] %vm775_vm1, %v5280_v63  ;;  %801 = vst.msk [vmem:[#allocation2 + $0x64] sm:$0xf] %vm775_vm1, %v5281_v25  ;;  %v6385_v31 = vsel %vm264_vm0, %v355_v0, %v357_v16 }
  0xc7   : > { %v642_v45 = vsel %vm610_vm14, %v6351_v6, 0.0  ;;  %v641_v37 = vsel %vm609_vm15, %v6360_v46, 0.0  ;;  %8480 = vst [vmem:[#allocation69_spill] sm:$0xff] %v6385_v31 }
  0xc8   : > { %v5283_v50 = vpack.c.bf16 %v642_v45, %v642_v45  ;;  %v5282_v11 = vpack.c.bf16 %v641_v37, %v641_v37  ;;  %v8478_v37 = vrot.slane %v6106_v9, 7 }
  0xc9   : > { %v576_v59 = vpop.permute.xlu1 %575  ;;  %v573_v57 = vpop.permute.xlu0 %572 }
  0xca   : > { %vm612_vm2 = vcmp.eq.s32.totalorder %v576_v59, 1  ;;  %vm611_vm3 = vcmp.eq.s32.totalorder %v573_v57, 1  ;;  %802 = vst.msk [vmem:[#allocation2 + $0x68] sm:$0xf] %vm775_vm1, %v5282_v11  ;;  %803 = vst.msk [vmem:[#allocation2 + $0x6c] sm:$0xf] %vm775_vm1, %v5283_v50  ;;  %v6382_v49 = vsel %vm264_vm0, %v357_v16, %v8478_v37 }
  0xcb   : > { %v644_v25 = vsel %vm612_vm2, %v6369_v39, 0.0  ;;  %v643_v63 = vsel %vm611_vm3, %v6372_v60, 0.0  ;;  %8479 = vst [vmem:[#allocation68_spill] sm:$0xff] %v6382_v49 }
  0xcc   : > { %v5285_v46 = vpack.c.bf16 %v644_v25, %v644_v25  ;;  %v5284_v45 = vpack.c.bf16 %v643_v63, %v643_v63 }
  0xcd   : > { %v582_v59 = vpop.permute.xlu1 %581  ;;  %v579_v57 = vpop.permute.xlu0 %578 }
  0xce   : > { %vm614_vm4 = vcmp.eq.s32.totalorder %v582_v59, 1  ;;  %vm613_vm5 = vcmp.eq.s32.totalorder %v579_v57, 1  ;;  %804 = vst.msk [vmem:[#allocation2 + $0x70] sm:$0xf] %vm775_vm1, %v5284_v45  ;;  %805 = vst.msk [vmem:[#allocation2 + $0x74] sm:$0xf] %vm775_vm1, %v5285_v46 }
  0xcf   : > { %v646_v50 = vsel %vm614_vm4, %v6382_v49, 0.0  ;;  %v645_v11 = vsel %vm613_vm5, %v6385_v31, 0.0 }
  0xd0   : > { %v5287_v25 = vpack.c.bf16 %v646_v50, %v646_v50  ;;  %v5286_v63 = vpack.c.bf16 %v645_v11, %v645_v11 }
  0xd2   : > { %v909_v60 = vpop.permute.xlu1 %908  ;;  %v906_v37 = vpop.permute.xlu0 %905  ;;  %806 = vst.msk [vmem:[#allocation2 + $0x78] sm:$0xf] %vm775_vm1, %v5286_v63  ;;  %807 = vst.msk [vmem:[#allocation2 + $0x7c] sm:$0xf] %vm775_vm1, %v5287_v25 }
  0xd3   : > { %vm1001_vm0 = vcmp.eq.s32.totalorder %v909_v60, 1  ;;  %vm1000_vm6 = vcmp.eq.s32.totalorder %v906_v37, 1 }
  0xd4   : > { %v1033_v0 = vsel %vm1001_vm0, %v6104_v8, 0.0  ;;  %v1032_v16 = vsel %vm1000_vm6, %v6108_v10, 0.0 }
  0xd5   : > { %v5289_v45 = vpack.c.bf16 %v1033_v0, %v1033_v0  ;;  %v5288_v46 = vpack.c.bf16 %v1032_v16, %v1032_v16 }
  0xd6   : > { %v912_v59 = vpop.permute.xlu1 %911  ;;  %v915_v57 = vpop.permute.xlu0 %914 }
  0xd7   : > { %vm1002_vm7 = vcmp.eq.s32.totalorder %v912_v59, 1  ;;  %vm1003_vm8 = vcmp.eq.s32.totalorder %v915_v57, 1  ;;  %1162 = vrot.lane.b32.xlu0 %v5289_v45, %s5772_s28  ;;  %1160 = vrot.lane.b32.xlu1 %v5288_v46, %s5772_s28 }
  0xd8   : > { %v1034_v50 = vsel %vm1002_vm7, %v6102_v7, 0.0  ;;  %v1035_v60 = vsel %vm1003_vm8, %v6112_v13, 0.0 }
  0xd9   : > { %v5290_v11 = vpack.c.bf16 %v1034_v50, %v1034_v50  ;;  %v5291_v25 = vpack.c.bf16 %v1035_v60, %v1035_v60 }
  0xda   : > { %v918_v63 = vpop.permute.xlu1 %917  ;;  %v921_v37 = vpop.permute.xlu0 %920 }
  0xdb   : > { %vm1004_vm1 = vcmp.eq.s32.totalorder %v918_v63, 1  ;;  %vm1005_vm9 = vcmp.eq.s32.totalorder %v921_v37, 1  ;;  %1166 = vrot.lane.b32.xlu0 %v5291_v25, %s5772_s28  ;;  %1164 = vrot.lane.b32.xlu1 %v5290_v11, %s5772_s28 }
  0xdc   : > { %v1036_v0 = vsel %vm1004_vm1, %v6119_v19, 0.0  ;;  %v1037_v16 = vsel %vm1005_vm9, %v6121_v20, 0.0 }
  0xdd   : > { %v5292_v45 = vpack.c.bf16 %v1036_v0, %v1036_v0  ;;  %v5293_v46 = vpack.c.bf16 %v1037_v16, %v1037_v16 }
  0xde   : > { %v924_v59 = vpop.permute.xlu1 %923  ;;  %v927_v57 = vpop.permute.xlu0 %926 }
  0xdf   : > { %vm1006_vm10 = vcmp.eq.s32.totalorder %v924_v59, 1  ;;  %vm1007_vm11 = vcmp.eq.s32.totalorder %v927_v57, 1  ;;  %1170 = vrot.lane.b32.xlu0 %v5293_v46, %s5772_s28  ;;  %1168 = vrot.lane.b32.xlu1 %v5292_v45, %s5772_s28 }
  0xe0   : > { %v1038_v50 = vsel %vm1006_vm10, %v6137_v30, 0.0  ;;  %v1039_v60 = vsel %vm1007_vm11, %v6146_v34, 0.0 }
  0xe1   : > { %v5294_v25 = vpack.c.bf16 %v1038_v50, %v1038_v50  ;;  %v5295_v11 = vpack.c.bf16 %v1039_v60, %v1039_v60 }
  0xe2   : > { %v930_v63 = vpop.permute.xlu1 %929  ;;  %v933_v37 = vpop.permute.xlu0 %932 }
  0xe3   : > { %vm1008_vm12 = vcmp.eq.s32.totalorder %v930_v63, 1  ;;  %vm1009_vm13 = vcmp.eq.s32.totalorder %v933_v37, 1  ;;  %1174 = vrot.lane.b32.xlu0 %v5295_v11, %s5772_s28  ;;  %1172 = vrot.lane.b32.xlu1 %v5294_v25, %s5772_s28 }
  0xe4   : > { %v1040_v0 = vsel %vm1008_vm12, %v6156_v43, 0.0  ;;  %v1041_v16 = vsel %vm1009_vm13, %v6168_v53, 0.0 }
  0xe5   : > { %v5296_v46 = vpack.c.bf16 %v1040_v0, %v1040_v0  ;;  %v5297_v45 = vpack.c.bf16 %v1041_v16, %v1041_v16 }
  0xe6   : > { %v936_v59 = vpop.permute.xlu1 %935  ;;  %v939_v57 = vpop.permute.xlu0 %938 }
  0xe7   : > { %vm1010_vm14 = vcmp.eq.s32.totalorder %v936_v59, 1  ;;  %vm1011_vm15 = vcmp.eq.s32.totalorder %v939_v57, 1  ;;  %1178 = vrot.lane.b32.xlu0 %v5297_v45, %s5772_s28  ;;  %1176 = vrot.lane.b32.xlu1 %v5296_v46, %s5772_s28 }
  0xe8   : > { %v1042_v50 = vsel %vm1010_vm14, %v6172_v58, 0.0  ;;  %v1043_v60 = vsel %vm1011_vm15, %v6181_v62, 0.0 }
  0xe9   : > { %v5298_v11 = vpack.c.bf16 %v1042_v50, %v1042_v50  ;;  %v5299_v25 = vpack.c.bf16 %v1043_v60, %v1043_v60 }
  0xea   : > { %v942_v63 = vpop.permute.xlu1 %941  ;;  %v945_v37 = vpop.permute.xlu0 %944 }
  0xeb   : > { %vm1012_vm2 = vcmp.eq.s32.totalorder %v942_v63, 1  ;;  %vm1013_vm3 = vcmp.eq.s32.totalorder %v945_v37, 1  ;;  %1182 = vrot.lane.b32.xlu0 %v5299_v25, %s5772_s28  ;;  %1180 = vrot.lane.b32.xlu1 %v5298_v11, %s5772_s28 }
  0xec   : > { %v1044_v0 = vsel %vm1012_vm2, %v6189_v12, 0.0  ;;  %v1045_v16 = vsel %vm1013_vm3, %v6191_v14, 0.0 }
  0xed   : > { %v5300_v45 = vpack.c.bf16 %v1044_v0, %v1044_v0  ;;  %v5301_v46 = vpack.c.bf16 %v1045_v16, %v1045_v16 }
  0xee   : > { %v948_v59 = vpop.permute.xlu1 %947  ;;  %v951_v57 = vpop.permute.xlu0 %950 }
  0xef   : > { %vm1014_vm4 = vcmp.eq.s32.totalorder %v948_v59, 1  ;;  %vm1015_vm5 = vcmp.eq.s32.totalorder %v951_v57, 1  ;;  %1186 = vrot.lane.b32.xlu0 %v5301_v46, %s5772_s28  ;;  %1184 = vrot.lane.b32.xlu1 %v5300_v45, %s5772_s28 }
  0xf0   : > { %v1046_v50 = vsel %vm1014_vm4, %v6213_v40, 0.0  ;;  %v1047_v60 = vsel %vm1015_vm5, %v6215_v41, 0.0 }
  0xf1   : > { %v5302_v25 = vpack.c.bf16 %v1046_v50, %v1046_v50  ;;  %v5303_v11 = vpack.c.bf16 %v1047_v60, %v1047_v60 }
  0xf2   : > { %v954_v63 = vpop.permute.xlu1 %953  ;;  %v957_v37 = vpop.permute.xlu0 %956 }
  0xf3   : > { %vm1016_vm0 = vcmp.eq.s32.totalorder %v954_v63, 1  ;;  %vm1017_vm6 = vcmp.eq.s32.totalorder %v957_v37, 1  ;;  %1190 = vrot.lane.b32.xlu0 %v5303_v11, %s5772_s28  ;;  %1188 = vrot.lane.b32.xlu1 %v5302_v25, %s5772_s28 }
  0xf4   : > { %v1048_v0 = vsel %vm1016_vm0, %v6228_v55, 0.0  ;;  %v1049_v16 = vsel %vm1017_vm6, %v6240_v5, 0.0 }
  0xf5   : > { %v5304_v46 = vpack.c.bf16 %v1048_v0, %v1048_v0  ;;  %v5305_v45 = vpack.c.bf16 %v1049_v16, %v1049_v16 }
  0xf6   : > { %v960_v59 = vpop.permute.xlu1 %959  ;;  %v963_v57 = vpop.permute.xlu0 %962 }
  0xf7   : > { %vm1018_vm7 = vcmp.eq.s32.totalorder %v960_v59, 1  ;;  %vm1019_vm8 = vcmp.eq.s32.totalorder %v963_v57, 1  ;;  %1194 = vrot.lane.b32.xlu0 %v5305_v45, %s5772_s28  ;;  %1192 = vrot.lane.b32.xlu1 %v5304_v46, %s5772_s28 }
  0xf8   : > { %v1050_v50 = vsel %vm1018_vm7, %v6244_v21, 0.0  ;;  %v1051_v60 = vsel %vm1019_vm8, %v6253_v28, 0.0 }
  0xf9   : > { %v5306_v11 = vpack.c.bf16 %v1050_v50, %v1050_v50  ;;  %v5307_v25 = vpack.c.bf16 %v1051_v60, %v1051_v60 }
  0xfa   : > { %v966_v63 = vpop.permute.xlu1 %965  ;;  %v969_v37 = vpop.permute.xlu0 %968 }
  0xfb   : > { %vm1020_vm1 = vcmp.eq.s32.totalorder %v966_v63, 1  ;;  %vm1021_vm9 = vcmp.eq.s32.totalorder %v969_v37, 1  ;;  %1198 = vrot.lane.b32.xlu0 %v5307_v25, %s5772_s28  ;;  %1196 = vrot.lane.b32.xlu1 %v5306_v11, %s5772_s28 }
  0xfc   : > { %v1052_v0 = vsel %vm1020_vm1, %v6269_v51, 0.0  ;;  %v1053_v16 = vsel %vm1021_vm9, %v6271_v56, 0.0 }
  0xfd   : > { %v5308_v45 = vpack.c.bf16 %v1052_v0, %v1052_v0  ;;  %v5309_v46 = vpack.c.bf16 %v1053_v16, %v1053_v16 }
  0xfe   : > { %v972_v59 = vpop.permute.xlu1 %971  ;;  %v975_v57 = vpop.permute.xlu0 %974 }
  0xff   : > { %vm1022_vm10 = vcmp.eq.s32.totalorder %v972_v59, 1  ;;  %vm1023_vm11 = vcmp.eq.s32.totalorder %v975_v57, 1  ;;  %1202 = vrot.lane.b32.xlu0 %v5309_v46, %s5772_s28  ;;  %1200 = vrot.lane.b32.xlu1 %v5308_v45, %s5772_s28 }
 0x100   : > { %v1054_v50 = vsel %vm1022_vm10, %v6279_v15, 0.0  ;;  %v1055_v60 = vsel %vm1023_vm11, %v6281_v22, 0.0 }
 0x101   : > { %v5310_v25 = vpack.c.bf16 %v1054_v50, %v1054_v50  ;;  %v5311_v11 = vpack.c.bf16 %v1055_v60, %v1055_v60 }
 0x102   : > { %v978_v63 = vpop.permute.xlu1 %977  ;;  %v981_v37 = vpop.permute.xlu0 %980 }
 0x103   : > { %vm1024_vm12 = vcmp.eq.s32.totalorder %v978_v63, 1  ;;  %vm1025_vm13 = vcmp.eq.s32.totalorder %v981_v37, 1  ;;  %1206 = vrot.lane.b32.xlu0 %v5311_v11, %s5772_s28  ;;  %1204 = vrot.lane.b32.xlu1 %v5310_v25, %s5772_s28 }
 0x104   : > { %v1056_v0 = vsel %vm1024_vm12, %v6311_v3, 0.0  ;;  %v1057_v16 = vsel %vm1025_vm13, %v6313_v17, 0.0 }
 0x105   : > { %v5312_v46 = vpack.c.bf16 %v1056_v0, %v1056_v0  ;;  %v5313_v45 = vpack.c.bf16 %v1057_v16, %v1057_v16 }
 0x106   : > { %v984_v59 = vpop.permute.xlu1 %983  ;;  %v987_v57 = vpop.permute.xlu0 %986 }
 0x107   : > { %vm1026_vm14 = vcmp.eq.s32.totalorder %v984_v59, 1  ;;  %vm1027_vm15 = vcmp.eq.s32.totalorder %v987_v57, 1  ;;  %1210 = vrot.lane.b32.xlu0 %v5313_v45, %s5772_s28  ;;  %1208 = vrot.lane.b32.xlu1 %v5312_v46, %s5772_s28 }
 0x108   : > { %v1058_v50 = vsel %vm1026_vm14, %v6315_v24, 0.0  ;;  %v1059_v60 = vsel %vm1027_vm15, %v6317_v38, 0.0 }
 0x109   : > { %v5314_v11 = vpack.c.bf16 %v1058_v50, %v1058_v50  ;;  %v5315_v25 = vpack.c.bf16 %v1059_v60, %v1059_v60  ;;  %v1388_v50 = vld [vmem:[%s8281_s3 + $0x8] sm:$0xff]  ;;  %v1387_v60 = vld [vmem:[%s8281_s3] sm:$0xff] }
 0x10a   : > { %v990_v63 = vpop.permute.xlu1 %989  ;;  %v993_v37 = vpop.permute.xlu0 %992  ;;  %vm1420_vm0 = vcmp.gt.f32.partialorder %v1388_v50, 0.5  ;;  %vm1419_vm6 = vcmp.gt.f32.partialorder %v1387_v60, 0.5  ;;  %v1390_v50 = vld [vmem:[%s8281_s3 + $0x18] sm:$0xff] }
 0x10b   : > { %vm1028_vm2 = vcmp.eq.s32.totalorder %v990_v63, 1  ;;  %vm1029_vm3 = vcmp.eq.s32.totalorder %v993_v37, 1  ;;  %1214 = vrot.lane.b32.xlu0 %v5315_v25, %s5772_s28  ;;  %1212 = vrot.lane.b32.xlu1 %v5314_v11, %s5772_s28  ;;  %vm1422_vm9 = vcmp.gt.f32.partialorder %v1390_v50, 0.5 }
 0x10c   : > { %v1060_v0 = vsel %vm1028_vm2, %v6339_v1, 0.0  ;;  %v1061_v16 = vsel %vm1029_vm3, %v6341_v29, 0.0 }
 0x10d   : > { %v5316_v45 = vpack.c.bf16 %v1060_v0, %v1060_v0  ;;  %v5317_v46 = vpack.c.bf16 %v1061_v16, %v1061_v16  ;;  %v1391_v0 = vld [vmem:[%s8281_s3 + $0x20] sm:$0xff]  ;;  %v1389_v16 = vld [vmem:[%s8281_s3 + $0x10] sm:$0xff] }
 0x10e   : > { %v996_v59 = vpop.permute.xlu1 %995  ;;  %v999_v57 = vpop.permute.xlu0 %998  ;;  %vm1423_vm7 = vcmp.gt.f32.partialorder %v1391_v0, 0.5  ;;  %vm1421_vm8 = vcmp.gt.f32.partialorder %v1389_v16, 0.5  ;;  %v1397_v16 = vld [vmem:[%s8281_s3 + $0x50] sm:$0xff] }
 0x10f   : > { %vm1030_vm4 = vcmp.eq.s32.totalorder %v996_v59, 1  ;;  %vm1031_vm5 = vcmp.eq.s32.totalorder %v999_v57, 1  ;;  %1218 = vrot.lane.b32.xlu0 %v5317_v46, %s5772_s28  ;;  %1216 = vrot.lane.b32.xlu1 %v5316_v45, %s5772_s28  ;;  %v8481_v45 = vmov 0   ;;  %v1393_v57 = vld [vmem:[%s8281_s3 + $0x30] sm:$0xff]  ;;  %vm1429_vm12 = vcmp.gt.f32.partialorder %v1397_v16, 0.5 }
 0x110   : > { %v1062_v11 = vsel %vm1030_vm4, %v6362_v35, 0.0  ;;  %v1063_v25 = vsel %vm1031_vm5, %v6106_v9, 0.0  ;;  %v6470_v46 = vsel %vm1420_vm0, 1, %v8481_v45  ;;  %v6473_v59 = vsel %vm1419_vm6, 1, %v8481_v45  ;;  %v1401_v16 = vld [vmem:[%s8281_s3 + $0x70] sm:$0xff] }
 0x111   : > { %v5318_v63 = vpack.c.bf16 %v1062_v11, %v1062_v11  ;;  %v5319_v37 = vpack.c.bf16 %v1063_v25, %v1063_v25  ;;  %v6484_v60 = vsel %vm1423_vm7, 1, %v8481_v45  ;;  %v6487_v11 = vsel %vm1421_vm8, 1, %v8481_v45  ;;  %v1395_v25 = vld [vmem:[%s8281_s3 + $0x40] sm:$0xff] }
 0x112   : > { %vm1425_vm1 = vcmp.gt.f32.partialorder %v1393_v57, 0.5  ;;  %v6501_v0 = vsel %vm1422_vm9, 1, %v8481_v45  ;;  %vm1427_vm10 = vcmp.gt.f32.partialorder %v1395_v25, 0.5  ;;  %v1394_v57 = vld [vmem:[%s8281_s3 + $0x38] sm:$0xff]  ;;  %v1399_v25 = vld [vmem:[%s8281_s3 + $0x60] sm:$0xff]  ;;  %v6526_v49 = vsel %vm1429_vm12, 1, %v8481_v45 }
 0x113   : > { %1222 = vrot.lane.b32.xlu0 %v5319_v37, %s5772_s28  ;;  %1220 = vrot.lane.b32.xlu1 %v5318_v63, %s5772_s28  ;;  %v1392_v63 = vld [vmem:[%s8281_s3 + $0x28] sm:$0xff]  ;;  %v6498_v37 = vsel %vm1425_vm1, 1, %v8481_v45  ;;  %v6512_v50 = vsel %vm1427_vm10, 1, %v8481_v45  ;;  %vm1426_vm13 = vcmp.gt.f32.partialorder %v1394_v57, 0.5  ;;  %vm1431_vm14 = vcmp.gt.f32.partialorder %v1399_v25, 0.5  ;;  %v1398_v57 = vld [vmem:[%s8281_s3 + $0x58] sm:$0xff] }
 0x114   : > { %vm1424_vm11 = vcmp.gt.f32.partialorder %v1392_v63, 0.5  ;;  %v1396_v63 = vld [vmem:[%s8281_s3 + $0x48] sm:$0xff]  ;;  %v6529_v39 = vsel %vm1426_vm13, 1, %v8481_v45  ;;  %v6540_v6 = vsel %vm1431_vm14, 1, %v8481_v45  ;;  %vm1433_vm2 = vcmp.gt.f32.partialorder %v1401_v16, 0.5  ;;  %v1403_v25 = vld [vmem:[%s8281_s3 + $0x80] sm:$0xff] }
 0x115   : > { %v6515_v31 = vsel %vm1424_vm11, 1, %v8481_v45  ;;  %vm1428_vm15 = vcmp.gt.f32.partialorder %v1396_v63, 0.5  ;;  %vm1430_vm3 = vcmp.gt.f32.partialorder %v1398_v57, 0.5  ;;  %v1400_v63 = vld [vmem:[%s8281_s3 + $0x68] sm:$0xff]  ;;  %v6554_v36 = vsel %vm1433_vm2, 1, %v8481_v45  ;;  %v1405_v16 = vld [vmem:[%s8281_s3 + $0x90] sm:$0xff] }
 0x116   : > { %v6543_v44 = vsel %vm1428_vm15, 1, %v8481_v45  ;;  %v6557_v32 = vsel %vm1430_vm3, 1, %v8481_v45  ;;  %vm1435_vm4 = vcmp.gt.f32.partialorder %v1403_v25, 0.5  ;;  %vm1432_vm5 = vcmp.gt.f32.partialorder %v1400_v63, 0.5  ;;  %v1402_v57 = vld [vmem:[%s8281_s3 + $0x78] sm:$0xff]  ;;  %v1407_v25 = vld [vmem:[%s8281_s3 + $0xa0] sm:$0xff] }
 0x117   : > { %1487 = vperm.xlu0 %5639, %v6470_v46   ;;  %1484 = vperm.xlu1 %5638, %v6473_v59   ;;  %v6568_v27 = vsel %vm1435_vm4, 1, %v8481_v45  ;;  %v6571_v54 = vsel %vm1432_vm5, 1, %v8481_v45  ;;  %vm1437_vm0 = vcmp.gt.f32.partialorder %v1405_v16, 0.5  ;;  %vm1434_vm6 = vcmp.gt.f32.partialorder %v1402_v57, 0.5  ;;  %v1404_v63 = vld [vmem:[%s8281_s3 + $0x88] sm:$0xff]  ;;  %v1409_v16 = vld [vmem:[%s8281_s3 + $0xb0] sm:$0xff] }
 0x118   : > { %v6582_v2 = vsel %vm1437_vm0, 1, %v8481_v45  ;;  %v6585_v48 = vsel %vm1434_vm6, 1, %v8481_v45  ;;  %vm1439_vm7 = vcmp.gt.f32.partialorder %v1407_v25, 0.5  ;;  %vm1436_vm8 = vcmp.gt.f32.partialorder %v1404_v63, 0.5  ;;  %v1406_v57 = vld [vmem:[%s8281_s3 + $0x98] sm:$0xff]  ;;  %v1411_v25 = vld [vmem:[%s8281_s3 + $0xc0] sm:$0xff] }
 0x119   : > { %8482 = vst [vmem:[#allocation70_spill] sm:$0xff] %v6582_v2  ;;  %v6596_v47 = vsel %vm1439_vm7, 1, %v8481_v45  ;;  %v6599_v18 = vsel %vm1436_vm8, 1, %v8481_v45  ;;  %vm1441_vm1 = vcmp.gt.f32.partialorder %v1409_v16, 0.5  ;;  %vm1438_vm9 = vcmp.gt.f32.partialorder %v1406_v57, 0.5  ;;  %v1408_v63 = vld [vmem:[%s8281_s3 + $0xa8] sm:$0xff] }
 0x11a   : > { %8483 = vst [vmem:[#allocation71_spill] sm:$0xff] %v6596_v47  ;;  %v6610_v26 = vsel %vm1441_vm1, 1, %v8481_v45  ;;  %v6613_v4 = vsel %vm1438_vm9, 1, %v8481_v45  ;;  %vm1443_vm10 = vcmp.gt.f32.partialorder %v1411_v25, 0.5  ;;  %vm1440_vm11 = vcmp.gt.f32.partialorder %v1408_v63, 0.5  ;;  %v1413_v16 = vld [vmem:[%s8281_s3 + $0xd0] sm:$0xff] }
 0x11b   : > { %1496 = vperm.xlu0 %5639, %v6484_v60   ;;  %1490 = vperm.xlu1 %5638, %v6487_v11   ;;  %8484 = vst [vmem:[#allocation72_spill] sm:$0xff] %v6610_v26  ;;  %v1410_v57 = vld [vmem:[%s8281_s3 + $0xb8] sm:$0xff]  ;;  %v6624_v61 = vsel %vm1443_vm10, 1, %v8481_v45  ;;  %v6627_v42 = vsel %vm1440_vm11, 1, %v8481_v45  ;;  %vm1445_vm12 = vcmp.gt.f32.partialorder %v1413_v16, 0.5  ;;  %v1415_v25 = vld [vmem:[%s8281_s3 + $0xe0] sm:$0xff] }
 0x11c   : > { %8485 = vst [vmem:[#allocation73_spill] sm:$0xff] %v6624_v61  ;;  %8486 = vst [vmem:[#allocation74_spill] sm:$0xff] %v6627_v42  ;;  %vm1442_vm13 = vcmp.gt.f32.partialorder %v1410_v57, 0.5  ;;  %v1412_v63 = vld [vmem:[%s8281_s3 + $0xc8] sm:$0xff]  ;;  %v6638_v52 = vsel %vm1445_vm12, 1, %v8481_v45  ;;  %vm1447_vm14 = vcmp.gt.f32.partialorder %v1415_v25, 0.5 }
 0x11d   : > { %8487 = vst [vmem:[#allocation75_spill] sm:$0xff] %v6638_v52  ;;  %v6641_v33 = vsel %vm1442_vm13, 1, %v8481_v45  ;;  %vm1444_vm15 = vcmp.gt.f32.partialorder %v1412_v63, 0.5  ;;  %v1417_v16 = vld [vmem:[%s8281_s3 + $0xf0] sm:$0xff]  ;;  %v1414_v57 = vld [vmem:[%s8281_s3 + $0xd8] sm:$0xff]  ;;  %vm1256_vm2 = vcmask 60448  }
 0x11e   : > { %8488 = vst [vmem:[#allocation76_spill] sm:$0xff] %v6641_v33  ;;  %v6652_v23 = vsel %vm1447_vm14, 1, %v8481_v45  ;;  %vm1449_vm3 = vcmp.gt.f32.partialorder %v1417_v16, 0.5  ;;  %vm1446_vm4 = vcmp.gt.f32.partialorder %v1414_v57, 0.5  ;;  %vm1289_vm0 = vcmask 1046528  }
 0x11f   : > { %1502 = vperm.xlu0 %5639, %v6498_v37   ;;  %1493 = vperm.xlu1 %5638, %v6501_v0   ;;  %8489 = vst [vmem:[#allocation77_spill] sm:$0xff] %v6652_v23 }
 0x123   : > { %1508 = vperm.xlu0 %5639, %v6512_v50   ;;  %1499 = vperm.xlu1 %5638, %v6515_v31  }
 0x127   : > { %1514 = vperm.xlu0 %5639, %v6526_v49   ;;  %1505 = vperm.xlu1 %5638, %v6529_v39  }
 0x12b   : > { %1520 = vperm.xlu0 %5639, %v6540_v6   ;;  %1511 = vperm.xlu1 %5638, %v6543_v44  }
 0x12f   : > { %1526 = vperm.xlu0 %5639, %v6554_v36   ;;  %1517 = vperm.xlu1 %5638, %v6557_v32  }
 0x133   : > { %1532 = vperm.xlu0 %5639, %v6568_v27   ;;  %1523 = vperm.xlu1 %5638, %v6571_v54  }
 0x137   : > { %1538 = vperm.xlu0 %5639, %v6582_v2   ;;  %1529 = vperm.xlu1 %5638, %v6585_v48  }
 0x13b   : > { %1544 = vperm.xlu0 %5639, %v6596_v47   ;;  %1535 = vperm.xlu1 %5638, %v6599_v18   ;;  %v6668_v47 = vsel %vm1446_vm4, 1, %v8481_v45 }
 0x13c   : > { %8492 = vst [vmem:[#allocation80_spill] sm:$0xff] %v6668_v47 }
 0x13f   : > { %1550 = vperm.xlu0 %5639, %v6610_v26   ;;  %1541 = vperm.xlu1 %5638, %v6613_v4   ;;  %v6665_v26 = vsel %vm1449_vm3, 1, %v8481_v45 }
 0x140   : > { %8491 = vst [vmem:[#allocation79_spill] sm:$0xff] %v6665_v26 }
 0x143   : > { %1556 = vperm.xlu0 %5639, %v6624_v61   ;;  %1547 = vperm.xlu1 %5638, %v6627_v42   ;;  %v6655_v61 = vsel %vm1444_vm15, 1, %v8481_v45 }
 0x144   : > { %8490 = vst [vmem:[#allocation78_spill] sm:$0xff] %v6655_v61 }
 0x147   : > { %1562 = vperm.xlu0 %5639, %v6638_v52   ;;  %1553 = vperm.xlu1 %5638, %v6641_v33   ;;  %v1416_v52 = vld [vmem:[%s8281_s3 + $0xe8] sm:$0xff] }
 0x148   : > { %vm1448_vm5 = vcmp.gt.f32.partialorder %v1416_v52, 0.5 }
 0x149   : > { %v1163_v25 = vpop.permute.xlu0 %1162  ;;  %v1161_v63 = vpop.permute.xlu1 %1160 }
 0x14a   : > { %1258 = vst.msk [vmem:[#allocation2 + $0x4] sm:$0xf] %vm1256_vm2, %v1163_v25  ;;  %1257 = vst.msk [vmem:[#allocation2] sm:$0xf] %vm1256_vm2, %v1161_v63  ;;  %v1418_v25 = vld [vmem:[%s8281_s3 + $0xf8] sm:$0xff]  ;;  %v8360_v63 = vrot.slane %v6108_v10, 1 }
 0x14b   : > { %1568 = vperm.xlu0 %5639, %v6652_v23   ;;  %1559 = vperm.xlu1 %5638, %v6655_v61   ;;  %v8359_v23 = vrot.slane %v6106_v9, 1  ;;  %v6680_v61 = vsel %vm1448_vm5, 1, %v8481_v45  ;;  %vm1450_vm6 = vcmp.gt.f32.partialorder %v1418_v25, 0.5  ;;  %v5773_v25 = vmov 3  }
 0x14c   : > { %8493 = vst [vmem:[#allocation81_spill] sm:$0xff] %v6680_v61 }
 0x14d   : > { %v1167_v16 = vpop.permute.xlu0 %1166  ;;  %v1165_v57 = vpop.permute.xlu1 %1164 }
 0x14e   : > { %1260 = vst.msk [vmem:[#allocation2 + $0xc] sm:$0xf] %vm1256_vm2, %v1167_v16  ;;  %1259 = vst.msk [vmem:[#allocation2 + $0x8] sm:$0xf] %vm1256_vm2, %v1165_v57  ;;  %v6687_v57 = vsel %vm1289_vm0, %v8359_v23, %v8360_v63 }
 0x14f   : > { %1574 = vperm.xlu0 %5639, %v6665_v26   ;;  %1565 = vperm.xlu1 %5638, %v6668_v47   ;;  %v6693_v26 = vsel %vm1450_vm6, 1, %v8481_v45 }
 0x150   : > { %8494 = vst [vmem:[#allocation82_spill] sm:$0xff] %v6693_v26 }
 0x151   : > { %v1171_v52 = vpop.permute.xlu0 %1170  ;;  %v1169_v16 = vpop.permute.xlu1 %1168 }
 0x152   : > { %1262 = vst.msk [vmem:[#allocation2 + $0x14] sm:$0xf] %vm1256_vm2, %v1171_v52  ;;  %1261 = vst.msk [vmem:[#allocation2 + $0x10] sm:$0xf] %vm1256_vm2, %v1169_v16 }
 0x153   : > { %1571 = vperm.xlu1 %5638, %v6680_v61   ;;  %5640 = vset.pattern.permute.xlu0 %v5773_v25 }
 0x155   : > { %v1175_v47 = vpop.permute.xlu0 %1174  ;;  %v1173_v33 = vpop.permute.xlu1 %1172 }
 0x156   : > { %1264 = vst.msk [vmem:[#allocation2 + $0x1c] sm:$0xf] %vm1256_vm2, %v1175_v47  ;;  %1263 = vst.msk [vmem:[#allocation2 + $0x18] sm:$0xf] %vm1256_vm2, %v1173_v33 }
 0x157   : > { %1577 = vperm.xlu1 %5638, %v6693_v26  }
 0x159   : > { %v1179_v23 = vpop.permute.xlu0 %1178  ;;  %v1177_v63 = vpop.permute.xlu1 %1176 }
 0x15a   : > { %1266 = vst.msk [vmem:[#allocation2 + $0x24] sm:$0xf] %vm1256_vm2, %v1179_v23  ;;  %1265 = vst.msk [vmem:[#allocation2 + $0x20] sm:$0xf] %vm1256_vm2, %v1177_v63 }
 0x15b   : > { %5641 = vset.pattern.permute.xlu1 %v5773_v25 }
 0x15d   : > { %v1183_v52 = vpop.permute.xlu0 %1182  ;;  %v1181_v16 = vpop.permute.xlu1 %1180 }
 0x15e   : > { %1268 = vst.msk [vmem:[#allocation2 + $0x2c] sm:$0xf] %vm1256_vm2, %v1183_v52  ;;  %1267 = vst.msk [vmem:[#allocation2 + $0x28] sm:$0xf] %vm1256_vm2, %v1181_v16 }
 0x161   : > { %v1187_v47 = vpop.permute.xlu0 %1186  ;;  %v1185_v45 = vpop.permute.xlu1 %1184 }
 0x162   : > { %1270 = vst.msk [vmem:[#allocation2 + $0x34] sm:$0xf] %vm1256_vm2, %v1187_v47  ;;  %1269 = vst.msk [vmem:[#allocation2 + $0x30] sm:$0xf] %vm1256_vm2, %v1185_v45 }
 0x165   : > { %v1191_v33 = vpop.permute.xlu0 %1190  ;;  %v1189_v26 = vpop.permute.xlu1 %1188 }
 0x166   : > { %1272 = vst.msk [vmem:[#allocation2 + $0x3c] sm:$0xf] %vm1256_vm2, %v1191_v33  ;;  %1271 = vst.msk [vmem:[#allocation2 + $0x38] sm:$0xf] %vm1256_vm2, %v1189_v26 }
 0x169   : > { %v1195_v23 = vpop.permute.xlu0 %1194  ;;  %v1193_v63 = vpop.permute.xlu1 %1192 }
 0x16a   : > { %1274 = vst.msk [vmem:[#allocation2 + $0x44] sm:$0xf] %vm1256_vm2, %v1195_v23  ;;  %1273 = vst.msk [vmem:[#allocation2 + $0x40] sm:$0xf] %vm1256_vm2, %v1193_v63 }
 0x16d   : > { %v1199_v25 = vpop.permute.xlu0 %1198  ;;  %v1197_v52 = vpop.permute.xlu1 %1196 }
 0x16e   : > { %1276 = vst.msk [vmem:[#allocation2 + $0x4c] sm:$0xf] %vm1256_vm2, %v1199_v25  ;;  %1275 = vst.msk [vmem:[#allocation2 + $0x48] sm:$0xf] %vm1256_vm2, %v1197_v52 }
 0x171   : > { %v1203_v16 = vpop.permute.xlu0 %1202  ;;  %v1201_v45 = vpop.permute.xlu1 %1200 }
 0x172   : > { %1278 = vst.msk [vmem:[#allocation2 + $0x54] sm:$0xf] %vm1256_vm2, %v1203_v16  ;;  %1277 = vst.msk [vmem:[#allocation2 + $0x50] sm:$0xf] %vm1256_vm2, %v1201_v45 }
 0x175   : > { %v1207_v47 = vpop.permute.xlu0 %1206  ;;  %v1205_v26 = vpop.permute.xlu1 %1204 }
 0x176   : > { %1280 = vst.msk [vmem:[#allocation2 + $0x5c] sm:$0xf] %vm1256_vm2, %v1207_v47  ;;  %1279 = vst.msk [vmem:[#allocation2 + $0x58] sm:$0xf] %vm1256_vm2, %v1205_v26  ;;  %v1291_v26 = vrot.slane %v6104_v8, 1 }
 0x179   : > { %v1211_v33 = vpop.permute.xlu0 %1210  ;;  %v1209_v23 = vpop.permute.xlu1 %1208 }
 0x17a   : > { %1282 = vst.msk [vmem:[#allocation2 + $0x64] sm:$0xf] %vm1256_vm2, %v1211_v33  ;;  %1281 = vst.msk [vmem:[#allocation2 + $0x60] sm:$0xf] %vm1256_vm2, %v1209_v23  ;;  %v1295_v33 = vrot.slane %v6102_v7, 1 }
 0x17c   : > { %v6725_v23 = vsel %vm1289_vm0, %v1291_v26, %v1295_v33 }
 0x17d   : > { %v1215_v63 = vpop.permute.xlu0 %1214  ;;  %v1213_v25 = vpop.permute.xlu1 %1212  ;;  %8495 = vst [vmem:[#allocation83_spill] sm:$0xff] %v6725_v23 }
 0x17e   : > { %1284 = vst.msk [vmem:[#allocation2 + $0x6c] sm:$0xf] %vm1256_vm2, %v1215_v63  ;;  %1283 = vst.msk [vmem:[#allocation2 + $0x68] sm:$0xf] %vm1256_vm2, %v1213_v25  ;;  %v8496_v63 = vrot.slane %v6108_v10, 1 }
 0x180   : > { %v6730_v25 = vsel %vm1289_vm0, %v8496_v63, %v1291_v26 }
 0x181   : > { %v1219_v52 = vpop.permute.xlu0 %1218  ;;  %v1217_v16 = vpop.permute.xlu1 %1216  ;;  %8497 = vst [vmem:[#allocation84_spill] sm:$0xff] %v6730_v25 }
 0x182   : > { %1286 = vst.msk [vmem:[#allocation2 + $0x74] sm:$0xf] %vm1256_vm2, %v1219_v52  ;;  %1285 = vst.msk [vmem:[#allocation2 + $0x70] sm:$0xf] %vm1256_vm2, %v1217_v16  ;;  %v1296_v52 = vrot.slane %v6112_v13, 1  ;;  %v1302_v13 = vrot.slane %v6137_v30, 1 }
 0x184   : > { %v6738_v10 = vsel %vm1289_vm0, %v1295_v33, %v1296_v52 }
 0x185   : > { %v1223_v45 = vpop.permute.xlu0 %1222  ;;  %v1221_v47 = vpop.permute.xlu1 %1220  ;;  %8498 = vst [vmem:[#allocation85_spill] sm:$0xff] %v6738_v10 }
 0x186   : > { %1288 = vst.msk [vmem:[#allocation2 + $0x7c] sm:$0xf] %vm1256_vm2, %v1223_v45  ;;  %1287 = vst.msk [vmem:[#allocation2 + $0x78] sm:$0xf] %vm1256_vm2, %v1221_v47  ;;  %v1298_v45 = vrot.slane %v6119_v19, 1  ;;  %v1300_v47 = vrot.slane %v6121_v20, 1 }
 0x188   : > { %v6749_v33 = vsel %vm1289_vm0, %v1296_v52, %v1298_v45 }
 0x189   : > { %8499 = vst [vmem:[#allocation86_spill] sm:$0xff] %v6749_v33 }
 0x192   : > { %v1488_v16 = vpop.permute.xlu0 %1487  ;;  %v1485_v61 = vpop.permute.xlu1 %1484 }
 0x193   : > { %vm1580_vm7 = vcmp.eq.s32.totalorder %v1488_v16, 1  ;;  %vm1579_vm8 = vcmp.eq.s32.totalorder %v1485_v61, 1  ;;  %v1304_v16 = vrot.slane %v6146_v34, 1  ;;  %v6743_v61 = vsel %vm1289_vm0, %v1298_v45, %v1300_v47 }
 0x194   : > { %v1612_v7 = vsel %vm1580_vm7, %v6725_v23, 0.0  ;;  %v1611_v8 = vsel %vm1579_vm8, %v6730_v25, 0.0  ;;  %v6760_v45 = vsel %vm1289_vm0, %v1300_v47, %v1302_v13 }
 0x195   : > { %v5321_v2 = vpack.c.bf16 %v1612_v7, %v1612_v7  ;;  %v5320_v42 = vpack.c.bf16 %v1611_v8, %v1611_v8  ;;  %v6753_v19 = vsel %vm1289_vm0, %v1302_v13, %v1304_v16 }
 0x196   : > { %v1497_v26 = vpop.permute.xlu0 %1496  ;;  %v1491_v63 = vpop.permute.xlu1 %1490 }
 0x197   : > { %vm1583_vm1 = vcmp.eq.s32.totalorder %v1497_v26, 1  ;;  %vm1581_vm9 = vcmp.eq.s32.totalorder %v1491_v63, 1  ;;  %1739 = vrot.lane.b32.xlu0 %v5320_v42, %s5774_s29  ;;  %1741 = vrot.lane.b32.xlu1 %v5321_v2, %s5774_s29  ;;  %v1306_v42 = vrot.slane %v6156_v43, 1  ;;  %v1308_v2 = vrot.slane %v6168_v53, 1 }
 0x198   : > { %v1613_v7 = vsel %vm1581_vm9, %v6738_v10, 0.0  ;;  %v1615_v30 = vsel %vm1583_vm1, %v6743_v61, 0.0 }
 0x199   : > { %v5322_v8 = vpack.c.bf16 %v1613_v7, %v1613_v7  ;;  %v5324_v63 = vpack.c.bf16 %v1615_v30, %v1615_v30 }
 0x19a   : > { %v1503_v34 = vpop.permute.xlu0 %1502  ;;  %v1494_v20 = vpop.permute.xlu1 %1493 }
 0x19b   : > { %vm1585_vm10 = vcmp.eq.s32.totalorder %v1503_v34, 1  ;;  %vm1582_vm11 = vcmp.eq.s32.totalorder %v1494_v20, 1  ;;  %1743 = vrot.lane.b32.xlu0 %v5322_v8, %s5774_s29  ;;  %v1310_v34 = vrot.slane %v6172_v58, 1  ;;  %v1312_v20 = vrot.slane %v6181_v62, 1 }
 0x19c   : > { %v1614_v26 = vsel %vm1582_vm11, %v6749_v33, 0.0  ;;  %v1617_v7 = vsel %vm1585_vm10, %v6753_v19, 0.0  ;;  %v6766_v8 = vsel %vm1289_vm0, %v1306_v42, %v1308_v2 }
 0x19d   : > { %v5323_v52 = vpack.c.bf16 %v1614_v26, %v1614_v26  ;;  %v5326_v30 = vpack.c.bf16 %v1617_v7, %v1617_v7  ;;  %v6772_v26 = vsel %vm1289_vm0, %v1304_v16, %v1306_v42  ;;  %v6776_v62 = vsel %vm1289_vm0, %v1310_v34, %v1312_v20 }
 0x19e   : > { %v1509_v23 = vpop.permute.xlu0 %1508  ;;  %v1500_v25 = vpop.permute.xlu1 %1499 }
 0x19f   : > { %vm1587_vm12 = vcmp.eq.s32.totalorder %v1509_v23, 1  ;;  %vm1584_vm13 = vcmp.eq.s32.totalorder %v1500_v25, 1  ;;  %1747 = vrot.lane.b32.xlu0 %v5324_v63, %s5774_s29  ;;  %1745 = vrot.lane.b32.xlu1 %v5323_v52, %s5774_s29  ;;  %v1314_v23 = vrot.slane %v6189_v12, 1  ;;  %v1316_v25 = vrot.slane %v6191_v14, 1 }
 0x1a0   : > { %v1616_v13 = vsel %vm1584_vm13, %v6760_v45, 0.0  ;;  %v1619_v58 = vsel %vm1587_vm12, %v6766_v8, 0.0  ;;  %v6784_v52 = vsel %vm1289_vm0, %v1308_v2, %v1310_v34 }
 0x1a1   : > { %v5325_v47 = vpack.c.bf16 %v1616_v13, %v1616_v13  ;;  %v5328_v42 = vpack.c.bf16 %v1619_v58, %v1619_v58 }
 0x1a2   : > { %v1515_v53 = vpop.permute.xlu0 %1514  ;;  %v1506_v43 = vpop.permute.xlu1 %1505 }
 0x1a3   : > { %vm1589_vm14 = vcmp.eq.s32.totalorder %v1515_v53, 1  ;;  %vm1586_vm15 = vcmp.eq.s32.totalorder %v1506_v43, 1  ;;  %1751 = vrot.lane.b32.xlu0 %v5326_v30, %s5774_s29  ;;  %1749 = vrot.lane.b32.xlu1 %v5325_v47, %s5774_s29  ;;  %v1318_v43 = vrot.slane %v6213_v40, 1  ;;  %v1320_v30 = vrot.slane %v6215_v41, 1 }
 0x1a4   : > { %v1618_v16 = vsel %vm1586_vm15, %v6772_v26, 0.0  ;;  %v1621_v7 = vsel %vm1589_vm14, %v6776_v62, 0.0  ;;  %v6790_v47 = vsel %vm1289_vm0, %v1314_v23, %v1316_v25 }
 0x1a5   : > { %v5327_v63 = vpack.c.bf16 %v1618_v16, %v1618_v16  ;;  %v5330_v2 = vpack.c.bf16 %v1621_v7, %v1621_v7  ;;  %v6796_v16 = vsel %vm1289_vm0, %v1312_v20, %v1314_v23  ;;  %v6800_v41 = vsel %vm1289_vm0, %v1318_v43, %v1320_v30 }
 0x1a6   : > { %v1521_v13 = vpop.permute.xlu0 %1520  ;;  %v1512_v53 = vpop.permute.xlu1 %1511 }
 0x1a7   : > { %vm1591_vm2 = vcmp.eq.s32.totalorder %v1521_v13, 1  ;;  %vm1588_vm3 = vcmp.eq.s32.totalorder %v1512_v53, 1  ;;  %1755 = vrot.lane.b32.xlu0 %v5328_v42, %s5774_s29  ;;  %1753 = vrot.lane.b32.xlu1 %v5327_v63, %s5774_s29  ;;  %v1322_v42 = vrot.slane %v6228_v55, 1  ;;  %v1324_v63 = vrot.slane %v6240_v5, 1 }
 0x1a8   : > { %v1620_v58 = vsel %vm1588_vm3, %v6784_v52, 0.0  ;;  %v1623_v40 = vsel %vm1591_vm2, %v6790_v47, 0.0  ;;  %v6808_v13 = vsel %vm1289_vm0, %v1316_v25, %v1318_v43 }
 0x1a9   : > { %v5329_v34 = vpack.c.bf16 %v1620_v58, %v1620_v58  ;;  %v5332_v23 = vpack.c.bf16 %v1623_v40, %v1623_v40 }
 0x1aa   : > { %v1527_v14 = vpop.permute.xlu0 %1526  ;;  %v1518_v12 = vpop.permute.xlu1 %1517 }
 0x1ab   : > { %vm1593_vm4 = vcmp.eq.s32.totalorder %v1527_v14, 1  ;;  %vm1590_vm5 = vcmp.eq.s32.totalorder %v1518_v12, 1  ;;  %1759 = vrot.lane.b32.xlu0 %v5330_v2, %s5774_s29  ;;  %1757 = vrot.lane.b32.xlu1 %v5329_v34, %s5774_s29  ;;  %v1326_v12 = vrot.slane %v6244_v21, 1  ;;  %v1328_v2 = vrot.slane %v6253_v28, 1 }
 0x1ac   : > { %v1622_v20 = vsel %vm1590_vm5, %v6796_v16, 0.0  ;;  %v1625_v53 = vsel %vm1593_vm4, %v6800_v41, 0.0  ;;  %v6814_v34 = vsel %vm1289_vm0, %v1322_v42, %v1324_v63 }
 0x1ad   : > { %v5331_v7 = vpack.c.bf16 %v1622_v20, %v1622_v20  ;;  %v5334_v25 = vpack.c.bf16 %v1625_v53, %v1625_v53  ;;  %v6820_v20 = vsel %vm1289_vm0, %v1320_v30, %v1322_v42  ;;  %v6824_v28 = vsel %vm1289_vm0, %v1326_v12, %v1328_v2 }
 0x1ae   : > { %v1533_v58 = vpop.permute.xlu0 %1532  ;;  %v1524_v14 = vpop.permute.xlu1 %1523 }
 0x1af   : > { %vm1595_vm6 = vcmp.eq.s32.totalorder %v1533_v58, 1  ;;  %vm1592_vm7 = vcmp.eq.s32.totalorder %v1524_v14, 1  ;;  %1763 = vrot.lane.b32.xlu0 %v5332_v23, %s5774_s29  ;;  %1761 = vrot.lane.b32.xlu1 %v5331_v7, %s5774_s29  ;;  %v1330_v23 = vrot.slane %v6269_v51, 1  ;;  %v1332_v7 = vrot.slane %v6271_v56, 1 }
 0x1b0   : > { %v1624_v40 = vsel %vm1592_vm7, %v6808_v13, 0.0  ;;  %v1627_v21 = vsel %vm1595_vm6, %v6814_v34, 0.0  ;;  %v6832_v58 = vsel %vm1289_vm0, %v1324_v63, %v1326_v12 }
 0x1b1   : > { %v5333_v43 = vpack.c.bf16 %v1624_v40, %v1624_v40  ;;  %v5336_v42 = vpack.c.bf16 %v1627_v21, %v1627_v21 }
 0x1b2   : > { %v1539_v5 = vpop.permute.xlu0 %1538  ;;  %v1530_v55 = vpop.permute.xlu1 %1529 }
 0x1b3   : > { %vm1597_vm8 = vcmp.eq.s32.totalorder %v1539_v5, 1  ;;  %vm1594_vm1 = vcmp.eq.s32.totalorder %v1530_v55, 1  ;;  %1767 = vrot.lane.b32.xlu0 %v5334_v25, %s5774_s29  ;;  %1765 = vrot.lane.b32.xlu1 %v5333_v43, %s5774_s29  ;;  %v1334_v55 = vrot.slane %v6279_v15, 1  ;;  %v1336_v25 = vrot.slane %v6281_v22, 1 }
 0x1b4   : > { %v1626_v30 = vsel %vm1594_vm1, %v6820_v20, 0.0  ;;  %v1629_v14 = vsel %vm1597_vm8, %v6824_v28, 0.0  ;;  %v6838_v43 = vsel %vm1289_vm0, %v1330_v23, %v1332_v7 }
 0x1b5   : > { %v5335_v53 = vpack.c.bf16 %v1626_v30, %v1626_v30  ;;  %v5338_v63 = vpack.c.bf16 %v1629_v14, %v1629_v14  ;;  %v6844_v30 = vsel %vm1289_vm0, %v1328_v2, %v1330_v23  ;;  %v6848_v51 = vsel %vm1289_vm0, %v1334_v55, %v1336_v25 }
 0x1b6   : > { %v1545_v40 = vpop.permute.xlu0 %1544  ;;  %v1536_v5 = vpop.permute.xlu1 %1535 }
 0x1b7   : > { %vm1599_vm9 = vcmp.eq.s32.totalorder %v1545_v40, 1  ;;  %vm1596_vm10 = vcmp.eq.s32.totalorder %v1536_v5, 1  ;;  %1771 = vrot.lane.b32.xlu0 %v5336_v42, %s5774_s29  ;;  %1769 = vrot.lane.b32.xlu1 %v5335_v53, %s5774_s29  ;;  %v1338_v42 = vrot.slane %v6311_v3, 1  ;;  %v1340_v53 = vrot.slane %v6313_v17, 1 }
 0x1b8   : > { %v1628_v21 = vsel %vm1596_vm10, %v6832_v58, 0.0  ;;  %v1631_v15 = vsel %vm1599_vm9, %v6838_v43, 0.0  ;;  %v6856_v40 = vsel %vm1289_vm0, %v1332_v7, %v1334_v55 }
 0x1b9   : > { %v5337_v12 = vpack.c.bf16 %v1628_v21, %v1628_v21  ;;  %v5340_v23 = vpack.c.bf16 %v1631_v15, %v1631_v15 }
 0x1ba   : > { %v1551_v22 = vpop.permute.xlu0 %1550  ;;  %v1542_v56 = vpop.permute.xlu1 %1541 }
 0x1bb   : > { %vm1601_vm11 = vcmp.eq.s32.totalorder %v1551_v22, 1  ;;  %vm1598_vm12 = vcmp.eq.s32.totalorder %v1542_v56, 1  ;;  %1775 = vrot.lane.b32.xlu0 %v5338_v63, %s5774_s29  ;;  %1773 = vrot.lane.b32.xlu1 %v5337_v12, %s5774_s29  ;;  %v1342_v56 = vrot.slane %v6315_v24, 1  ;;  %v1344_v63 = vrot.slane %v6317_v38, 1 }
 0x1bc   : > { %v1630_v2 = vsel %vm1598_vm12, %v6844_v30, 0.0  ;;  %v1633_v5 = vsel %vm1601_vm11, %v6848_v51, 0.0  ;;  %v6862_v12 = vsel %vm1289_vm0, %v1338_v42, %v1340_v53 }
 0x1bd   : > { %v5339_v14 = vpack.c.bf16 %v1630_v2, %v1630_v2  ;;  %v5342_v7 = vpack.c.bf16 %v1633_v5, %v1633_v5  ;;  %v6868_v2 = vsel %vm1289_vm0, %v1336_v25, %v1338_v42  ;;  %v6872_v38 = vsel %vm1289_vm0, %v1342_v56, %v1344_v63 }
 0x1be   : > { %v1557_v21 = vpop.permute.xlu0 %1556  ;;  %v1548_v22 = vpop.permute.xlu1 %1547 }
 0x1bf   : > { %vm1603_vm13 = vcmp.eq.s32.totalorder %v1557_v21, 1  ;;  %vm1600_vm14 = vcmp.eq.s32.totalorder %v1548_v22, 1  ;;  %1779 = vrot.lane.b32.xlu0 %v5340_v23, %s5774_s29  ;;  %1777 = vrot.lane.b32.xlu1 %v5339_v14, %s5774_s29  ;;  %v1346_v23 = vrot.slane %v6339_v1, 1  ;;  %v1348_v14 = vrot.slane %v6341_v29, 1 }
 0x1c0   : > { %v1632_v15 = vsel %vm1600_vm14, %v6856_v40, 0.0  ;;  %v1635_v24 = vsel %vm1603_vm13, %v6862_v12, 0.0  ;;  %v6880_v21 = vsel %vm1289_vm0, %v1340_v53, %v1342_v56 }
 0x1c1   : > { %v5341_v55 = vpack.c.bf16 %v1632_v15, %v1632_v15  ;;  %v5344_v42 = vpack.c.bf16 %v1635_v24, %v1635_v24  ;;  %v6891_v56 = vsel %vm1289_vm0, %v1344_v63, %v1346_v23 }
 0x1c2   : > { %v1563_v17 = vpop.permute.xlu0 %1562  ;;  %v1554_v3 = vpop.permute.xlu1 %1553 }
 0x1c3   : > { %vm1605_vm15 = vcmp.eq.s32.totalorder %v1563_v17, 1  ;;  %vm1602_vm2 = vcmp.eq.s32.totalorder %v1554_v3, 1  ;;  %1783 = vrot.lane.b32.xlu0 %v5342_v7, %s5774_s29  ;;  %1781 = vrot.lane.b32.xlu1 %v5341_v55, %s5774_s29  ;;  %v6884_v3 = vsel %vm1289_vm0, %v1346_v23, %v1348_v14  ;;  %v1350_v7 = vrot.slane %v6362_v35, 1 }
 0x1c4   : > { %v1634_v25 = vsel %vm1602_vm2, %v6868_v2, 0.0  ;;  %v1637_v22 = vsel %vm1605_vm15, %v6872_v38, 0.0 }
 0x1c5   : > { %v5343_v5 = vpack.c.bf16 %v1634_v25, %v1634_v25  ;;  %v5346_v55 = vpack.c.bf16 %v1637_v22, %v1637_v22  ;;  %v6903_v23 = vsel %vm1289_vm0, %v1348_v14, %v1350_v7 }
 0x1c6   : > { %v1569_v15 = vpop.permute.xlu0 %1568  ;;  %v1560_v17 = vpop.permute.xlu1 %1559 }
 0x1c7   : > { %vm1607_vm3 = vcmp.eq.s32.totalorder %v1569_v15, 1  ;;  %vm1604_vm4 = vcmp.eq.s32.totalorder %v1560_v17, 1  ;;  %1787 = vrot.lane.b32.xlu0 %v5344_v42, %s5774_s29  ;;  %1785 = vrot.lane.b32.xlu1 %v5343_v5, %s5774_s29  ;;  %v8500_v15 = vrot.slane %v6106_v9, 1 }
 0x1c8   : > { %v1636_v24 = vsel %vm1604_vm4, %v6880_v21, 0.0  ;;  %v1639_v25 = vsel %vm1607_vm3, %v6884_v3, 0.0 }
 0x1c9   : > { %v5345_v53 = vpack.c.bf16 %v1636_v24, %v1636_v24  ;;  %v6897_v17 = vsel %vm1289_vm0, %v1350_v7, %v8500_v15  ;;  %v5348_v5 = vpack.c.bf16 %v1639_v25, %v1639_v25  ;;  %vm1835_vm0 = vcmask 93248   ;;  %v8513_v25 = vld [vmem:[#allocation79_spill] sm:$0xff] }
 0x1ca   : > { %v1575_v29 = vpop.permute.xlu0 %1574  ;;  %v1566_v1 = vpop.permute.xlu1 %1565 }
 0x1cb   : > { %vm1609_vm5 = vcmp.eq.s32.totalorder %v1575_v29, 1  ;;  %vm1606_vm6 = vcmp.eq.s32.totalorder %v1566_v1, 1  ;;  %1791 = vrot.lane.b32.xlu0 %v5346_v55, %s5774_s29  ;;  %1789 = vrot.lane.b32.xlu1 %v5345_v53, %s5774_s29 }
 0x1cc   : > { %v1638_v42 = vsel %vm1606_vm6, %v6891_v56, 0.0  ;;  %v1641_v22 = vsel %vm1609_vm5, %v6897_v17, 0.0 }
 0x1cd   : > { %v5347_v63 = vpack.c.bf16 %v1638_v42, %v1638_v42  ;;  %v5350_v29 = vpack.c.bf16 %v1641_v22, %v1641_v22 }
 0x1ce   : > { %v1572_v24 = vpop.permute.xlu1 %1571 }
 0x1cf   : > { %vm1608_vm7 = vcmp.eq.s32.totalorder %v1572_v24, 1  ;;  %1795 = vrot.lane.b32.xlu0 %v5348_v5, %s5774_s29  ;;  %1793 = vrot.lane.b32.xlu1 %v5347_v63, %s5774_s29 }
 0x1d0   : > { %v1640_v1 = vsel %vm1608_vm7, %v6903_v23, 0.0 }
 0x1d1   : > { %v5349_v55 = vpack.c.bf16 %v1640_v1, %v1640_v1 }
 0x1d2   : > { %v1578_v53 = vpop.permute.xlu1 %1577 }
 0x1d3   : > { %vm1610_vm8 = vcmp.eq.s32.totalorder %v1578_v53, 1  ;;  %1799 = vrot.lane.b32.xlu0 %v5350_v29, %s5774_s29  ;;  %1797 = vrot.lane.b32.xlu1 %v5349_v55, %s5774_s29 }
 0x1d4   : > { %v1642_v14 = vsel %vm1610_vm8, %v6687_v57, 0.0 }
 0x1d5   : > { %v5351_v7 = vpack.c.bf16 %v1642_v14, %v1642_v14 }
 0x1d7   : > { %1965 = vperm.xlu0 %5640, %v6473_v59   ;;  %1801 = vrot.lane.b32.xlu1 %v5351_v7, %s5774_s29 }
 0x1db   : > { %1974 = vperm.xlu0 %5640, %v6501_v0   ;;  %1968 = vperm.xlu1 %5641, %v6470_v46   ;;  %v8510_v46 = vld [vmem:[#allocation75_spill] sm:$0xff] }
 0x1df   : > { %1980 = vperm.xlu0 %5640, %v6515_v31   ;;  %1971 = vperm.xlu1 %5641, %v6487_v11   ;;  %v8509_v31 = vld [vmem:[#allocation81_spill] sm:$0xff]  ;;  %v8511_v11 = vld [vmem:[#allocation82_spill] sm:$0xff] }
 0x1e3   : > { %1986 = vperm.xlu0 %5640, %v6529_v39   ;;  %1977 = vperm.xlu1 %5641, %v6484_v60   ;;  %v8503_v39 = vld [vmem:[#allocation76_spill] sm:$0xff] }
 0x1e7   : > { %1992 = vperm.xlu0 %5640, %v6543_v44   ;;  %1983 = vperm.xlu1 %5641, %v6498_v37   ;;  %v8501_v44 = vld [vmem:[#allocation74_spill] sm:$0xff]  ;;  %v8512_v37 = vld [vmem:[#allocation77_spill] sm:$0xff] }
 0x1eb   : > { %1998 = vperm.xlu0 %5640, %v6557_v32   ;;  %1989 = vperm.xlu1 %5641, %v6512_v50   ;;  %v8502_v32 = vld [vmem:[#allocation70_spill] sm:$0xff] }
 0x1ef   : > { %2004 = vperm.xlu0 %5640, %v6571_v54   ;;  %1995 = vperm.xlu1 %5641, %v6526_v49   ;;  %v8504_v54 = vld [vmem:[#allocation71_spill] sm:$0xff]  ;;  %v8505_v49 = vld [vmem:[#allocation78_spill] sm:$0xff] }
 0x1f3   : > { %2010 = vperm.xlu0 %5640, %v6585_v48   ;;  %2001 = vperm.xlu1 %5641, %v6540_v6   ;;  %v8506_v48 = vld [vmem:[#allocation72_spill] sm:$0xff] }
 0x1f7   : > { %2016 = vperm.xlu0 %5640, %v6599_v18   ;;  %2007 = vperm.xlu1 %5641, %v6554_v36  }
 0x1fb   : > { %2022 = vperm.xlu0 %5640, %v6613_v4   ;;  %2013 = vperm.xlu1 %5641, %v6568_v27   ;;  %v8507_v4 = vld [vmem:[#allocation80_spill] sm:$0xff]  ;;  %v8508_v27 = vld [vmem:[#allocation73_spill] sm:$0xff] }
 0x1ff   : > { %2028 = vperm.xlu0 %5640, %v8501_v44   ;;  %2019 = vperm.xlu1 %5641, %v8502_v32  }
 0x203   : > { %2034 = vperm.xlu0 %5640, %v8503_v39   ;;  %2025 = vperm.xlu1 %5641, %v8504_v54  }
 0x207   : > { %2040 = vperm.xlu0 %5640, %v8505_v49   ;;  %2031 = vperm.xlu1 %5641, %v8506_v48  }
 0x209   : > { %v1740_v18 = vpop.permute.xlu0 %1739  ;;  %v1742_v6 = vpop.permute.xlu1 %1741 }
 0x20a   : > { %1836 = vst.msk [vmem:[#allocation2] sm:$0xf] %vm1835_vm0, %v1740_v18  ;;  %1837 = vst.msk [vmem:[#allocation2 + $0x4] sm:$0xf] %vm1835_vm0, %v1742_v6 }
 0x20b   : > { %2046 = vperm.xlu0 %5640, %v8507_v4   ;;  %2037 = vperm.xlu1 %5641, %v8508_v27  }
 0x20d   : > { %v1744_v36 = vpop.permute.xlu0 %1743 }
 0x20e   : > { %1838 = vst.msk [vmem:[#allocation2 + $0x8] sm:$0xf] %vm1835_vm0, %v1744_v36 }
 0x20f   : > { %2052 = vperm.xlu0 %5640, %v8509_v31   ;;  %2043 = vperm.xlu1 %5641, %v8510_v46  }
 0x211   : > { %v1748_v59 = vpop.permute.xlu0 %1747  ;;  %v1746_v60 = vpop.permute.xlu1 %1745 }
 0x212   : > { %1840 = vst.msk [vmem:[#allocation2 + $0x10] sm:$0xf] %vm1835_vm0, %v1748_v59  ;;  %1839 = vst.msk [vmem:[#allocation2 + $0xc] sm:$0xf] %vm1835_vm0, %v1746_v60  ;;  %v8514_v60 = vld [vmem:[#allocation13_spill] sm:$0xff] }
 0x213   : > { %2058 = vperm.xlu0 %5640, %v8511_v11   ;;  %2049 = vperm.xlu1 %5641, %v8512_v37  }
 0x215   : > { %v1752_v0 = vpop.permute.xlu0 %1751  ;;  %v1750_v50 = vpop.permute.xlu1 %1749 }
 0x216   : > { %1842 = vst.msk [vmem:[#allocation2 + $0x18] sm:$0xf] %vm1835_vm0, %v1752_v0  ;;  %1841 = vst.msk [vmem:[#allocation2 + $0x14] sm:$0xf] %vm1835_vm0, %v1750_v50 }
 0x217   : > { %2055 = vperm.xlu1 %5641, %v8513_v25   ;;  %v8515_v25 = vld [vmem:[#allocation16_spill] sm:$0xff] }
 0x219   : > { %v1756_v15 = vpop.permute.xlu0 %1755  ;;  %v1754_v42 = vpop.permute.xlu1 %1753 }
 0x21a   : > { %1844 = vst.msk [vmem:[#allocation2 + $0x20] sm:$0xf] %vm1835_vm0, %v1756_v15  ;;  %1843 = vst.msk [vmem:[#allocation2 + $0x1c] sm:$0xf] %vm1835_vm0, %v1754_v42 }
 0x21d   : > { %v1760_v5 = vpop.permute.xlu0 %1759  ;;  %v1758_v63 = vpop.permute.xlu1 %1757 }
 0x21e   : > { %1846 = vst.msk [vmem:[#allocation2 + $0x28] sm:$0xf] %vm1835_vm0, %v1760_v5  ;;  %1845 = vst.msk [vmem:[#allocation2 + $0x24] sm:$0xf] %vm1835_vm0, %v1758_v63  ;;  %v8516_v5 = vld [vmem:[#allocation21_spill] sm:$0xff] }
 0x221   : > { %v1764_v22 = vpop.permute.xlu0 %1763  ;;  %v1762_v24 = vpop.permute.xlu1 %1761 }
 0x222   : > { %1848 = vst.msk [vmem:[#allocation2 + $0x30] sm:$0xf] %vm1835_vm0, %v1764_v22  ;;  %1847 = vst.msk [vmem:[#allocation2 + $0x2c] sm:$0xf] %vm1835_vm0, %v1762_v24 }
 0x225   : > { %v1768_v1 = vpop.permute.xlu0 %1767  ;;  %v1766_v29 = vpop.permute.xlu1 %1765 }
 0x226   : > { %1850 = vst.msk [vmem:[#allocation2 + $0x38] sm:$0xf] %vm1835_vm0, %v1768_v1  ;;  %1849 = vst.msk [vmem:[#allocation2 + $0x34] sm:$0xf] %vm1835_vm0, %v1766_v29  ;;  %v5776_v1 = vmov 5   ;;  %v8517_v29 = vld [vmem:[#allocation19_spill] sm:$0xff] }
 0x227   : > { %5643 = vset.pattern.permute.xlu0 %v5776_v1  ;;  %5642 = vset.pattern.permute.xlu1 %v5776_v1  ;;  %v8524_v1 = vld [vmem:[#allocation37_spill] sm:$0xff] }
 0x229   : > { %v1772_v55 = vpop.permute.xlu0 %1771  ;;  %v1770_v53 = vpop.permute.xlu1 %1769 }
 0x22a   : > { %1852 = vst.msk [vmem:[#allocation2 + $0x40] sm:$0xf] %vm1835_vm0, %v1772_v55  ;;  %1851 = vst.msk [vmem:[#allocation2 + $0x3c] sm:$0xf] %vm1835_vm0, %v1770_v53 }
 0x22d   : > { %v1776_v14 = vpop.permute.xlu0 %1775  ;;  %v1774_v7 = vpop.permute.xlu1 %1773 }
 0x22e   : > { %1854 = vst.msk [vmem:[#allocation2 + $0x48] sm:$0xf] %vm1835_vm0, %v1776_v14  ;;  %1853 = vst.msk [vmem:[#allocation2 + $0x44] sm:$0xf] %vm1835_vm0, %v1774_v7  ;;  %v8518_v7 = vld [vmem:[#allocation24_spill] sm:$0xff] }
 0x231   : > { %v1780_v44 = vpop.permute.xlu0 %1779  ;;  %v1778_v32 = vpop.permute.xlu1 %1777 }
 0x232   : > { %1856 = vst.msk [vmem:[#allocation2 + $0x50] sm:$0xf] %vm1835_vm0, %v1780_v44  ;;  %1855 = vst.msk [vmem:[#allocation2 + $0x4c] sm:$0xf] %vm1835_vm0, %v1778_v32 }
 0x235   : > { %v1784_v39 = vpop.permute.xlu0 %1783  ;;  %v1782_v54 = vpop.permute.xlu1 %1781 }
 0x236   : > { %1858 = vst.msk [vmem:[#allocation2 + $0x58] sm:$0xf] %vm1835_vm0, %v1784_v39  ;;  %1857 = vst.msk [vmem:[#allocation2 + $0x54] sm:$0xf] %vm1835_vm0, %v1782_v54  ;;  %v8519_v54 = vld [vmem:[#allocation26_spill] sm:$0xff] }
 0x239   : > { %v1788_v49 = vpop.permute.xlu0 %1787  ;;  %v1786_v48 = vpop.permute.xlu1 %1785 }
 0x23a   : > { %1860 = vst.msk [vmem:[#allocation2 + $0x60] sm:$0xf] %vm1835_vm0, %v1788_v49  ;;  %1859 = vst.msk [vmem:[#allocation2 + $0x5c] sm:$0xf] %vm1835_vm0, %v1786_v48 }
 0x23d   : > { %v1792_v18 = vpop.permute.xlu0 %1791  ;;  %v1790_v6 = vpop.permute.xlu1 %1789 }
 0x23e   : > { %1862 = vst.msk [vmem:[#allocation2 + $0x68] sm:$0xf] %vm1835_vm0, %v1792_v18  ;;  %1861 = vst.msk [vmem:[#allocation2 + $0x64] sm:$0xf] %vm1835_vm0, %v1790_v6  ;;  %v8520_v6 = vld [vmem:[#allocation30_spill] sm:$0xff] }
 0x241   : > { %v1796_v4 = vpop.permute.xlu0 %1795  ;;  %v1794_v27 = vpop.permute.xlu1 %1793 }
 0x242   : > { %1864 = vst.msk [vmem:[#allocation2 + $0x70] sm:$0xf] %vm1835_vm0, %v1796_v4  ;;  %1863 = vst.msk [vmem:[#allocation2 + $0x6c] sm:$0xf] %vm1835_vm0, %v1794_v27 }
 0x245   : > { %v1800_v36 = vpop.permute.xlu0 %1799  ;;  %v1798_v31 = vpop.permute.xlu1 %1797 }
 0x246   : > { %1866 = vst.msk [vmem:[#allocation2 + $0x78] sm:$0xf] %vm1835_vm0, %v1800_v36  ;;  %1865 = vst.msk [vmem:[#allocation2 + $0x74] sm:$0xf] %vm1835_vm0, %v1798_v31  ;;  %v8521_v31 = vld [vmem:[#allocation29_spill] sm:$0xff] }
 0x249   : > { %v1802_v46 = vpop.permute.xlu1 %1801 }
 0x24a   : > { %1867 = vst.msk [vmem:[#allocation2 + $0x7c] sm:$0xf] %vm1835_vm0, %v1802_v46 }
 0x252   : > { %v1966_v59 = vpop.permute.xlu0 %1965 }
 0x253   : > { %vm2060_vm1 = vcmp.eq.s32.totalorder %v1966_v59, 1 }
 0x254   : > { %v2092_v11 = vsel %vm2060_vm1, %v8514_v60, 0.0 }
 0x255   : > { %v5352_v37 = vpack.c.bf16 %v2092_v11, %v2092_v11 }
 0x256   : > { %v1975_v0 = vpop.permute.xlu0 %1974  ;;  %v1969_v50 = vpop.permute.xlu1 %1968 }
 0x257   : > { %vm2063_vm9 = vcmp.eq.s32.totalorder %v1975_v0, 1  ;;  %vm2061_vm10 = vcmp.eq.s32.totalorder %v1969_v50, 1  ;;  %2220 = vrot.lane.b32.xlu1 %v5352_v37, %s5775_s30  ;;  %v8522_v37 = vld [vmem:[#allocation33_spill] sm:$0xff] }
 0x258   : > { %v2093_v15 = vsel %vm2061_vm10, %v8515_v25, 0.0  ;;  %v2095_v63 = vsel %vm2063_vm9, %v8516_v5, 0.0  ;;  %v2540_v5 = vld [vmem:[%s8281_s3 + $0xf0] sm:$0xff] }
 0x259   : > { %v5353_v42 = vpack.c.bf16 %v2093_v15, %v2093_v15  ;;  %v5355_v53 = vpack.c.bf16 %v2095_v63, %v2095_v63 }
 0x25a   : > { %v1981_v22 = vpop.permute.xlu0 %1980  ;;  %v1972_v24 = vpop.permute.xlu1 %1971 }
 0x25b   : > { %vm2065_vm11 = vcmp.eq.s32.totalorder %v1981_v22, 1  ;;  %vm2062_vm12 = vcmp.eq.s32.totalorder %v1972_v24, 1  ;;  %2222 = vrot.lane.b32.xlu0 %v5353_v42, %s5775_s30  ;;  %v8523_v42 = vld [vmem:[#allocation34_spill] sm:$0xff] }
 0x25c   : > { %v2094_v55 = vsel %vm2062_vm12, %v8517_v29, 0.0  ;;  %v2097_v44 = vsel %vm2065_vm11, %v8518_v7, 0.0  ;;  %v2539_v29 = vld [vmem:[%s8281_s3 + $0xe8] sm:$0xff] }
 0x25d   : > { %v5354_v14 = vpack.c.bf16 %v2094_v55, %v2094_v55  ;;  %v5357_v48 = vpack.c.bf16 %v2097_v44, %v2097_v44  ;;  %v8525_v44 = vld [vmem:[#allocation35_spill] sm:$0xff] }
 0x25e   : > { %v1987_v32 = vpop.permute.xlu0 %1986  ;;  %v1978_v39 = vpop.permute.xlu1 %1977 }
 0x25f   : > { %vm2067_vm13 = vcmp.eq.s32.totalorder %v1987_v32, 1  ;;  %vm2064_vm14 = vcmp.eq.s32.totalorder %v1978_v39, 1  ;;  %2224 = vrot.lane.b32.xlu1 %v5354_v14, %s5775_s30  ;;  %2226 = vrot.lane.b32.xlu0 %v5355_v53, %s5775_s30 }
 0x260   : > { %v2096_v49 = vsel %vm2064_vm14, %v8519_v54, 0.0  ;;  %v2099_v4 = vsel %vm2067_vm13, %v8520_v6, 0.0  ;;  %v2538_v54 = vld [vmem:[%s8281_s3 + $0xe0] sm:$0xff] }
 0x261   : > { %v5356_v18 = vpack.c.bf16 %v2096_v49, %v2096_v49  ;;  %v5359_v59 = vpack.c.bf16 %v2099_v4, %v2099_v4 }
 0x262   : > { %v1993_v27 = vpop.permute.xlu0 %1992  ;;  %v1984_v36 = vpop.permute.xlu1 %1983 }
 0x263   : > { %vm2069_vm15 = vcmp.eq.s32.totalorder %v1993_v27, 1  ;;  %vm2066_vm2 = vcmp.eq.s32.totalorder %v1984_v36, 1  ;;  %2228 = vrot.lane.b32.xlu1 %v5356_v18, %s5775_s30  ;;  %2230 = vrot.lane.b32.xlu0 %v5357_v48, %s5775_s30  ;;  %v8526_v48 = vld [vmem:[#allocation40_spill] sm:$0xff]  ;;  %v8527_v36 = vld [vmem:[#allocation42_spill] sm:$0xff] }
 0x264   : > { %v2098_v46 = vsel %vm2066_vm2, %v8521_v31, 0.0  ;;  %v2101_v0 = vsel %vm2069_vm15, %v8522_v37, 0.0  ;;  %v2536_v31 = vld [vmem:[%s8281_s3 + $0xd0] sm:$0xff] }
 0x265   : > { %v5358_v11 = vpack.c.bf16 %v2098_v46, %v2098_v46  ;;  %v5361_v22 = vpack.c.bf16 %v2101_v0, %v2101_v0  ;;  %v8528_v0 = vld [vmem:[#allocation46_spill] sm:$0xff] }
 0x266   : > { %v1999_v50 = vpop.permute.xlu0 %1998  ;;  %v1990_v15 = vpop.permute.xlu1 %1989 }
 0x267   : > { %vm2071_vm3 = vcmp.eq.s32.totalorder %v1999_v50, 1  ;;  %vm2068_vm4 = vcmp.eq.s32.totalorder %v1990_v15, 1  ;;  %2232 = vrot.lane.b32.xlu1 %v5358_v11, %s5775_s30  ;;  %2234 = vrot.lane.b32.xlu0 %v5359_v59, %s5775_s30 }
 0x268   : > { %v2100_v63 = vsel %vm2068_vm4, %v8523_v42, 0.0  ;;  %v2103_v55 = vsel %vm2071_vm3, %v8524_v1, 0.0  ;;  %v2534_v42 = vld [vmem:[%s8281_s3 + $0xc0] sm:$0xff] }
 0x269   : > { %v5360_v24 = vpack.c.bf16 %v2100_v63, %v2100_v63  ;;  %v5363_v39 = vpack.c.bf16 %v2103_v55, %v2103_v55 }
 0x26a   : > { %v2005_v53 = vpop.permute.xlu0 %2004  ;;  %v1996_v14 = vpop.permute.xlu1 %1995 }
 0x26b   : > { %vm2073_vm5 = vcmp.eq.s32.totalorder %v2005_v53, 1  ;;  %vm2070_vm6 = vcmp.eq.s32.totalorder %v1996_v14, 1  ;;  %2236 = vrot.lane.b32.xlu1 %v5360_v24, %s5775_s30  ;;  %2238 = vrot.lane.b32.xlu0 %v5361_v22, %s5775_s30  ;;  %v8529_v22 = vld [vmem:[#allocation43_spill] sm:$0xff]  ;;  %v8530_v14 = vld [vmem:[#allocation49_spill] sm:$0xff] }
 0x26c   : > { %v2102_v32 = vsel %vm2070_vm6, %v8525_v44, 0.0  ;;  %v2105_v18 = vsel %vm2073_vm5, %v8526_v48, 0.0  ;;  %v2532_v44 = vld [vmem:[%s8281_s3 + $0xb0] sm:$0xff] }
 0x26d   : > { %v5362_v49 = vpack.c.bf16 %v2102_v32, %v2102_v32  ;;  %v5365_v59 = vpack.c.bf16 %v2105_v18, %v2105_v18  ;;  %v8531_v18 = vld [vmem:[#allocation50_spill] sm:$0xff] }
 0x26e   : > { %v2011_v4 = vpop.permute.xlu0 %2010  ;;  %v2002_v27 = vpop.permute.xlu1 %2001 }
 0x26f   : > { %vm2075_vm7 = vcmp.eq.s32.totalorder %v2011_v4, 1  ;;  %vm2072_vm8 = vcmp.eq.s32.totalorder %v2002_v27, 1  ;;  %2240 = vrot.lane.b32.xlu1 %v5362_v49, %s5775_s30  ;;  %2242 = vrot.lane.b32.xlu0 %v5363_v39, %s5775_s30 }
 0x270   : > { %v2104_v46 = vsel %vm2072_vm8, %v8527_v36, 0.0  ;;  %v2107_v50 = vsel %vm2075_vm7, %v8528_v0, 0.0  ;;  %v2530_v36 = vld [vmem:[%s8281_s3 + $0xa0] sm:$0xff] }
 0x271   : > { %v5364_v11 = vpack.c.bf16 %v2104_v46, %v2104_v46  ;;  %v5367_v55 = vpack.c.bf16 %v2107_v50, %v2107_v50  ;;  %v8533_v50 = vld [vmem:[#allocation52_spill] sm:$0xff] }
 0x272   : > { %v2017_v15 = vpop.permute.xlu0 %2016  ;;  %v2008_v63 = vpop.permute.xlu1 %2007 }
 0x273   : > { %vm2077_vm0 = vcmp.eq.s32.totalorder %v2017_v15, 1  ;;  %vm2074_vm1 = vcmp.eq.s32.totalorder %v2008_v63, 1  ;;  %2244 = vrot.lane.b32.xlu1 %v5364_v11, %s5775_s30  ;;  %2246 = vrot.lane.b32.xlu0 %v5365_v59, %s5775_s30  ;;  %v8532_v11 = vld [vmem:[#allocation51_spill] sm:$0xff] }
 0x274   : > { %v2106_v24 = vsel %vm2074_vm1, %v8529_v22, 0.0  ;;  %v2109_v32 = vsel %vm2077_vm0, %v8530_v14, 0.0  ;;  %vm2316_vm1 = vcmask 126048   ;;  %v2528_v22 = vld [vmem:[%s8281_s3 + $0x90] sm:$0xff] }
 0x275   : > { %v5366_v53 = vpack.c.bf16 %v2106_v24, %v2106_v24  ;;  %v5369_v27 = vpack.c.bf16 %v2109_v32, %v2109_v32  ;;  %v8535_v32 = vld [vmem:[#allocation58_spill] sm:$0xff] }
 0x276   : > { %v2023_v39 = vpop.permute.xlu0 %2022  ;;  %v2014_v49 = vpop.permute.xlu1 %2013 }
 0x277   : > { %vm2079_vm9 = vcmp.eq.s32.totalorder %v2023_v39, 1  ;;  %vm2076_vm10 = vcmp.eq.s32.totalorder %v2014_v49, 1  ;;  %2248 = vrot.lane.b32.xlu1 %v5366_v53, %s5775_s30  ;;  %2250 = vrot.lane.b32.xlu0 %v5367_v55, %s5775_s30  ;;  %v8534_v49 = vld [vmem:[#allocation57_spill] sm:$0xff] }
 0x278   : > { %v2108_v4 = vsel %vm2076_vm10, %v8531_v18, 0.0  ;;  %v2111_v59 = vsel %vm2079_vm9, %v8532_v11, 0.0  ;;  %v2526_v18 = vld [vmem:[%s8281_s3 + $0x80] sm:$0xff] }
 0x279   : > { %v5368_v46 = vpack.c.bf16 %v2108_v4, %v2108_v4  ;;  %v5371_v39 = vpack.c.bf16 %v2111_v59, %v2111_v59 }
 0x27a   : > { %v2029_v15 = vpop.permute.xlu0 %2028  ;;  %v2020_v63 = vpop.permute.xlu1 %2019 }
 0x27b   : > { %vm2081_vm11 = vcmp.eq.s32.totalorder %v2029_v15, 1  ;;  %vm2078_vm12 = vcmp.eq.s32.totalorder %v2020_v63, 1  ;;  %2252 = vrot.lane.b32.xlu1 %v5368_v46, %s5775_s30  ;;  %2254 = vrot.lane.b32.xlu0 %v5369_v27, %s5775_s30  ;;  %v8536_v63 = vld [vmem:[#allocation61_spill] sm:$0xff] }
 0x27c   : > { %v2110_v24 = vsel %vm2078_vm12, %v8533_v50, 0.0  ;;  %v2113_v55 = vsel %vm2081_vm11, %v8534_v49, 0.0  ;;  %v2524_v50 = vld [vmem:[%s8281_s3 + $0x70] sm:$0xff] }
 0x27d   : > { %v5370_v53 = vpack.c.bf16 %v2110_v24, %v2110_v24  ;;  %v5373_v15 = vpack.c.bf16 %v2113_v55, %v2113_v55 }
 0x27e   : > { %v2035_v9 = vpop.permute.xlu0 %2034  ;;  %v2026_v35 = vpop.permute.xlu1 %2025 }
 0x27f   : > { %vm2083_vm13 = vcmp.eq.s32.totalorder %v2035_v9, 1  ;;  %vm2080_vm14 = vcmp.eq.s32.totalorder %v2026_v35, 1  ;;  %2256 = vrot.lane.b32.xlu1 %v5370_v53, %s5775_s30  ;;  %2258 = vrot.lane.b32.xlu0 %v5371_v39, %s5775_s30  ;;  %v8537_v9 = vld [vmem:[#allocation62_spill] sm:$0xff]  ;;  %v8538_v53 = vld [vmem:[#allocation63_spill] sm:$0xff] }
 0x280   : > { %v2112_v4 = vsel %vm2080_vm14, %v8535_v32, 0.0  ;;  %v2115_v27 = vsel %vm2083_vm13, %v8536_v63, 0.0 }
 0x281   : > { %v5372_v46 = vpack.c.bf16 %v2112_v4, %v2112_v4  ;;  %v5375_v59 = vpack.c.bf16 %v2115_v27, %v2115_v27 }
 0x282   : > { %v2041_v60 = vpop.permute.xlu0 %2040  ;;  %v2032_v25 = vpop.permute.xlu1 %2031 }
 0x283   : > { %vm2085_vm15 = vcmp.eq.s32.totalorder %v2041_v60, 1  ;;  %vm2082_vm2 = vcmp.eq.s32.totalorder %v2032_v25, 1  ;;  %2260 = vrot.lane.b32.xlu1 %v5372_v46, %s5775_s30  ;;  %2262 = vrot.lane.b32.xlu0 %v5373_v15, %s5775_s30  ;;  %v8539_v60 = vld [vmem:[#allocation64_spill] sm:$0xff]  ;;  %v8540_v46 = vld [vmem:[#allocation66_spill] sm:$0xff] }
 0x284   : > { %v2114_v35 = vsel %vm2082_vm2, %v8537_v9, 0.0  ;;  %v2117_v39 = vsel %vm2085_vm15, %v8538_v53, 0.0 }
 0x285   : > { %v5374_v24 = vpack.c.bf16 %v2114_v35, %v2114_v35  ;;  %v5377_v55 = vpack.c.bf16 %v2117_v39, %v2117_v39 }
 0x286   : > { %v2047_v49 = vpop.permute.xlu0 %2046  ;;  %v2038_v32 = vpop.permute.xlu1 %2037 }
 0x287   : > { %vm2087_vm3 = vcmp.eq.s32.totalorder %v2047_v49, 1  ;;  %vm2084_vm4 = vcmp.eq.s32.totalorder %v2038_v32, 1  ;;  %2264 = vrot.lane.b32.xlu1 %v5374_v24, %s5775_s30  ;;  %2266 = vrot.lane.b32.xlu0 %v5375_v59, %s5775_s30  ;;  %v8541_v49 = vld [vmem:[#allocation67_spill] sm:$0xff]  ;;  %v8542_v24 = vld [vmem:[#allocation68_spill] sm:$0xff] }
 0x288   : > { %v2116_v25 = vsel %vm2084_vm4, %v8539_v60, 0.0  ;;  %v2119_v15 = vsel %vm2087_vm3, %v8540_v46, 0.0 }
 0x289   : > { %v5376_v4 = vpack.c.bf16 %v2116_v25, %v2116_v25  ;;  %v5379_v27 = vpack.c.bf16 %v2119_v15, %v2119_v15 }
 0x28a   : > { %v2053_v63 = vpop.permute.xlu0 %2052  ;;  %v2044_v9 = vpop.permute.xlu1 %2043 }
 0x28b   : > { %vm2089_vm5 = vcmp.eq.s32.totalorder %v2053_v63, 1  ;;  %vm2086_vm6 = vcmp.eq.s32.totalorder %v2044_v9, 1  ;;  %2268 = vrot.lane.b32.xlu1 %v5376_v4, %s5775_s30  ;;  %2270 = vrot.lane.b32.xlu0 %v5377_v55, %s5775_s30  ;;  %v8543_v63 = vld [vmem:[#allocation69_spill] sm:$0xff]  ;;  %v8544_v55 = vld [vmem:[#allocation18_spill] sm:$0xff] }
 0x28c   : > { %v2118_v32 = vsel %vm2086_vm6, %v8541_v49, 0.0  ;;  %v2121_v59 = vsel %vm2089_vm5, %v8542_v24, 0.0  ;;  %v2522_v49 = vld [vmem:[%s8281_s3 + $0x60] sm:$0xff] }
 0x28d   : > { %v5378_v35 = vpack.c.bf16 %v2118_v32, %v2118_v32  ;;  %v5381_v39 = vpack.c.bf16 %v2121_v59, %v2121_v59  ;;  %v5676_v59 = vld [vmem:[%s6095_s27 + $0x4] sm:$0xf]  ;;  %vm2554_vm6 = vcmp.gt.f32.partialorder %v2522_v49, 0.5 }
 0x28e   : > { %v2059_v53 = vpop.permute.xlu0 %2058  ;;  %v2050_v60 = vpop.permute.xlu1 %2049 }
 0x28f   : > { %vm2091_vm7 = vcmp.eq.s32.totalorder %v2059_v53, 1  ;;  %vm2088_vm8 = vcmp.eq.s32.totalorder %v2050_v60, 1  ;;  %2272 = vrot.lane.b32.xlu1 %v5378_v35, %s5775_s30  ;;  %2274 = vrot.lane.b32.xlu0 %v5379_v27, %s5775_s30  ;;  %v8545_v53 = vld [vmem:[#allocation14_spill] sm:$0xff] }
 0x290   : > { %v2120_v9 = vsel %vm2088_vm8, %v8543_v63, 0.0  ;;  %v2123_v4 = vsel %vm2091_vm7, %v8544_v55, 0.0  ;;  %v5675_v35 = vld [vmem:[%s6095_s27] sm:$0xf]  ;;  %v2520_v63 = vld [vmem:[%s8281_s3 + $0x50] sm:$0xff]  ;;  %vm2556_vm8 = vcmp.gt.f32.partialorder %v2524_v50, 0.5 }
 0x291   : > { %v5380_v25 = vpack.c.bf16 %v2120_v9, %v2120_v9  ;;  %v5383_v32 = vpack.c.bf16 %v2123_v4, %v2123_v4  ;;  %v5677_v9 = vld [vmem:[%s6095_s27 + $0x8] sm:$0xf]  ;;  %v5680_v4 = vld [vmem:[%s6095_s27 + $0x14] sm:$0xf]  ;;  %vm2552_vm4 = vcmp.gt.f32.partialorder %v2520_v63, 0.5 }
 0x292   : > { %v2056_v15 = vpop.permute.xlu1 %2055 }
 0x293   : > { %vm2090_vm0 = vcmp.eq.s32.totalorder %v2056_v15, 1  ;;  %2276 = vrot.lane.b32.xlu1 %v5380_v25, %s5775_s30  ;;  %2278 = vrot.lane.b32.xlu0 %v5381_v39, %s5775_s30  ;;  %v5678_v39 = vld [vmem:[%s6095_s27 + $0xc] sm:$0xf]  ;;  %v5679_v25 = vld [vmem:[%s6095_s27 + $0x10] sm:$0xf] }
 0x294   : > { %v2122_v60 = vsel %vm2090_vm0, %v8545_v53, 0.0  ;;  %v5681_v15 = vld [vmem:[%s6095_s27 + $0x18] sm:$0xf]  ;;  %v2518_v53 = vld [vmem:[%s8281_s3 + $0x40] sm:$0xff] }
 0x295   : > { %v5382_v27 = vpack.c.bf16 %v2122_v60, %v2122_v60  ;;  %v5682_v60 = vld [vmem:[%s6095_s27 + $0x1c] sm:$0xf]  ;;  %vm2550_vm2 = vcmp.gt.f32.partialorder %v2518_v53, 0.5 }
 0x297   : > { %2280 = vrot.lane.b32.xlu1 %v5382_v27, %s5775_s30  ;;  %2282 = vrot.lane.b32.xlu0 %v5383_v32, %s5775_s30  ;;  %v5683_v32 = vld [vmem:[%s6095_s27 + $0x20] sm:$0xf]  ;;  %v5684_v27 = vld [vmem:[%s6095_s27 + $0x24] sm:$0xf] }
 0x29b   : > { %2381 = vrot.lane.b32.xlu1 %v5675_v35, %s5777_s5  ;;  %2383 = vrot.lane.b32.xlu0 %v5676_v59, %s5777_s5  ;;  %v5685_v35 = vld [vmem:[%s6095_s27 + $0x28] sm:$0xf]  ;;  %v5686_v59 = vld [vmem:[%s6095_s27 + $0x2c] sm:$0xf] }
 0x29f   : > { %2385 = vrot.lane.b32.xlu1 %v5677_v9, %s5777_s5  ;;  %2387 = vrot.lane.b32.xlu0 %v5678_v39, %s5777_s5  ;;  %v5687_v9 = vld [vmem:[%s6095_s27 + $0x30] sm:$0xf]  ;;  %v5688_v39 = vld [vmem:[%s6095_s27 + $0x34] sm:$0xf] }
 0x2a3   : > { %2389 = vrot.lane.b32.xlu1 %v5679_v25, %s5777_s5  ;;  %2391 = vrot.lane.b32.xlu0 %v5680_v4, %s5777_s5  ;;  %v5689_v25 = vld [vmem:[%s6095_s27 + $0x38] sm:$0xf]  ;;  %v5690_v4 = vld [vmem:[%s6095_s27 + $0x3c] sm:$0xf] }
 0x2a7   : > { %2393 = vrot.lane.b32.xlu1 %v5681_v15, %s5777_s5  ;;  %2395 = vrot.lane.b32.xlu0 %v5682_v60, %s5777_s5  ;;  %v5691_v15 = vld [vmem:[%s6095_s27 + $0x40] sm:$0xf]  ;;  %v5692_v60 = vld [vmem:[%s6095_s27 + $0x44] sm:$0xf] }
 0x2ab   : > { %2397 = vrot.lane.b32.xlu1 %v5683_v32, %s5777_s5  ;;  %2399 = vrot.lane.b32.xlu0 %v5684_v27, %s5777_s5  ;;  %v5693_v32 = vld [vmem:[%s6095_s27 + $0x48] sm:$0xf]  ;;  %v5694_v27 = vld [vmem:[%s6095_s27 + $0x4c] sm:$0xf] }
 0x2af   : > { %2401 = vrot.lane.b32.xlu1 %v5685_v35, %s5777_s5  ;;  %2403 = vrot.lane.b32.xlu0 %v5686_v59, %s5777_s5  ;;  %v5695_v35 = vld [vmem:[%s6095_s27 + $0x50] sm:$0xf]  ;;  %v5696_v59 = vld [vmem:[%s6095_s27 + $0x54] sm:$0xf] }
 0x2b3   : > { %2405 = vrot.lane.b32.xlu1 %v5687_v9, %s5777_s5  ;;  %2407 = vrot.lane.b32.xlu0 %v5688_v39, %s5777_s5  ;;  %v5697_v9 = vld [vmem:[%s6095_s27 + $0x58] sm:$0xf]  ;;  %v5698_v39 = vld [vmem:[%s6095_s27 + $0x5c] sm:$0xf] }
 0x2b7   : > { %2409 = vrot.lane.b32.xlu1 %v5689_v25, %s5777_s5  ;;  %2411 = vrot.lane.b32.xlu0 %v5690_v4, %s5777_s5  ;;  %v5699_v4 = vld [vmem:[%s6095_s27 + $0x60] sm:$0xf] }
 0x2bb   : > { %2413 = vrot.lane.b32.xlu1 %v5691_v15, %s5777_s5  ;;  %2415 = vrot.lane.b32.xlu0 %v5692_v60, %s5777_s5  ;;  %v5700_v15 = vld [vmem:[%s6095_s27 + $0x64] sm:$0xf] }
 0x2bf   : > { %2417 = vrot.lane.b32.xlu1 %v5693_v32, %s5777_s5  ;;  %2419 = vrot.lane.b32.xlu0 %v5694_v27, %s5777_s5  ;;  %v5701_v32 = vld [vmem:[%s6095_s27 + $0x68] sm:$0xf]  ;;  %v5702_v27 = vld [vmem:[%s6095_s27 + $0x6c] sm:$0xf] }
 0x2c3   : > { %2421 = vrot.lane.b32.xlu1 %v5695_v35, %s5777_s5  ;;  %2423 = vrot.lane.b32.xlu0 %v5696_v59, %s5777_s5 }
 0x2c7   : > { %2425 = vrot.lane.b32.xlu1 %v5697_v9, %s5777_s5  ;;  %2427 = vrot.lane.b32.xlu0 %v5698_v39, %s5777_s5  ;;  %v2510_v9 = vld [vmem:[%s8281_s3] sm:$0xff]  ;;  %v2511_v39 = vld [vmem:[%s8281_s3 + $0x8] sm:$0xff] }
 0x2c8   : > { %vm2542_vm9 = vcmp.gt.f32.partialorder %v2510_v9, 0.5  ;;  %vm2543_vm10 = vcmp.gt.f32.partialorder %v2511_v39, 0.5  ;;  %v8546_v9 = vmov 0  }
 0x2c9   : > { %v2221_v25 = vpop.permute.xlu1 %2220  ;;  %v7124_v39 = vsel %vm2542_vm9, 1, %v8546_v9  ;;  %v7175_v53 = vsel %vm2550_vm2, 1, %v8546_v9  ;;  %v7191_v63 = vsel %vm2552_vm4, 1, %v8546_v9  ;;  %v7207_v49 = vsel %vm2554_vm6, 1, %v8546_v9 }
 0x2ca   : > { %2317 = vst.msk [vmem:[#allocation2] sm:$0xf] %vm2316_vm1, %v2221_v25  ;;  %v5703_v25 = vld [vmem:[%s6095_s27 + $0x70] sm:$0xf]  ;;  %v7223_v50 = vsel %vm2556_vm8, 1, %v8546_v9  ;;  %vm2558_vm9 = vcmp.gt.f32.partialorder %v2526_v18, 0.5 }
 0x2cb   : > { %2429 = vrot.lane.b32.xlu1 %v5699_v4, %s5777_s5  ;;  %2431 = vrot.lane.b32.xlu0 %v5700_v15, %s5777_s5  ;;  %v5704_v4 = vld [vmem:[%s6095_s27 + $0x74] sm:$0xf]  ;;  %v7239_v18 = vsel %vm2558_vm9, 1, %v8546_v9  ;;  %vm2477_vm8 = vcmask 158848   ;;  %vm2571_vm9 = vcmp.gt.f32.partialorder %v2539_v29, 0.5 }
 0x2cd   : > { %v2223_v60 = vpop.permute.xlu0 %2222 }
 0x2ce   : > { %2318 = vst.msk [vmem:[#allocation2 + $0x4] sm:$0xf] %vm2316_vm1, %v2223_v60 }
 0x2cf   : > { %2433 = vrot.lane.b32.xlu1 %v5701_v32, %s5777_s5  ;;  %2435 = vrot.lane.b32.xlu0 %v5702_v27, %s5777_s5  ;;  %v2512_v32 = vld [vmem:[%s8281_s3 + $0x10] sm:$0xff]  ;;  %v2514_v27 = vld [vmem:[%s8281_s3 + $0x20] sm:$0xff] }
 0x2d0   : > { %vm2544_vm11 = vcmp.gt.f32.partialorder %v2512_v32, 0.5  ;;  %vm2546_vm12 = vcmp.gt.f32.partialorder %v2514_v27, 0.5 }
 0x2d1   : > { %v2225_v35 = vpop.permute.xlu1 %2224  ;;  %v2227_v59 = vpop.permute.xlu0 %2226  ;;  %v7143_v32 = vsel %vm2546_vm12, 1, %v8546_v9 }
 0x2d2   : > { %2319 = vst.msk [vmem:[#allocation2 + $0x8] sm:$0xf] %vm2316_vm1, %v2225_v35  ;;  %2320 = vst.msk [vmem:[#allocation2 + $0xc] sm:$0xf] %vm2316_vm1, %v2227_v59  ;;  %v5705_v35 = vld [vmem:[%s6095_s27 + $0x78] sm:$0xf] }
 0x2d3   : > { %2437 = vrot.lane.b32.xlu1 %v5703_v25, %s5777_s5  ;;  %2439 = vrot.lane.b32.xlu0 %v5704_v4, %s5777_s5  ;;  %v5706_v59 = vld [vmem:[%s6095_s27 + $0x7c] sm:$0xf]  ;;  %v7127_v25 = vsel %vm2543_vm10, 1, %v8546_v9  ;;  %s188_s27 = sand.u32 1, %s5759_s16  }
 0x2d4   : > { %s4956_s28 = sshll.u32 %s188_s27, 8  ;;  %s8237_s19 = scalar_lea.sflag [#allocation4], %s188_s27 }
 0x2d5   : > { %v2229_v15 = vpop.permute.xlu1 %2228  ;;  %v2231_v60 = vpop.permute.xlu0 %2230  ;;  %s8114_s14 = scalar_lea.vmem [#allocation3], %s4956_s28  ;;  %s5711_s28 = sshll.u32 %s5785_s23, 4  ;;  %s5712_s28 = int_to_ptr.vmem [resolvable:$false] %s5711_s28 }
 0x2d6   : > { %2321 = vst.msk [vmem:[#allocation2 + $0x10] sm:$0xf] %vm2316_vm1, %v2229_v15  ;;  %2322 = vst.msk [vmem:[#allocation2 + $0x14] sm:$0xf] %vm2316_vm1, %v2231_v60  ;;  %v2513_v60 = vld [vmem:[%s8281_s3 + $0x18] sm:$0xff]  ;;  %s4890_s11 = sshll.u32 %s8114_s14, 4  ;;  %s8232_s11 = int_to_ptr.vmem [resolvable:$true] %s4890_s11 }
 0x2d7   : > { %2441 = vrot.lane.b32.xlu1 %v5705_v35, %s5777_s5  ;;  %2443 = vrot.lane.b32.xlu0 %v5706_v59, %s5777_s5  ;;  %v2516_v35 = vld [vmem:[%s8281_s3 + $0x30] sm:$0xff]  ;;  %v7140_v59 = vsel %vm2544_vm11, 1, %v8546_v9  ;;  %vm2545_vm13 = vcmp.gt.f32.partialorder %v2513_v60, 0.5  ;;  %vm2560_vm11 = vcmp.gt.f32.partialorder %v2528_v22, 0.5  ;;  %s5707_s22 = scalar_lea.vmem %s8232_s11, 4096  ;;  %s5713_s30 = scalar_lea.vmem %s5712_s28, 8192 }
 0x2d8   : > { %vm2548_vm14 = vcmp.gt.f32.partialorder %v2516_v35, 0.5  ;;  %v7156_v55 = vsel %vm2545_vm13, 1, %v8546_v9  ;;  %v7255_v22 = vsel %vm2560_vm11, 1, %v8546_v9  ;;  %vm2562_vm13 = vcmp.gt.f32.partialorder %v2530_v36, 0.5  ;;  %p5708_p11 = scmp.ne.s32.totalorder %s8232_s11, %s5707_s22  ;;  %p5714_p0 = scmp.lt.s32.totalorder %s8232_s11, %s5712_s28 }
 0x2d9   : > { %v2233_v4 = vpop.permute.xlu1 %2232  ;;  %v2235_v15 = vpop.permute.xlu0 %2234  ;;  %v7159_v60 = vsel %vm2548_vm14, 1, %v8546_v9  ;;  %v7271_v36 = vsel %vm2562_vm13, 1, %v8546_v9  ;;  %p5715_p1 = scmp.lt.s32.totalorder %s5713_s30, %s5707_s22 }
 0x2da   : > { %2323 = vst.msk [vmem:[#allocation2 + $0x18] sm:$0xf] %vm2316_vm1, %v2233_v4  ;;  %2324 = vst.msk [vmem:[#allocation2 + $0x1c] sm:$0xf] %vm2316_vm1, %v2235_v15  ;;  %v2515_v15 = vld [vmem:[%s8281_s3 + $0x28] sm:$0xff]  ;;  %p5709_p12 = pnand %p5708_p11, %p5850_p5 }
 0x2db   : > { %2607 = vperm.xlu1 %5642, %v7124_v39   ;;  %2610 = vperm.xlu0 %5643, %v7127_v25   ;;  %vm2547_vm15 = vcmp.gt.f32.partialorder %v2515_v15, 0.5  ;;  %p5716_p2 = por %p5715_p1, %p5714_p0 }
 0x2dc   : > { %v7172_v24 = vsel %vm2547_vm15, 1, %v8546_v9  ;;  %vm2564_vm15 = vcmp.gt.f32.partialorder %v2532_v44, 0.5  ;;  %p5710_p13 = pneg %p5709_p12 }
 0x2dd   : > { %v2237_v27 = vpop.permute.xlu1 %2236  ;;  %v2239_v4 = vpop.permute.xlu0 %2238  ;;  %v7287_v44 = vsel %vm2564_vm15, 1, %v8546_v9 }
 0x2de   : > { %2325 = vst.msk [vmem:[#allocation2 + $0x20] sm:$0xf] %vm2316_vm1, %v2237_v27  ;;  %2326 = vst.msk [vmem:[#allocation2 + $0x24] sm:$0xf] %vm2316_vm1, %v2239_v4  ;;  %v2517_v4 = vld [vmem:[%s8281_s3 + $0x38] sm:$0xff]  ;;  %p5717_p3 = pnand %p5716_p2, %p5710_p13 }
 0x2df   : > { %2613 = vperm.xlu1 %5642, %v7140_v59   ;;  %2619 = vperm.xlu0 %5643, %v7143_v32   ;;  %vm2549_vm3 = vcmp.gt.f32.partialorder %v2517_v4, 0.5  ;;  %8547 = vst [vmem:[#allocation74_spill] sm:$0xff] %v7287_v44 }
 0x2e0   : > { %v7188_v46 = vsel %vm2549_vm3, 1, %v8546_v9  ;;  %vm2566_vm3 = vcmp.gt.f32.partialorder %v2534_v42, 0.5 }
 0x2e1   : > { %v2241_v35 = vpop.permute.xlu1 %2240  ;;  %v2243_v27 = vpop.permute.xlu0 %2242  ;;  %v7303_v42 = vsel %vm2566_vm3, 1, %v8546_v9 }
 0x2e2   : > { %2327 = vst.msk [vmem:[#allocation2 + $0x28] sm:$0xf] %vm2316_vm1, %v2241_v35  ;;  %2328 = vst.msk [vmem:[#allocation2 + $0x2c] sm:$0xf] %vm2316_vm1, %v2243_v27  ;;  %v2519_v27 = vld [vmem:[%s8281_s3 + $0x48] sm:$0xff] }
 0x2e3   : > { %2616 = vperm.xlu1 %5642, %v7156_v55   ;;  %2625 = vperm.xlu0 %5643, %v7159_v60   ;;  %vm2551_vm5 = vcmp.gt.f32.partialorder %v2519_v27, 0.5  ;;  %8548 = vst [vmem:[#allocation70_spill] sm:$0xff] %v7303_v42 }
 0x2e4   : > { %v7204_v11 = vsel %vm2551_vm5, 1, %v8546_v9  ;;  %vm2568_vm5 = vcmp.gt.f32.partialorder %v2536_v31, 0.5 }
 0x2e5   : > { %v2245_v15 = vpop.permute.xlu1 %2244  ;;  %v2247_v35 = vpop.permute.xlu0 %2246  ;;  %v7319_v31 = vsel %vm2568_vm5, 1, %v8546_v9 }
 0x2e6   : > { %2329 = vst.msk [vmem:[#allocation2 + $0x30] sm:$0xf] %vm2316_vm1, %v2245_v15  ;;  %2330 = vst.msk [vmem:[#allocation2 + $0x34] sm:$0xf] %vm2316_vm1, %v2247_v35  ;;  %v2521_v35 = vld [vmem:[%s8281_s3 + $0x58] sm:$0xff] }
 0x2e7   : > { %2622 = vperm.xlu1 %5642, %v7172_v24   ;;  %2631 = vperm.xlu0 %5643, %v7175_v53   ;;  %vm2553_vm7 = vcmp.gt.f32.partialorder %v2521_v35, 0.5  ;;  %8549 = vst [vmem:[#allocation76_spill] sm:$0xff] %v7319_v31 }
 0x2e8   : > { %v7220_v14 = vsel %vm2553_vm7, 1, %v8546_v9  ;;  %vm2570_vm7 = vcmp.gt.f32.partialorder %v2538_v54, 0.5 }
 0x2e9   : > { %v2249_v4 = vpop.permute.xlu1 %2248  ;;  %v2251_v15 = vpop.permute.xlu0 %2250  ;;  %v7335_v54 = vsel %vm2570_vm7, 1, %v8546_v9 }
 0x2ea   : > { %2331 = vst.msk [vmem:[#allocation2 + $0x38] sm:$0xf] %vm2316_vm1, %v2249_v4  ;;  %2332 = vst.msk [vmem:[#allocation2 + $0x3c] sm:$0xf] %vm2316_vm1, %v2251_v15  ;;  %v2523_v15 = vld [vmem:[%s8281_s3 + $0x68] sm:$0xff] }
 0x2eb   : > { %2628 = vperm.xlu1 %5642, %v7188_v46   ;;  %2637 = vperm.xlu0 %5643, %v7191_v63   ;;  %vm2555_vm0 = vcmp.gt.f32.partialorder %v2523_v15, 0.5  ;;  %8551 = vst [vmem:[#allocation78_spill] sm:$0xff] %v7335_v54 }
 0x2ec   : > { %v7236_v0 = vsel %vm2555_vm0, 1, %v8546_v9  ;;  %vm2572_vm0 = vcmp.gt.f32.partialorder %v2540_v5, 0.5 }
 0x2ed   : > { %v2253_v27 = vpop.permute.xlu1 %2252  ;;  %v2255_v4 = vpop.permute.xlu0 %2254 }
 0x2ee   : > { %2333 = vst.msk [vmem:[#allocation2 + $0x40] sm:$0xf] %vm2316_vm1, %v2253_v27  ;;  %2334 = vst.msk [vmem:[#allocation2 + $0x44] sm:$0xf] %vm2316_vm1, %v2255_v4  ;;  %v2525_v4 = vld [vmem:[%s8281_s3 + $0x78] sm:$0xff] }
 0x2ef   : > { %2634 = vperm.xlu1 %5642, %v7204_v11   ;;  %2643 = vperm.xlu0 %5643, %v7207_v49   ;;  %vm2557_vm10 = vcmp.gt.f32.partialorder %v2525_v4, 0.5 }
 0x2f0   : > { %v7252_v48 = vsel %vm2557_vm10, 1, %v8546_v9 }
 0x2f1   : > { %v2257_v35 = vpop.permute.xlu1 %2256  ;;  %v2259_v27 = vpop.permute.xlu0 %2258 }
 0x2f2   : > { %2335 = vst.msk [vmem:[#allocation2 + $0x48] sm:$0xf] %vm2316_vm1, %v2257_v35  ;;  %2336 = vst.msk [vmem:[#allocation2 + $0x4c] sm:$0xf] %vm2316_vm1, %v2259_v27  ;;  %v2527_v27 = vld [vmem:[%s8281_s3 + $0x88] sm:$0xff] }
 0x2f3   : > { %2640 = vperm.xlu1 %5642, %v7220_v14   ;;  %2649 = vperm.xlu0 %5643, %v7223_v50   ;;  %vm2559_vm12 = vcmp.gt.f32.partialorder %v2527_v27, 0.5 }
 0x2f4   : > { %v7268_v1 = vsel %vm2559_vm12, 1, %v8546_v9 }
 0x2f5   : > { %v2261_v15 = vpop.permute.xlu1 %2260  ;;  %v2263_v35 = vpop.permute.xlu0 %2262 }
 0x2f6   : > { %2337 = vst.msk [vmem:[#allocation2 + $0x50] sm:$0xf] %vm2316_vm1, %v2261_v15  ;;  %2338 = vst.msk [vmem:[#allocation2 + $0x54] sm:$0xf] %vm2316_vm1, %v2263_v35  ;;  %v2529_v35 = vld [vmem:[%s8281_s3 + $0x98] sm:$0xff] }
 0x2f7   : > { %2646 = vperm.xlu1 %5642, %v7236_v0   ;;  %2655 = vperm.xlu0 %5643, %v7239_v18   ;;  %vm2561_vm14 = vcmp.gt.f32.partialorder %v2529_v35, 0.5 }
 0x2f8   : > { %v7284_v37 = vsel %vm2561_vm14, 1, %v8546_v9 }
 0x2f9   : > { %v2265_v4 = vpop.permute.xlu1 %2264  ;;  %v2267_v15 = vpop.permute.xlu0 %2266 }
 0x2fa   : > { %2339 = vst.msk [vmem:[#allocation2 + $0x58] sm:$0xf] %vm2316_vm1, %v2265_v4  ;;  %2340 = vst.msk [vmem:[#allocation2 + $0x5c] sm:$0xf] %vm2316_vm1, %v2267_v15  ;;  %v2531_v15 = vld [vmem:[%s8281_s3 + $0xa8] sm:$0xff] }
 0x2fb   : > { %2652 = vperm.xlu1 %5642, %v7252_v48   ;;  %2661 = vperm.xlu0 %5643, %v7255_v22   ;;  %vm2563_vm2 = vcmp.gt.f32.partialorder %v2531_v15, 0.5 }
 0x2fc   : > { %v7300_v6 = vsel %vm2563_vm2, 1, %v8546_v9 }
 0x2fd   : > { %v2269_v27 = vpop.permute.xlu1 %2268  ;;  %v2271_v4 = vpop.permute.xlu0 %2270 }
 0x2fe   : > { %2341 = vst.msk [vmem:[#allocation2 + $0x60] sm:$0xf] %vm2316_vm1, %v2269_v27  ;;  %2342 = vst.msk [vmem:[#allocation2 + $0x64] sm:$0xf] %vm2316_vm1, %v2271_v4  ;;  %v2533_v4 = vld [vmem:[%s8281_s3 + $0xb8] sm:$0xff] }
 0x2ff   : > { %2658 = vperm.xlu1 %5642, %v7268_v1   ;;  %2667 = vperm.xlu0 %5643, %v7271_v36   ;;  %vm2565_vm4 = vcmp.gt.f32.partialorder %v2533_v4, 0.5 }
 0x300   : > { %v7316_v7 = vsel %vm2565_vm4, 1, %v8546_v9 }
 0x301   : > { %v2273_v35 = vpop.permute.xlu1 %2272  ;;  %v2275_v27 = vpop.permute.xlu0 %2274 }
 0x302   : > { %2343 = vst.msk [vmem:[#allocation2 + $0x68] sm:$0xf] %vm2316_vm1, %v2273_v35  ;;  %2344 = vst.msk [vmem:[#allocation2 + $0x6c] sm:$0xf] %vm2316_vm1, %v2275_v27  ;;  %v2535_v27 = vld [vmem:[%s8281_s3 + $0xc8] sm:$0xff] }
 0x303   : > { %2664 = vperm.xlu1 %5642, %v7284_v37   ;;  %2673 = vperm.xlu0 %5643, %v7287_v44   ;;  %vm2567_vm6 = vcmp.gt.f32.partialorder %v2535_v27, 0.5 }
 0x304   : > { %v7332_v27 = vsel %vm2567_vm6, 1, %v8546_v9 }
 0x305   : > { %v2277_v15 = vpop.permute.xlu1 %2276  ;;  %v2279_v35 = vpop.permute.xlu0 %2278  ;;  %8550 = vst [vmem:[#allocation71_spill] sm:$0xff] %v7332_v27 }
 0x306   : > { %2345 = vst.msk [vmem:[#allocation2 + $0x70] sm:$0xf] %vm2316_vm1, %v2277_v15  ;;  %2346 = vst.msk [vmem:[#allocation2 + $0x74] sm:$0xf] %vm2316_vm1, %v2279_v35  ;;  %v2537_v35 = vld [vmem:[%s8281_s3 + $0xd8] sm:$0xff] }
 0x307   : > { %2670 = vperm.xlu1 %5642, %v7300_v6   ;;  %2679 = vperm.xlu0 %5643, %v7303_v42   ;;  %v7348_v42 = vsel %vm2572_vm0, 1, %v8546_v9 }
 0x308   : > { %8553 = vst [vmem:[#allocation80_spill] sm:$0xff] %v7348_v42 }
 0x309   : > { %v2281_v4 = vpop.permute.xlu1 %2280  ;;  %v2283_v15 = vpop.permute.xlu0 %2282 }
 0x30a   : > { %2347 = vst.msk [vmem:[#allocation2 + $0x78] sm:$0xf] %vm2316_vm1, %v2281_v4  ;;  %2348 = vst.msk [vmem:[#allocation2 + $0x7c] sm:$0xf] %vm2316_vm1, %v2283_v15  ;;  %vm2569_vm1 = vcmp.gt.f32.partialorder %v2537_v35, 0.5 }
 0x30b   : > { %2676 = vperm.xlu1 %5642, %v7316_v7   ;;  %2685 = vperm.xlu0 %5643, %v7319_v31   ;;  %v7345_v31 = vsel %vm2569_vm1, 1, %v8546_v9 }
 0x30c   : > { %8552 = vst [vmem:[#allocation72_spill] sm:$0xff] %v7345_v31 }
 0x30d   : > { %v2382_v4 = vpop.permute.xlu1 %2381  ;;  %v2384_v15 = vpop.permute.xlu0 %2383 }
 0x30e   : > { %2478 = vst.msk [vmem:[#allocation2] sm:$0xf] %vm2477_vm8, %v2382_v4  ;;  %2479 = vst.msk [vmem:[#allocation2 + $0x4] sm:$0xf] %vm2477_vm8, %v2384_v15  ;;  %v2541_v4 = vld [vmem:[%s8281_s3 + $0xf8] sm:$0xff]  ;;  %v7358_v15 = vsel %vm2571_vm9, 1, %v8546_v9 }
 0x30f   : > { %2682 = vperm.xlu1 %5642, %v7332_v27   ;;  %2691 = vperm.xlu0 %5643, %v7335_v54   ;;  %8554 = vst [vmem:[#allocation73_spill] sm:$0xff] %v7358_v15  ;;  %vm2573_vm10 = vcmp.gt.f32.partialorder %v2541_v4, 0.5 }
 0x310   : > { %v7364_v29 = vsel %vm2573_vm10, 1, %v8546_v9 }
 0x311   : > { %v2386_v35 = vpop.permute.xlu1 %2385  ;;  %v2388_v5 = vpop.permute.xlu0 %2387  ;;  %8555 = vst [vmem:[#allocation81_spill] sm:$0xff] %v7364_v29 }
 0x312   : > { %2480 = vst.msk [vmem:[#allocation2 + $0x8] sm:$0xf] %vm2477_vm8, %v2386_v35  ;;  %2481 = vst.msk [vmem:[#allocation2 + $0xc] sm:$0xf] %vm2477_vm8, %v2388_v5 }
 0x313   : > { %2688 = vperm.xlu1 %5642, %v7345_v31   ;;  %2697 = vperm.xlu0 %5643, %v7348_v42   ;;  %v5778_v42 = vmov 6  }
 0x315   : > { %v2390_v54 = vpop.permute.xlu1 %2389  ;;  %v2392_v27 = vpop.permute.xlu0 %2391 }
 0x316   : > { %2482 = vst.msk [vmem:[#allocation2 + $0x10] sm:$0xf] %vm2477_vm8, %v2390_v54  ;;  %2483 = vst.msk [vmem:[#allocation2 + $0x14] sm:$0xf] %vm2477_vm8, %v2392_v27 }
 0x317   : > { %2694 = vperm.xlu1 %5642, %v7358_v15   ;;  %5644 = vset.pattern.permute.xlu0 %v5778_v42 }
 0x319   : > { %v2394_v35 = vpop.permute.xlu1 %2393  ;;  %v2396_v5 = vpop.permute.xlu0 %2395 }
 0x31a   : > { %2484 = vst.msk [vmem:[#allocation2 + $0x18] sm:$0xf] %vm2477_vm8, %v2394_v35  ;;  %2485 = vst.msk [vmem:[#allocation2 + $0x1c] sm:$0xf] %vm2477_vm8, %v2396_v5 }
 0x31b   : > { %2700 = vperm.xlu1 %5642, %v7364_v29  }
 0x31d   : > { %v2398_v4 = vpop.permute.xlu1 %2397  ;;  %v2400_v31 = vpop.permute.xlu0 %2399 }
 0x31e   : > { %2486 = vst.msk [vmem:[#allocation2 + $0x20] sm:$0xf] %vm2477_vm8, %v2398_v4  ;;  %2487 = vst.msk [vmem:[#allocation2 + $0x24] sm:$0xf] %vm2477_vm8, %v2400_v31 }
 0x31f   : > { %5645 = vset.pattern.permute.xlu1 %v5778_v42 }
 0x321   : > { %v2402_v27 = vpop.permute.xlu1 %2401  ;;  %v2404_v54 = vpop.permute.xlu0 %2403 }
 0x322   : > { %2488 = vst.msk [vmem:[#allocation2 + $0x28] sm:$0xf] %vm2477_vm8, %v2402_v27  ;;  %2489 = vst.msk [vmem:[#allocation2 + $0x2c] sm:$0xf] %vm2477_vm8, %v2404_v54 }
 0x325   : > { %v2406_v35 = vpop.permute.xlu1 %2405  ;;  %v2408_v9 = vpop.permute.xlu0 %2407 }
 0x326   : > { %2490 = vst.msk [vmem:[#allocation2 + $0x30] sm:$0xf] %vm2477_vm8, %v2406_v35  ;;  %2491 = vst.msk [vmem:[#allocation2 + $0x34] sm:$0xf] %vm2477_vm8, %v2408_v9 }
 0x329   : > { %v2410_v5 = vpop.permute.xlu1 %2409  ;;  %v2412_v29 = vpop.permute.xlu0 %2411 }
 0x32a   : > { %2492 = vst.msk [vmem:[#allocation2 + $0x38] sm:$0xf] %vm2477_vm8, %v2410_v5  ;;  %2493 = vst.msk [vmem:[#allocation2 + $0x3c] sm:$0xf] %vm2477_vm8, %v2412_v29 }
 0x32d   : > { %v2414_v31 = vpop.permute.xlu1 %2413  ;;  %v2416_v42 = vpop.permute.xlu0 %2415 }
 0x32e   : > { %2494 = vst.msk [vmem:[#allocation2 + $0x40] sm:$0xf] %vm2477_vm8, %v2414_v31  ;;  %2495 = vst.msk [vmem:[#allocation2 + $0x44] sm:$0xf] %vm2477_vm8, %v2416_v42 }
 0x331   : > { %v2418_v4 = vpop.permute.xlu1 %2417  ;;  %v2420_v27 = vpop.permute.xlu0 %2419 }
 0x332   : > { %2496 = vst.msk [vmem:[#allocation2 + $0x48] sm:$0xf] %vm2477_vm8, %v2418_v4  ;;  %2497 = vst.msk [vmem:[#allocation2 + $0x4c] sm:$0xf] %vm2477_vm8, %v2420_v27 }
 0x335   : > { %v2422_v54 = vpop.permute.xlu1 %2421  ;;  %v2424_v9 = vpop.permute.xlu0 %2423 }
 0x336   : > { %2498 = vst.msk [vmem:[#allocation2 + $0x50] sm:$0xf] %vm2477_vm8, %v2422_v54  ;;  %2499 = vst.msk [vmem:[#allocation2 + $0x54] sm:$0xf] %vm2477_vm8, %v2424_v9 }
 0x339   : > { %v2426_v35 = vpop.permute.xlu1 %2425  ;;  %v2428_v29 = vpop.permute.xlu0 %2427 }
 0x33a   : > { %2500 = vst.msk [vmem:[#allocation2 + $0x58] sm:$0xf] %vm2477_vm8, %v2426_v35  ;;  %2501 = vst.msk [vmem:[#allocation2 + $0x5c] sm:$0xf] %vm2477_vm8, %v2428_v29 }
 0x33d   : > { %v2430_v5 = vpop.permute.xlu1 %2429  ;;  %v2432_v31 = vpop.permute.xlu0 %2431 }
 0x33e   : > { %2502 = vst.msk [vmem:[#allocation2 + $0x60] sm:$0xf] %vm2477_vm8, %v2430_v5  ;;  %2503 = vst.msk [vmem:[#allocation2 + $0x64] sm:$0xf] %vm2477_vm8, %v2432_v31 }
 0x341   : > { %v2434_v42 = vpop.permute.xlu1 %2433  ;;  %v2436_v4 = vpop.permute.xlu0 %2435 }
 0x342   : > { %2504 = vst.msk [vmem:[#allocation2 + $0x68] sm:$0xf] %vm2477_vm8, %v2434_v42  ;;  %2505 = vst.msk [vmem:[#allocation2 + $0x6c] sm:$0xf] %vm2477_vm8, %v2436_v4 }
 0x345   : > { %v2438_v27 = vpop.permute.xlu1 %2437  ;;  %v2440_v54 = vpop.permute.xlu0 %2439 }
 0x346   : > { %2506 = vst.msk [vmem:[#allocation2 + $0x70] sm:$0xf] %vm2477_vm8, %v2438_v27  ;;  %2507 = vst.msk [vmem:[#allocation2 + $0x74] sm:$0xf] %vm2477_vm8, %v2440_v54 }
 0x349   : > { %v2442_v9 = vpop.permute.xlu1 %2441  ;;  %v2444_v35 = vpop.permute.xlu0 %2443 }
 0x34a   : > { %2508 = vst.msk [vmem:[#allocation2 + $0x78] sm:$0xf] %vm2477_vm8, %v2442_v9  ;;  %2509 = vst.msk [vmem:[#allocation2 + $0x7c] sm:$0xf] %vm2477_vm8, %v2444_v35 }
 0x356   : > { %v2608_v29 = vpop.permute.xlu1 %2607  ;;  %v2611_v5 = vpop.permute.xlu0 %2610 }
 0x357   : > { %vm2702_vm11 = vcmp.eq.s32.totalorder %v2608_v29, 1  ;;  %vm2703_vm12 = vcmp.eq.s32.totalorder %v2611_v5, 1 }
 0x358   : > { %v2734_v31 = vsel %vm2702_vm11, %v6738_v10, 0.0  ;;  %v2735_v42 = vsel %vm2703_vm12, %v6749_v33, 0.0 }
 0x359   : > { %v5384_v4 = vpack.c.bf16 %v2734_v31, %v2734_v31  ;;  %v5385_v15 = vpack.c.bf16 %v2735_v42, %v2735_v42 }
 0x35a   : > { %v2614_v44 = vpop.permute.xlu1 %2613  ;;  %v2620_v27 = vpop.permute.xlu0 %2619 }
 0x35b   : > { %vm2704_vm13 = vcmp.eq.s32.totalorder %v2614_v44, 1  ;;  %vm2706_vm14 = vcmp.eq.s32.totalorder %v2620_v27, 1  ;;  %2862 = vrot.lane.b32.xlu0 %v5384_v4, %s5779_s6  ;;  %2864 = vrot.lane.b32.xlu1 %v5385_v15, %s5779_s6 }
 0x35c   : > { %v2736_v54 = vsel %vm2704_vm13, %v6743_v61, 0.0  ;;  %v2738_v35 = vsel %vm2706_vm14, %v6753_v19, 0.0 }
 0x35d   : > { %v5386_v9 = vpack.c.bf16 %v2736_v54, %v2736_v54  ;;  %v5388_v44 = vpack.c.bf16 %v2738_v35, %v2738_v35 }
 0x35e   : > { %v2617_v29 = vpop.permute.xlu1 %2616  ;;  %v2626_v5 = vpop.permute.xlu0 %2625 }
 0x35f   : > { %vm2705_vm15 = vcmp.eq.s32.totalorder %v2617_v29, 1  ;;  %vm2708_vm2 = vcmp.eq.s32.totalorder %v2626_v5, 1  ;;  %2866 = vrot.lane.b32.xlu0 %v5386_v9, %s5779_s6 }
 0x360   : > { %v2737_v31 = vsel %vm2705_vm15, %v6760_v45, 0.0  ;;  %v2740_v27 = vsel %vm2708_vm2, %v6766_v8, 0.0 }
 0x361   : > { %v5387_v42 = vpack.c.bf16 %v2737_v31, %v2737_v31  ;;  %v5390_v54 = vpack.c.bf16 %v2740_v27, %v2740_v27 }
 0x362   : > { %v2623_v4 = vpop.permute.xlu1 %2622  ;;  %v2632_v33 = vpop.permute.xlu0 %2631 }
 0x363   : > { %vm2707_vm3 = vcmp.eq.s32.totalorder %v2623_v4, 1  ;;  %vm2710_vm4 = vcmp.eq.s32.totalorder %v2632_v33, 1  ;;  %2868 = vrot.lane.b32.xlu1 %v5387_v42, %s5779_s6  ;;  %2870 = vrot.lane.b32.xlu0 %v5388_v44, %s5779_s6 }
 0x364   : > { %v2739_v15 = vsel %vm2707_vm3, %v6772_v26, 0.0  ;;  %v2742_v9 = vsel %vm2710_vm4, %v6776_v62, 0.0 }
 0x365   : > { %v5389_v29 = vpack.c.bf16 %v2739_v15, %v2739_v15  ;;  %v5392_v35 = vpack.c.bf16 %v2742_v9, %v2742_v9 }
 0x366   : > { %v2629_v5 = vpop.permute.xlu1 %2628  ;;  %v2638_v10 = vpop.permute.xlu0 %2637 }
 0x367   : > { %vm2709_vm5 = vcmp.eq.s32.totalorder %v2629_v5, 1  ;;  %vm2712_vm6 = vcmp.eq.s32.totalorder %v2638_v10, 1  ;;  %2872 = vrot.lane.b32.xlu1 %v5389_v29, %s5779_s6  ;;  %2874 = vrot.lane.b32.xlu0 %v5390_v54, %s5779_s6 }
 0x368   : > { %v2741_v33 = vsel %vm2709_vm5, %v6784_v52, 0.0  ;;  %v2744_v44 = vsel %vm2712_vm6, %v6790_v47, 0.0 }
 0x369   : > { %v5391_v31 = vpack.c.bf16 %v2741_v33, %v2741_v33  ;;  %v5394_v27 = vpack.c.bf16 %v2744_v44, %v2744_v44 }
 0x36a   : > { %v2635_v42 = vpop.permute.xlu1 %2634  ;;  %v2644_v4 = vpop.permute.xlu0 %2643 }
 0x36b   : > { %vm2711_vm7 = vcmp.eq.s32.totalorder %v2635_v42, 1  ;;  %vm2714_vm8 = vcmp.eq.s32.totalorder %v2644_v4, 1  ;;  %2876 = vrot.lane.b32.xlu1 %v5391_v31, %s5779_s6  ;;  %2878 = vrot.lane.b32.xlu0 %v5392_v35, %s5779_s6 }
 0x36c   : > { %v2743_v10 = vsel %vm2711_vm7, %v6796_v16, 0.0  ;;  %v2746_v54 = vsel %vm2714_vm8, %v6800_v41, 0.0 }
 0x36d   : > { %v5393_v15 = vpack.c.bf16 %v2743_v10, %v2743_v10  ;;  %v5396_v33 = vpack.c.bf16 %v2746_v54, %v2746_v54 }
 0x36e   : > { %v2641_v29 = vpop.permute.xlu1 %2640  ;;  %v2650_v5 = vpop.permute.xlu0 %2649 }
 0x36f   : > { %vm2713_vm1 = vcmp.eq.s32.totalorder %v2641_v29, 1  ;;  %vm2716_vm0 = vcmp.eq.s32.totalorder %v2650_v5, 1  ;;  %2880 = vrot.lane.b32.xlu1 %v5393_v15, %s5779_s6  ;;  %2882 = vrot.lane.b32.xlu0 %v5394_v27, %s5779_s6 }
 0x370   : > { %v2745_v9 = vsel %vm2713_vm1, %v6808_v13, 0.0  ;;  %v2748_v35 = vsel %vm2716_vm0, %v6814_v34, 0.0 }
 0x371   : > { %v5395_v31 = vpack.c.bf16 %v2745_v9, %v2745_v9  ;;  %v5398_v10 = vpack.c.bf16 %v2748_v35, %v2748_v35 }
 0x372   : > { %v2647_v42 = vpop.permute.xlu1 %2646  ;;  %v2656_v4 = vpop.permute.xlu0 %2655 }
 0x373   : > { %vm2715_vm9 = vcmp.eq.s32.totalorder %v2647_v42, 1  ;;  %vm2718_vm10 = vcmp.eq.s32.totalorder %v2656_v4, 1  ;;  %2884 = vrot.lane.b32.xlu1 %v5395_v31, %s5779_s6  ;;  %2886 = vrot.lane.b32.xlu0 %v5396_v33, %s5779_s6 }
 0x374   : > { %v2747_v44 = vsel %vm2715_vm9, %v6820_v20, 0.0  ;;  %v2750_v27 = vsel %vm2718_vm10, %v6824_v28, 0.0 }
 0x375   : > { %v5397_v15 = vpack.c.bf16 %v2747_v44, %v2747_v44  ;;  %v5400_v9 = vpack.c.bf16 %v2750_v27, %v2750_v27 }
 0x376   : > { %v2653_v29 = vpop.permute.xlu1 %2652  ;;  %v2662_v5 = vpop.permute.xlu0 %2661 }
 0x377   : > { %vm2717_vm11 = vcmp.eq.s32.totalorder %v2653_v29, 1  ;;  %vm2720_vm12 = vcmp.eq.s32.totalorder %v2662_v5, 1  ;;  %2888 = vrot.lane.b32.xlu1 %v5397_v15, %s5779_s6  ;;  %2890 = vrot.lane.b32.xlu0 %v5398_v10, %s5779_s6 }
 0x378   : > { %v2749_v54 = vsel %vm2717_vm11, %v6832_v58, 0.0  ;;  %v2752_v33 = vsel %vm2720_vm12, %v6838_v43, 0.0  ;;  %vm2958_vm11 = vcmask 191648  }
 0x379   : > { %v5399_v31 = vpack.c.bf16 %v2749_v54, %v2749_v54  ;;  %v5402_v44 = vpack.c.bf16 %v2752_v33, %v2752_v33 }
 0x37a   : > { %v2659_v42 = vpop.permute.xlu1 %2658  ;;  %v2668_v4 = vpop.permute.xlu0 %2667 }
 0x37b   : > { %vm2719_vm13 = vcmp.eq.s32.totalorder %v2659_v42, 1  ;;  %vm2722_vm14 = vcmp.eq.s32.totalorder %v2668_v4, 1  ;;  %2892 = vrot.lane.b32.xlu1 %v5399_v31, %s5779_s6  ;;  %2894 = vrot.lane.b32.xlu0 %v5400_v9, %s5779_s6 }
 0x37c   : > { %v2751_v35 = vsel %vm2719_vm13, %v6844_v30, 0.0  ;;  %v2754_v10 = vsel %vm2722_vm14, %v6848_v51, 0.0 }
 0x37d   : > { %v5401_v15 = vpack.c.bf16 %v2751_v35, %v2751_v35  ;;  %v5404_v54 = vpack.c.bf16 %v2754_v10, %v2754_v10 }
 0x37e   : > { %v2665_v29 = vpop.permute.xlu1 %2664  ;;  %v2674_v5 = vpop.permute.xlu0 %2673 }
 0x37f   : > { %vm2721_vm15 = vcmp.eq.s32.totalorder %v2665_v29, 1  ;;  %vm2724_vm2 = vcmp.eq.s32.totalorder %v2674_v5, 1  ;;  %2896 = vrot.lane.b32.xlu1 %v5401_v15, %s5779_s6  ;;  %2898 = vrot.lane.b32.xlu0 %v5402_v44, %s5779_s6 }
 0x380   : > { %v2753_v27 = vsel %vm2721_vm15, %v6856_v40, 0.0  ;;  %v2756_v9 = vsel %vm2724_vm2, %v6862_v12, 0.0 }
 0x381   : > { %v5403_v31 = vpack.c.bf16 %v2753_v27, %v2753_v27  ;;  %v5406_v35 = vpack.c.bf16 %v2756_v9, %v2756_v9 }
 0x382   : > { %v2671_v42 = vpop.permute.xlu1 %2670  ;;  %v2680_v4 = vpop.permute.xlu0 %2679 }
 0x383   : > { %vm2723_vm3 = vcmp.eq.s32.totalorder %v2671_v42, 1  ;;  %vm2726_vm4 = vcmp.eq.s32.totalorder %v2680_v4, 1  ;;  %2900 = vrot.lane.b32.xlu1 %v5403_v31, %s5779_s6  ;;  %2902 = vrot.lane.b32.xlu0 %v5404_v54, %s5779_s6 }
 0x384   : > { %v2755_v33 = vsel %vm2723_vm3, %v6868_v2, 0.0  ;;  %v2758_v44 = vsel %vm2726_vm4, %v6872_v38, 0.0 }
 0x385   : > { %v5405_v15 = vpack.c.bf16 %v2755_v33, %v2755_v33  ;;  %v5408_v27 = vpack.c.bf16 %v2758_v44, %v2758_v44 }
 0x386   : > { %v2677_v29 = vpop.permute.xlu1 %2676  ;;  %v2686_v5 = vpop.permute.xlu0 %2685 }
 0x387   : > { %vm2725_vm5 = vcmp.eq.s32.totalorder %v2677_v29, 1  ;;  %vm2728_vm6 = vcmp.eq.s32.totalorder %v2686_v5, 1  ;;  %2904 = vrot.lane.b32.xlu1 %v5405_v15, %s5779_s6  ;;  %2906 = vrot.lane.b32.xlu0 %v5406_v35, %s5779_s6 }
 0x388   : > { %v2757_v10 = vsel %vm2725_vm5, %v6880_v21, 0.0  ;;  %v2760_v54 = vsel %vm2728_vm6, %v6884_v3, 0.0 }
 0x389   : > { %v5407_v31 = vpack.c.bf16 %v2757_v10, %v2757_v10  ;;  %v5410_v33 = vpack.c.bf16 %v2760_v54, %v2760_v54 }
 0x38a   : > { %v2683_v42 = vpop.permute.xlu1 %2682  ;;  %v2692_v4 = vpop.permute.xlu0 %2691 }
 0x38b   : > { %vm2727_vm7 = vcmp.eq.s32.totalorder %v2683_v42, 1  ;;  %vm2730_vm8 = vcmp.eq.s32.totalorder %v2692_v4, 1  ;;  %2908 = vrot.lane.b32.xlu1 %v5407_v31, %s5779_s6  ;;  %2910 = vrot.lane.b32.xlu0 %v5408_v27, %s5779_s6  ;;  %v8556_v42 = vld [vmem:[#allocation84_spill] sm:$0xff] }
 0x38c   : > { %v2759_v9 = vsel %vm2727_vm7, %v6891_v56, 0.0  ;;  %v2762_v35 = vsel %vm2730_vm8, %v6897_v17, 0.0 }
 0x38d   : > { %v5409_v15 = vpack.c.bf16 %v2759_v9, %v2759_v9  ;;  %v5412_v10 = vpack.c.bf16 %v2762_v35, %v2762_v35 }
 0x38e   : > { %v2689_v29 = vpop.permute.xlu1 %2688  ;;  %v2698_v5 = vpop.permute.xlu0 %2697 }
 0x38f   : > { %vm2729_vm1 = vcmp.eq.s32.totalorder %v2689_v29, 1  ;;  %vm2732_vm0 = vcmp.eq.s32.totalorder %v2698_v5, 1  ;;  %2912 = vrot.lane.b32.xlu1 %v5409_v15, %s5779_s6  ;;  %2914 = vrot.lane.b32.xlu0 %v5410_v33, %s5779_s6  ;;  %v8557_v33 = vld [vmem:[#allocation83_spill] sm:$0xff] }
 0x390   : > { %v2761_v44 = vsel %vm2729_vm1, %v6903_v23, 0.0  ;;  %v2764_v27 = vsel %vm2732_vm0, %v8556_v42, 0.0 }
 0x391   : > { %v5411_v31 = vpack.c.bf16 %v2761_v44, %v2761_v44  ;;  %v5414_v9 = vpack.c.bf16 %v2764_v27, %v2764_v27 }
 0x392   : > { %v2695_v4 = vpop.permute.xlu1 %2694 }
 0x393   : > { %vm2731_vm9 = vcmp.eq.s32.totalorder %v2695_v4, 1  ;;  %2916 = vrot.lane.b32.xlu1 %v5411_v31, %s5779_s6  ;;  %2918 = vrot.lane.b32.xlu0 %v5412_v10, %s5779_s6 }
 0x394   : > { %v2763_v54 = vsel %vm2731_vm9, %v6687_v57, 0.0 }
 0x395   : > { %v5413_v29 = vpack.c.bf16 %v2763_v54, %v2763_v54 }
 0x396   : > { %v2701_v5 = vpop.permute.xlu1 %2700 }
 0x397   : > { %vm2733_vm10 = vcmp.eq.s32.totalorder %v2701_v5, 1  ;;  %2920 = vrot.lane.b32.xlu1 %v5413_v29, %s5779_s6  ;;  %2922 = vrot.lane.b32.xlu0 %v5414_v9, %s5779_s6 }
 0x398   : > { %v2765_v15 = vsel %vm2733_vm10, %v8557_v33, 0.0 }
 0x399   : > { %v5415_v35 = vpack.c.bf16 %v2765_v15, %v2765_v15 }
 0x39b   : > { %2924 = vrot.lane.b32.xlu1 %v5415_v35, %s5779_s6  ;;  %3088 = vperm.xlu0 %5644, %v7124_v39   ;;  %v8564_v39 = vld [vmem:[#allocation78_spill] sm:$0xff] }
 0x39f   : > { %3091 = vperm.xlu1 %5645, %v7127_v25   ;;  %3097 = vperm.xlu0 %5644, %v7156_v55   ;;  %v8565_v25 = vld [vmem:[#allocation81_spill] sm:$0xff] }
 0x3a3   : > { %3094 = vperm.xlu1 %5645, %v7140_v59   ;;  %3103 = vperm.xlu0 %5644, %v7172_v24  }
 0x3a7   : > { %3100 = vperm.xlu1 %5645, %v7143_v32   ;;  %3109 = vperm.xlu0 %5644, %v7188_v46   ;;  %v8562_v46 = vld [vmem:[#allocation76_spill] sm:$0xff] }
 0x3ab   : > { %3106 = vperm.xlu1 %5645, %v7159_v60   ;;  %3115 = vperm.xlu0 %5644, %v7204_v11   ;;  %v8566_v60 = vld [vmem:[#allocation80_spill] sm:$0xff] }
 0x3af   : > { %3112 = vperm.xlu1 %5645, %v7175_v53   ;;  %3121 = vperm.xlu0 %5644, %v7220_v14   ;;  %v8559_v14 = vld [vmem:[#allocation71_spill] sm:$0xff]  ;;  %v5780_v53 = vmov 7  }
 0x3b3   : > { %3118 = vperm.xlu1 %5645, %v7191_v63   ;;  %3127 = vperm.xlu0 %5644, %v7236_v0   ;;  %v8558_v0 = vld [vmem:[#allocation74_spill] sm:$0xff] }
 0x3b7   : > { %3124 = vperm.xlu1 %5645, %v7207_v49   ;;  %3133 = vperm.xlu0 %5644, %v7252_v48  }
 0x3bb   : > { %3130 = vperm.xlu1 %5645, %v7223_v50   ;;  %3139 = vperm.xlu0 %5644, %v7268_v1   ;;  %v8561_v1 = vld [vmem:[#allocation72_spill] sm:$0xff] }
 0x3bf   : > { %3136 = vperm.xlu1 %5645, %v7239_v18   ;;  %3145 = vperm.xlu0 %5644, %v7284_v37   ;;  %v8560_v37 = vld [vmem:[#allocation70_spill] sm:$0xff] }
 0x3c3   : > { %3142 = vperm.xlu1 %5645, %v7255_v22   ;;  %3151 = vperm.xlu0 %5644, %v7300_v6  }
 0x3c7   : > { %3148 = vperm.xlu1 %5645, %v7271_v36   ;;  %3157 = vperm.xlu0 %5644, %v7316_v7   ;;  %v8563_v7 = vld [vmem:[#allocation73_spill] sm:$0xff] }
 0x3cb   : > { %3154 = vperm.xlu1 %5645, %v8558_v0   ;;  %3163 = vperm.xlu0 %5644, %v8559_v14  }
 0x3cd   : > { %v2863_v48 = vpop.permute.xlu0 %2862  ;;  %v2865_v11 = vpop.permute.xlu1 %2864 }
 0x3ce   : > { %2959 = vst.msk [vmem:[#allocation2] sm:$0xf] %vm2958_vm11, %v2863_v48  ;;  %2960 = vst.msk [vmem:[#allocation2 + $0x4] sm:$0xf] %vm2958_vm11, %v2865_v11 }
 0x3cf   : > { %3160 = vperm.xlu1 %5645, %v8560_v37   ;;  %3169 = vperm.xlu0 %5644, %v8561_v1  }
 0x3d1   : > { %v2867_v6 = vpop.permute.xlu0 %2866 }
 0x3d2   : > { %2961 = vst.msk [vmem:[#allocation2 + $0x8] sm:$0xf] %vm2958_vm11, %v2867_v6 }
 0x3d3   : > { %3166 = vperm.xlu1 %5645, %v8562_v46   ;;  %3175 = vperm.xlu0 %5644, %v8563_v7  }
 0x3d5   : > { %v2869_v24 = vpop.permute.xlu1 %2868  ;;  %v2871_v55 = vpop.permute.xlu0 %2870 }
 0x3d6   : > { %2962 = vst.msk [vmem:[#allocation2 + $0xc] sm:$0xf] %vm2958_vm11, %v2869_v24  ;;  %2963 = vst.msk [vmem:[#allocation2 + $0x10] sm:$0xf] %vm2958_vm11, %v2871_v55  ;;  %v8567_v24 = vld [vmem:[#allocation19_spill] sm:$0xff] }
 0x3d7   : > { %3172 = vperm.xlu1 %5645, %v8564_v39   ;;  %3181 = vperm.xlu0 %5644, %v8565_v25  }
 0x3d9   : > { %v2873_v59 = vpop.permute.xlu1 %2872  ;;  %v2875_v32 = vpop.permute.xlu0 %2874 }
 0x3da   : > { %2964 = vst.msk [vmem:[#allocation2 + $0x14] sm:$0xf] %vm2958_vm11, %v2873_v59  ;;  %2965 = vst.msk [vmem:[#allocation2 + $0x18] sm:$0xf] %vm2958_vm11, %v2875_v32  ;;  %v8568_v32 = vld [vmem:[#allocation21_spill] sm:$0xff] }
 0x3db   : > { %3178 = vperm.xlu1 %5645, %v8566_v60   ;;  %5647 = vset.pattern.permute.xlu0 %v5780_v53 }
 0x3dd   : > { %v2877_v63 = vpop.permute.xlu1 %2876  ;;  %v2879_v49 = vpop.permute.xlu0 %2878 }
 0x3de   : > { %2966 = vst.msk [vmem:[#allocation2 + $0x1c] sm:$0xf] %vm2958_vm11, %v2877_v63  ;;  %2967 = vst.msk [vmem:[#allocation2 + $0x20] sm:$0xf] %vm2958_vm11, %v2879_v49  ;;  %v8569_v49 = vld [vmem:[#allocation24_spill] sm:$0xff] }
 0x3df   : > { %5646 = vset.pattern.permute.xlu1 %v5780_v53 }
 0x3e1   : > { %v2881_v50 = vpop.permute.xlu1 %2880  ;;  %v2883_v18 = vpop.permute.xlu0 %2882 }
 0x3e2   : > { %2968 = vst.msk [vmem:[#allocation2 + $0x24] sm:$0xf] %vm2958_vm11, %v2881_v50  ;;  %2969 = vst.msk [vmem:[#allocation2 + $0x28] sm:$0xf] %vm2958_vm11, %v2883_v18 }
 0x3e5   : > { %v2885_v22 = vpop.permute.xlu1 %2884  ;;  %v2887_v36 = vpop.permute.xlu0 %2886 }
 0x3e6   : > { %2970 = vst.msk [vmem:[#allocation2 + $0x2c] sm:$0xf] %vm2958_vm11, %v2885_v22  ;;  %2971 = vst.msk [vmem:[#allocation2 + $0x30] sm:$0xf] %vm2958_vm11, %v2887_v36  ;;  %v8570_v36 = vld [vmem:[#allocation26_spill] sm:$0xff] }
 0x3e9   : > { %v2889_v44 = vpop.permute.xlu1 %2888  ;;  %v2891_v10 = vpop.permute.xlu0 %2890 }
 0x3ea   : > { %2972 = vst.msk [vmem:[#allocation2 + $0x34] sm:$0xf] %vm2958_vm11, %v2889_v44  ;;  %2973 = vst.msk [vmem:[#allocation2 + $0x38] sm:$0xf] %vm2958_vm11, %v2891_v10 }
 0x3ed   : > { %v2893_v31 = vpop.permute.xlu1 %2892  ;;  %v2895_v27 = vpop.permute.xlu0 %2894 }
 0x3ee   : > { %2974 = vst.msk [vmem:[#allocation2 + $0x3c] sm:$0xf] %vm2958_vm11, %v2893_v31  ;;  %2975 = vst.msk [vmem:[#allocation2 + $0x40] sm:$0xf] %vm2958_vm11, %v2895_v27  ;;  %v8571_v27 = vld [vmem:[#allocation30_spill] sm:$0xff] }
 0x3f1   : > { %v2897_v4 = vpop.permute.xlu1 %2896  ;;  %v2899_v54 = vpop.permute.xlu0 %2898 }
 0x3f2   : > { %2976 = vst.msk [vmem:[#allocation2 + $0x44] sm:$0xf] %vm2958_vm11, %v2897_v4  ;;  %2977 = vst.msk [vmem:[#allocation2 + $0x48] sm:$0xf] %vm2958_vm11, %v2899_v54 }
 0x3f5   : > { %v2901_v9 = vpop.permute.xlu1 %2900  ;;  %v2903_v29 = vpop.permute.xlu0 %2902 }
 0x3f6   : > { %2978 = vst.msk [vmem:[#allocation2 + $0x4c] sm:$0xf] %vm2958_vm11, %v2901_v9  ;;  %2979 = vst.msk [vmem:[#allocation2 + $0x50] sm:$0xf] %vm2958_vm11, %v2903_v29  ;;  %v8572_v29 = vld [vmem:[#allocation29_spill] sm:$0xff] }
 0x3f9   : > { %v2905_v5 = vpop.permute.xlu1 %2904  ;;  %v2907_v15 = vpop.permute.xlu0 %2906 }
 0x3fa   : > { %2980 = vst.msk [vmem:[#allocation2 + $0x54] sm:$0xf] %vm2958_vm11, %v2905_v5  ;;  %2981 = vst.msk [vmem:[#allocation2 + $0x58] sm:$0xf] %vm2958_vm11, %v2907_v15 }
 0x3fd   : > { %v2909_v35 = vpop.permute.xlu1 %2908  ;;  %v2911_v0 = vpop.permute.xlu0 %2910 }
 0x3fe   : > { %2982 = vst.msk [vmem:[#allocation2 + $0x5c] sm:$0xf] %vm2958_vm11, %v2909_v35  ;;  %2983 = vst.msk [vmem:[#allocation2 + $0x60] sm:$0xf] %vm2958_vm11, %v2911_v0  ;;  %v8573_v0 = vld [vmem:[#allocation33_spill] sm:$0xff] }
 0x401   : > { %v2913_v14 = vpop.permute.xlu1 %2912  ;;  %v2915_v48 = vpop.permute.xlu0 %2914 }
 0x402   : > { %2984 = vst.msk [vmem:[#allocation2 + $0x64] sm:$0xf] %vm2958_vm11, %v2913_v14  ;;  %2985 = vst.msk [vmem:[#allocation2 + $0x68] sm:$0xf] %vm2958_vm11, %v2915_v48 }
 0x405   : > { %v2917_v11 = vpop.permute.xlu1 %2916  ;;  %v2919_v37 = vpop.permute.xlu0 %2918 }
 0x406   : > { %2986 = vst.msk [vmem:[#allocation2 + $0x6c] sm:$0xf] %vm2958_vm11, %v2917_v11  ;;  %2987 = vst.msk [vmem:[#allocation2 + $0x70] sm:$0xf] %vm2958_vm11, %v2919_v37  ;;  %v8574_v37 = vld [vmem:[#allocation34_spill] sm:$0xff] }
 0x409   : > { %v2921_v1 = vpop.permute.xlu1 %2920  ;;  %v2923_v6 = vpop.permute.xlu0 %2922 }
 0x40a   : > { %2988 = vst.msk [vmem:[#allocation2 + $0x74] sm:$0xf] %vm2958_vm11, %v2921_v1  ;;  %2989 = vst.msk [vmem:[#allocation2 + $0x78] sm:$0xf] %vm2958_vm11, %v2923_v6 }
 0x40d   : > { %v2925_v46 = vpop.permute.xlu1 %2924 }
 0x40e   : > { %2990 = vst.msk [vmem:[#allocation2 + $0x7c] sm:$0xf] %vm2958_vm11, %v2925_v46 }
 0x416   : > { %v3089_v7 = vpop.permute.xlu0 %3088 }
 0x417   : > { %vm3183_vm12 = vcmp.eq.s32.totalorder %v3089_v7, 1  ;;  %v8575_v7 = vld [vmem:[#allocation37_spill] sm:$0xff] }
 0x418   : > { %v3215_v55 = vsel %vm3183_vm12, %v8567_v24, 0.0 }
 0x419   : > { %v5416_v39 = vpack.c.bf16 %v3215_v55, %v3215_v55 }
 0x41a   : > { %v3092_v25 = vpop.permute.xlu1 %3091  ;;  %v3098_v59 = vpop.permute.xlu0 %3097 }
 0x41b   : > { %vm3184_vm13 = vcmp.eq.s32.totalorder %v3092_v25, 1  ;;  %vm3186_vm14 = vcmp.eq.s32.totalorder %v3098_v59, 1  ;;  %3343 = vrot.lane.b32.xlu1 %v5416_v39, %s5781_s7  ;;  %v8576_v25 = vld [vmem:[#allocation35_spill] sm:$0xff] }
 0x41c   : > { %v3216_v60 = vsel %vm3184_vm13, %v8568_v32, 0.0  ;;  %v3218_v50 = vsel %vm3186_vm14, %v8569_v49, 0.0 }
 0x41d   : > { %v5417_v63 = vpack.c.bf16 %v3216_v60, %v3216_v60  ;;  %v5419_v10 = vpack.c.bf16 %v3218_v50, %v3218_v50 }
 0x41e   : > { %v3095_v18 = vpop.permute.xlu1 %3094  ;;  %v3104_v22 = vpop.permute.xlu0 %3103 }
 0x41f   : > { %vm3185_vm15 = vcmp.eq.s32.totalorder %v3095_v18, 1  ;;  %vm3188_vm2 = vcmp.eq.s32.totalorder %v3104_v22, 1  ;;  %3345 = vrot.lane.b32.xlu0 %v5417_v63, %s5781_s7  ;;  %v8577_v63 = vld [vmem:[#allocation40_spill] sm:$0xff]  ;;  %v8578_v22 = vld [vmem:[#allocation42_spill] sm:$0xff] }
 0x420   : > { %v3217_v44 = vsel %vm3185_vm15, %v8570_v36, 0.0  ;;  %v3220_v4 = vsel %vm3188_vm2, %v8571_v27, 0.0 }
 0x421   : > { %v5418_v31 = vpack.c.bf16 %v3217_v44, %v3217_v44  ;;  %v5421_v15 = vpack.c.bf16 %v3220_v4, %v3220_v4 }
 0x422   : > { %v3101_v54 = vpop.permute.xlu1 %3100  ;;  %v3110_v9 = vpop.permute.xlu0 %3109 }
 0x423   : > { %vm3187_vm3 = vcmp.eq.s32.totalorder %v3101_v54, 1  ;;  %vm3190_vm4 = vcmp.eq.s32.totalorder %v3110_v9, 1  ;;  %3347 = vrot.lane.b32.xlu1 %v5418_v31, %s5781_s7  ;;  %3349 = vrot.lane.b32.xlu0 %v5419_v10, %s5781_s7  ;;  %v8579_v31 = vld [vmem:[#allocation46_spill] sm:$0xff]  ;;  %v8580_v9 = vld [vmem:[#allocation43_spill] sm:$0xff] }
 0x424   : > { %v3219_v5 = vsel %vm3187_vm3, %v8572_v29, 0.0  ;;  %v3222_v14 = vsel %vm3190_vm4, %v8573_v0, 0.0 }
 0x425   : > { %v5420_v35 = vpack.c.bf16 %v3219_v5, %v3219_v5  ;;  %v5423_v6 = vpack.c.bf16 %v3222_v14, %v3222_v14 }
 0x426   : > { %v3107_v48 = vpop.permute.xlu1 %3106  ;;  %v3116_v11 = vpop.permute.xlu0 %3115 }
 0x427   : > { %vm3189_vm5 = vcmp.eq.s32.totalorder %v3107_v48, 1  ;;  %vm3192_vm6 = vcmp.eq.s32.totalorder %v3116_v11, 1  ;;  %3351 = vrot.lane.b32.xlu1 %v5420_v35, %s5781_s7  ;;  %3353 = vrot.lane.b32.xlu0 %v5421_v15, %s5781_s7  ;;  %v8581_v35 = vld [vmem:[#allocation49_spill] sm:$0xff]  ;;  %v8582_v11 = vld [vmem:[#allocation50_spill] sm:$0xff] }
 0x428   : > { %v3221_v1 = vsel %vm3189_vm5, %v8574_v37, 0.0  ;;  %v3224_v24 = vsel %vm3192_vm6, %v8575_v7, 0.0 }
 0x429   : > { %v5422_v46 = vpack.c.bf16 %v3221_v1, %v3221_v1  ;;  %v5425_v32 = vpack.c.bf16 %v3224_v24, %v3224_v24 }
 0x42a   : > { %v3113_v55 = vpop.permute.xlu1 %3112  ;;  %v3122_v39 = vpop.permute.xlu0 %3121 }
 0x42b   : > { %vm3191_vm7 = vcmp.eq.s32.totalorder %v3113_v55, 1  ;;  %vm3194_vm8 = vcmp.eq.s32.totalorder %v3122_v39, 1  ;;  %3355 = vrot.lane.b32.xlu1 %v5422_v46, %s5781_s7  ;;  %3357 = vrot.lane.b32.xlu0 %v5423_v6, %s5781_s7  ;;  %v8583_v46 = vld [vmem:[#allocation51_spill] sm:$0xff]  ;;  %v8584_v39 = vld [vmem:[#allocation52_spill] sm:$0xff] }
 0x42c   : > { %v3223_v59 = vsel %vm3191_vm7, %v8576_v25, 0.0  ;;  %v3226_v49 = vsel %vm3194_vm8, %v8577_v63, 0.0 }
 0x42d   : > { %v5424_v60 = vpack.c.bf16 %v3223_v59, %v3223_v59  ;;  %v5427_v44 = vpack.c.bf16 %v3226_v49, %v3226_v49 }
 0x42e   : > { %v3119_v50 = vpop.permute.xlu1 %3118  ;;  %v3128_v18 = vpop.permute.xlu0 %3127 }
 0x42f   : > { %vm3193_vm1 = vcmp.eq.s32.totalorder %v3119_v50, 1  ;;  %vm3196_vm0 = vcmp.eq.s32.totalorder %v3128_v18, 1  ;;  %3359 = vrot.lane.b32.xlu1 %v5424_v60, %s5781_s7  ;;  %3361 = vrot.lane.b32.xlu0 %v5425_v32, %s5781_s7  ;;  %v8585_v60 = vld [vmem:[#allocation57_spill] sm:$0xff]  ;;  %v8586_v18 = vld [vmem:[#allocation58_spill] sm:$0xff] }
 0x430   : > { %v3225_v36 = vsel %vm3193_vm1, %v8578_v22, 0.0  ;;  %v3228_v27 = vsel %vm3196_vm0, %v8579_v31, 0.0 }
 0x431   : > { %v5426_v10 = vpack.c.bf16 %v3225_v36, %v3225_v36  ;;  %v5429_v5 = vpack.c.bf16 %v3228_v27, %v3228_v27 }
 0x432   : > { %v3125_v4 = vpop.permute.xlu1 %3124  ;;  %v3134_v54 = vpop.permute.xlu0 %3133 }
 0x433   : > { %vm3195_vm9 = vcmp.eq.s32.totalorder %v3125_v4, 1  ;;  %vm3198_vm10 = vcmp.eq.s32.totalorder %v3134_v54, 1  ;;  %3363 = vrot.lane.b32.xlu1 %v5426_v10, %s5781_s7  ;;  %3365 = vrot.lane.b32.xlu0 %v5427_v44, %s5781_s7  ;;  %v8587_v10 = vld [vmem:[#allocation61_spill] sm:$0xff]  ;;  %v8588_v54 = vld [vmem:[#allocation62_spill] sm:$0xff] }
 0x434   : > { %v3227_v29 = vsel %vm3195_vm9, %v8580_v9, 0.0  ;;  %v3230_v0 = vsel %vm3198_vm10, %v8581_v35, 0.0 }
 0x435   : > { %v5428_v15 = vpack.c.bf16 %v3227_v29, %v3227_v29  ;;  %v5431_v1 = vpack.c.bf16 %v3230_v0, %v3230_v0 }
 0x436   : > { %v3131_v14 = vpop.permute.xlu1 %3130  ;;  %v3140_v48 = vpop.permute.xlu0 %3139 }
 0x437   : > { %vm3197_vm11 = vcmp.eq.s32.totalorder %v3131_v14, 1  ;;  %vm3200_vm12 = vcmp.eq.s32.totalorder %v3140_v48, 1  ;;  %3367 = vrot.lane.b32.xlu1 %v5428_v15, %s5781_s7  ;;  %3369 = vrot.lane.b32.xlu0 %v5429_v5, %s5781_s7  ;;  %v8589_v15 = vld [vmem:[#allocation63_spill] sm:$0xff]  ;;  %v8590_v48 = vld [vmem:[#allocation64_spill] sm:$0xff] }
 0x438   : > { %v3229_v37 = vsel %vm3197_vm11, %v8582_v11, 0.0  ;;  %v3232_v7 = vsel %vm3200_vm12, %v8583_v46, 0.0 }
 0x439   : > { %v5430_v6 = vpack.c.bf16 %v3229_v37, %v3229_v37  ;;  %v5433_v59 = vpack.c.bf16 %v3232_v7, %v3232_v7 }
 0x43a   : > { %v3137_v24 = vpop.permute.xlu1 %3136  ;;  %v3146_v55 = vpop.permute.xlu0 %3145 }
 0x43b   : > { %vm3199_vm13 = vcmp.eq.s32.totalorder %v3137_v24, 1  ;;  %vm3202_vm14 = vcmp.eq.s32.totalorder %v3146_v55, 1  ;;  %3371 = vrot.lane.b32.xlu1 %v5430_v6, %s5781_s7  ;;  %3373 = vrot.lane.b32.xlu0 %v5431_v1, %s5781_s7  ;;  %v8591_v6 = vld [vmem:[#allocation66_spill] sm:$0xff]  ;;  %v8592_v55 = vld [vmem:[#allocation67_spill] sm:$0xff] }
 0x43c   : > { %v3231_v25 = vsel %vm3199_vm13, %v8584_v39, 0.0  ;;  %v3234_v63 = vsel %vm3202_vm14, %v8585_v60, 0.0 }
 0x43d   : > { %v5432_v32 = vpack.c.bf16 %v3231_v25, %v3231_v25  ;;  %v5435_v36 = vpack.c.bf16 %v3234_v63, %v3234_v63 }
 0x43e   : > { %v3143_v49 = vpop.permute.xlu1 %3142  ;;  %v3152_v50 = vpop.permute.xlu0 %3151 }
 0x43f   : > { %vm3201_vm15 = vcmp.eq.s32.totalorder %v3143_v49, 1  ;;  %vm3204_vm2 = vcmp.eq.s32.totalorder %v3152_v50, 1  ;;  %3375 = vrot.lane.b32.xlu1 %v5432_v32, %s5781_s7  ;;  %3377 = vrot.lane.b32.xlu0 %v5433_v59, %s5781_s7  ;;  %v8593_v32 = vld [vmem:[#allocation68_spill] sm:$0xff]  ;;  %v8594_v50 = vld [vmem:[#allocation69_spill] sm:$0xff] }
 0x440   : > { %v3233_v22 = vsel %vm3201_vm15, %v8586_v18, 0.0  ;;  %v3236_v31 = vsel %vm3204_vm2, %v8587_v10, 0.0 }
 0x441   : > { %v5434_v44 = vpack.c.bf16 %v3233_v22, %v3233_v22  ;;  %v5437_v29 = vpack.c.bf16 %v3236_v31, %v3236_v31 }
 0x442   : > { %v3149_v27 = vpop.permute.xlu1 %3148  ;;  %v3158_v4 = vpop.permute.xlu0 %3157 }
 0x443   : > { %vm3203_vm3 = vcmp.eq.s32.totalorder %v3149_v27, 1  ;;  %vm3206_vm4 = vcmp.eq.s32.totalorder %v3158_v4, 1  ;;  %3379 = vrot.lane.b32.xlu1 %v5434_v44, %s5781_s7  ;;  %3381 = vrot.lane.b32.xlu0 %v5435_v36, %s5781_s7  ;;  %v8595_v44 = vld [vmem:[#allocation18_spill] sm:$0xff] }
 0x444   : > { %v3235_v9 = vsel %vm3203_vm3, %v8588_v54, 0.0  ;;  %v3238_v35 = vsel %vm3206_vm4, %v8589_v15, 0.0  ;;  %v8596_v4 = vld [vmem:[#allocation14_spill] sm:$0xff] }
 0x445   : > { %v5436_v5 = vpack.c.bf16 %v3235_v9, %v3235_v9  ;;  %v5439_v37 = vpack.c.bf16 %v3238_v35, %v3238_v35 }
 0x446   : > { %v3155_v0 = vpop.permute.xlu1 %3154  ;;  %v3164_v14 = vpop.permute.xlu0 %3163 }
 0x447   : > { %vm3205_vm5 = vcmp.eq.s32.totalorder %v3155_v0, 1  ;;  %vm3208_vm6 = vcmp.eq.s32.totalorder %v3164_v14, 1  ;;  %3383 = vrot.lane.b32.xlu1 %v5436_v5, %s5781_s7  ;;  %3385 = vrot.lane.b32.xlu0 %v5437_v29, %s5781_s7  ;;  %v8597_v5 = vld [vmem:[#allocation16_spill] sm:$0xff]  ;;  %v3472_v0 = vld [vmem:[%s8281_s3] sm:$0xff]  ;;  %v3473_v14 = vld [vmem:[%s8281_s3 + $0x8] sm:$0xff] }
 0x448   : > { %v3237_v11 = vsel %vm3205_vm5, %v8590_v48, 0.0  ;;  %v3240_v46 = vsel %vm3208_vm6, %v8591_v6, 0.0  ;;  %v8598_v48 = vld [vmem:[#allocation13_spill] sm:$0xff]  ;;  %vm3504_vm12 = vcmp.gt.f32.partialorder %v3472_v0, 0.5  ;;  %vm3505_vm13 = vcmp.gt.f32.partialorder %v3473_v14, 0.5  ;;  %v3474_v6 = vld [vmem:[%s8281_s3 + $0x10] sm:$0xff] }
 0x449   : > { %v5438_v1 = vpack.c.bf16 %v3237_v11, %v3237_v11  ;;  %v5441_v25 = vpack.c.bf16 %v3240_v46, %v3240_v46  ;;  %v3476_v46 = vld [vmem:[%s8281_s3 + $0x20] sm:$0xff]  ;;  %vm3506_vm14 = vcmp.gt.f32.partialorder %v3474_v6, 0.5  ;;  %v3498_v0 = vld [vmem:[%s8281_s3 + $0xd0] sm:$0xff] }
 0x44a   : > { %v3161_v7 = vpop.permute.xlu1 %3160  ;;  %v3170_v24 = vpop.permute.xlu0 %3169  ;;  %vm3508_vm15 = vcmp.gt.f32.partialorder %v3476_v46, 0.5  ;;  %v3493_v46 = vld [vmem:[%s8281_s3 + $0xa8] sm:$0xff] }
 0x44b   : > { %vm3207_vm7 = vcmp.eq.s32.totalorder %v3161_v7, 1  ;;  %vm3210_vm8 = vcmp.eq.s32.totalorder %v3170_v24, 1  ;;  %3387 = vrot.lane.b32.xlu1 %v5438_v1, %s5781_s7  ;;  %3389 = vrot.lane.b32.xlu0 %v5439_v37, %s5781_s7  ;;  %v8599_v7 = vmov 0  }
 0x44c   : > { %v3239_v39 = vsel %vm3207_vm7, %v8592_v55, 0.0  ;;  %v3242_v60 = vsel %vm3210_vm8, %v8593_v32, 0.0  ;;  %v3536_v24 = vsel %vm3504_vm12, 1, %v8599_v7  ;;  %v7601_v55 = vsel %vm3505_vm13, 1, %v8599_v7 }
 0x44d   : > { %v5440_v59 = vpack.c.bf16 %v3239_v39, %v3239_v39  ;;  %v5443_v22 = vpack.c.bf16 %v3242_v60, %v3242_v60  ;;  %v3475_v39 = vld [vmem:[%s8281_s3 + $0x18] sm:$0xff]  ;;  %v7614_v32 = vsel %vm3508_vm15, 1, %v8599_v7  ;;  %v3488_v60 = vld [vmem:[%s8281_s3 + $0x80] sm:$0xff] }
 0x44e   : > { %v3167_v63 = vpop.permute.xlu1 %3166  ;;  %v3176_v49 = vpop.permute.xlu0 %3175  ;;  %vm3507_vm2 = vcmp.gt.f32.partialorder %v3475_v39, 0.5  ;;  %vm3520_vm4 = vcmp.gt.f32.partialorder %v3488_v60, 0.5  ;;  %v3502_v39 = vld [vmem:[%s8281_s3 + $0xf0] sm:$0xff]  ;;  %v3479_v60 = vld [vmem:[%s8281_s3 + $0x38] sm:$0xff] }
 0x44f   : > { %vm3209_vm1 = vcmp.eq.s32.totalorder %v3167_v63, 1  ;;  %vm3212_vm0 = vcmp.eq.s32.totalorder %v3176_v49, 1  ;;  %3391 = vrot.lane.b32.xlu1 %v5440_v59, %s5781_s7  ;;  %3393 = vrot.lane.b32.xlu0 %v5441_v25, %s5781_s7  ;;  %v3489_v25 = vld [vmem:[%s8281_s3 + $0x88] sm:$0xff]  ;;  %v7611_v59 = vsel %vm3506_vm14, 1, %v8599_v7  ;;  %v3491_v63 = vld [vmem:[%s8281_s3 + $0x98] sm:$0xff]  ;;  %v3539_v49 = vsel %vm3507_vm2, 1, %v8599_v7 }
 0x450   : > { %v3241_v18 = vsel %vm3209_vm1, %v8594_v50, 0.0  ;;  %v3244_v10 = vsel %vm3212_vm0, %v8595_v44, 0.0  ;;  %vm3521_vm3 = vcmp.gt.f32.partialorder %v3489_v25, 0.5  ;;  %vm3523_vm5 = vcmp.gt.f32.partialorder %v3491_v63, 0.5 }
 0x451   : > { %v5442_v36 = vpack.c.bf16 %v3241_v18, %v3241_v18  ;;  %v5445_v9 = vpack.c.bf16 %v3244_v10, %v3244_v10  ;;  %v3553_v50 = vsel %vm3521_vm3, 1, %v8599_v7  ;;  %v3490_v18 = vld [vmem:[%s8281_s3 + $0x90] sm:$0xff]  ;;  %v3555_v44 = vsel %vm3523_vm5, 1, %v8599_v7 }
 0x452   : > { %v3173_v31 = vpop.permute.xlu1 %3172  ;;  %v3182_v27 = vpop.permute.xlu0 %3181  ;;  %vm3522_vm6 = vcmp.gt.f32.partialorder %v3490_v18, 0.5  ;;  %v3478_v10 = vld [vmem:[%s8281_s3 + $0x30] sm:$0xff]  ;;  %vm3525_vm14 = vcmp.gt.f32.partialorder %v3493_v46, 0.5  ;;  %vm3534_vm15 = vcmp.gt.f32.partialorder %v3502_v39, 0.5  ;;  %vm3511_vm2 = vcmp.gt.f32.partialorder %v3479_v60, 0.5 }
 0x453   : > { %vm3211_vm9 = vcmp.eq.s32.totalorder %v3173_v31, 1  ;;  %vm3214_vm10 = vcmp.eq.s32.totalorder %v3182_v27, 1  ;;  %3395 = vrot.lane.b32.xlu1 %v5442_v36, %s5781_s7  ;;  %3397 = vrot.lane.b32.xlu0 %v5443_v22, %s5781_s7  ;;  %v3477_v22 = vld [vmem:[%s8281_s3 + $0x28] sm:$0xff]  ;;  %v3552_v36 = vsel %vm3520_vm4, 1, %v8599_v7  ;;  %v7638_v31 = vsel %vm3522_vm6, 1, %v8599_v7 }
 0x454   : > { %v3243_v54 = vsel %vm3211_vm9, %v8596_v4, 0.0  ;;  %v3246_v15 = vsel %vm3214_vm10, %v8597_v5, 0.0  ;;  %vm3509_vm7 = vcmp.gt.f32.partialorder %v3477_v22, 0.5  ;;  %vm3510_vm8 = vcmp.gt.f32.partialorder %v3478_v10, 0.5  ;;  %v3494_v4 = vld [vmem:[%s8281_s3 + $0xb0] sm:$0xff] }
 0x455   : > { %v5444_v29 = vpack.c.bf16 %v3243_v54, %v3243_v54  ;;  %v5447_v37 = vpack.c.bf16 %v3246_v15, %v3246_v15  ;;  %v7641_v27 = vsel %vm3509_vm7, 1, %v8599_v7  ;;  %v7649_v54 = vsel %vm3510_vm8, 1, %v8599_v7  ;;  %v3482_v15 = vld [vmem:[%s8281_s3 + $0x50] sm:$0xff] }
 0x456   : > { %v3179_v35 = vpop.permute.xlu1 %3178  ;;  %vm3526_vm1 = vcmp.gt.f32.partialorder %v3494_v4, 0.5  ;;  %vm3514_vm9 = vcmp.gt.f32.partialorder %v3482_v15, 0.5  ;;  %vm3530_vm10 = vcmp.gt.f32.partialorder %v3498_v0, 0.5  ;;  %v3557_v63 = vsel %vm3525_vm14, 1, %v8599_v7 }
 0x457   : > { %vm3213_vm11 = vcmp.eq.s32.totalorder %v3179_v35, 1  ;;  %3399 = vrot.lane.b32.xlu1 %v5444_v29, %s5781_s7  ;;  %3401 = vrot.lane.b32.xlu0 %v5445_v9, %s5781_s7  ;;  %v3481_v9 = vld [vmem:[%s8281_s3 + $0x48] sm:$0xff]  ;;  %v5782_v29 = vmov 8   ;;  %v7657_v5 = vsel %vm3526_vm1, 1, %v8599_v7  ;;  %v7671_v14 = vsel %vm3514_vm9, 1, %v8599_v7 }
 0x458   : > { %v3245_v11 = vsel %vm3213_vm11, %v8598_v48, 0.0  ;;  %vm3513_vm0 = vcmp.gt.f32.partialorder %v3481_v9, 0.5  ;;  %v3485_v48 = vld [vmem:[%s8281_s3 + $0x68] sm:$0xff]  ;;  %vm3439_vm3 = vcmask 224448   ;;  %v3543_v22 = vsel %vm3511_vm2, 1, %v8599_v7 }
 0x459   : > { %v5446_v1 = vpack.c.bf16 %v3245_v11, %v3245_v11  ;;  %v7664_v35 = vsel %vm3513_vm0, 1, %v8599_v7  ;;  %v7678_v11 = vsel %vm3530_vm10, 1, %v8599_v7  ;;  %vm3517_vm11 = vcmp.gt.f32.partialorder %v3485_v48, 0.5 }
 0x45a   : > { %v7688_v6 = vsel %vm3517_vm11, 1, %v8599_v7 }
 0x45b   : > { %3403 = vrot.lane.b32.xlu1 %v5446_v1, %s5781_s7  ;;  %3405 = vrot.lane.b32.xlu0 %v5447_v37, %s5781_s7  ;;  %v3492_v37 = vld [vmem:[%s8281_s3 + $0xa0] sm:$0xff]  ;;  %v3486_v1 = vld [vmem:[%s8281_s3 + $0x70] sm:$0xff] }
 0x45c   : > { %vm3524_vm12 = vcmp.gt.f32.partialorder %v3492_v37, 0.5  ;;  %vm3518_vm13 = vcmp.gt.f32.partialorder %v3486_v1, 0.5 }
 0x45d   : > { %v7700_v25 = vsel %vm3518_vm13, 1, %v8599_v7 }
 0x45f   : > { %3569 = vperm.xlu1 %5646, %v3536_v24   ;;  %3572 = vperm.xlu0 %5647, %v7601_v55  }
 0x463   : > { %3575 = vperm.xlu1 %5646, %v7611_v59   ;;  %3581 = vperm.xlu0 %5647, %v7614_v32  }
 0x467   : > { %3578 = vperm.xlu1 %5646, %v3539_v49   ;;  %3620 = vperm.xlu0 %5647, %v3553_v50  }
 0x46b   : > { %3617 = vperm.xlu1 %5646, %v3552_v36   ;;  %3626 = vperm.xlu0 %5647, %v3555_v44  }
 0x46f   : > { %3623 = vperm.xlu1 %5646, %v7638_v31   ;;  %3584 = vperm.xlu0 %5647, %v7641_v27  }
 0x473   : > { %5648 = vset.pattern.permute.xlu1 %v5782_v29  ;;  %3587 = vperm.xlu0 %5647, %v7649_v54  }
 0x474   : > { %4050 = vperm.xlu1 %5648, %v3536_v24   ;;  %v3556_v24 = vsel %vm3524_vm12, 1, %v8599_v7 }
 0x477   : > { %3635 = vperm.xlu0 %5647, %v7657_v5  }
 0x478   : > { %4098 = vperm.xlu1 %5648, %v3552_v36  }
 0x47b   : > { %3596 = vperm.xlu0 %5647, %v7664_v35  }
 0x47c   : > { %4101 = vperm.xlu1 %5648, %v3553_v50   ;;  %v3495_v50 = vld [vmem:[%s8281_s3 + $0xb8] sm:$0xff] }
 0x47d   : > { %vm3527_vm4 = vcmp.gt.f32.partialorder %v3495_v50, 0.5 }
 0x47f   : > { %3599 = vperm.xlu0 %5647, %v7671_v14  }
 0x480   : > { %4059 = vperm.xlu1 %5648, %v3539_v49   ;;  %v7708_v49 = vsel %vm3534_vm15, 1, %v8599_v7 }
 0x483   : > { %3647 = vperm.xlu0 %5647, %v7678_v11  }
 0x484   : > { %4107 = vperm.xlu1 %5648, %v3555_v44   ;;  %v3559_v44 = vsel %vm3527_vm4, 1, %v8599_v7 }
 0x487   : > { %3608 = vperm.xlu0 %5647, %v7688_v6  }
 0x488   : > { %5649 = vset.pattern.permute.xlu1 %v5780_v53 }
 0x489   : > { %3629 = vperm.xlu1 %5649, %v3556_v24  }
 0x48b   : > { %3611 = vperm.xlu0 %5647, %v7700_v25  }
 0x48d   : > { %3632 = vperm.xlu1 %5649, %v3557_v63   ;;  %v3344_v18 = vpop.permute.xlu1 %3343 }
 0x48e   : > { %3440 = vst.msk [vmem:[#allocation2] sm:$0xf] %vm3439_vm3, %v3344_v18 }
 0x48f   : > { %3659 = vperm.xlu0 %5647, %v7708_v49  }
 0x491   : > { %3590 = vperm.xlu1 %5649, %v3543_v22   ;;  %v3346_v36 = vpop.permute.xlu0 %3345 }
 0x492   : > { %3441 = vst.msk [vmem:[#allocation2 + $0x4] sm:$0xf] %vm3439_vm3, %v3346_v36  ;;  %v3499_v36 = vld [vmem:[%s8281_s3 + $0xd8] sm:$0xff] }
 0x493   : > { %5654 = vset.pattern.permute.xlu0 %v5782_v29  ;;  %vm3531_vm1 = vcmp.gt.f32.partialorder %v3499_v36, 0.5 }
 0x494   : > { %4053 = vperm.xlu0 %5654, %v7601_v55  }
 0x495   : > { %3638 = vperm.xlu1 %5649, %v3559_v44   ;;  %v3348_v10 = vpop.permute.xlu1 %3347  ;;  %v3350_v4 = vpop.permute.xlu0 %3349 }
 0x496   : > { %3442 = vst.msk [vmem:[#allocation2 + $0x8] sm:$0xf] %vm3439_vm3, %v3348_v10  ;;  %3443 = vst.msk [vmem:[#allocation2 + $0xc] sm:$0xf] %vm3439_vm3, %v3350_v4 }
 0x498   : > { %4056 = vperm.xlu0 %5654, %v7611_v59  }
 0x499   : > { %5650 = vset.pattern.permute.xlu1 %v5782_v29  ;;  %v3352_v9 = vpop.permute.xlu1 %3351  ;;  %v3354_v15 = vpop.permute.xlu0 %3353 }
 0x49a   : > { %3444 = vst.msk [vmem:[#allocation2 + $0x10] sm:$0xf] %vm3439_vm3, %v3352_v9  ;;  %3445 = vst.msk [vmem:[#allocation2 + $0x14] sm:$0xf] %vm3439_vm3, %v3354_v15  ;;  %4065 = vperm.xlu1 %5650, %v7641_v27   ;;  %v3965_v9 = vld [vmem:[%s8281_s3 + $0x60] sm:$0xff]  ;;  %v3563_v15 = vsel %vm3531_vm1, 1, %v8599_v7 }
 0x49b   : > { %vm3997_vm0 = vcmp.gt.f32.partialorder %v3965_v9, 0.5  ;;  %vm4647_vm1 = vcmask 1041408  }
 0x49c   : > { %4104 = vperm.xlu0 %5654, %v7638_v31   ;;  %v3480_v31 = vld [vmem:[%s8281_s3 + $0x40] sm:$0xff] }
 0x49d   : > { %v3356_v55 = vpop.permute.xlu1 %3355  ;;  %v3358_v0 = vpop.permute.xlu0 %3357  ;;  %vm3512_vm5 = vcmp.gt.f32.partialorder %v3480_v31, 0.5 }
 0x49e   : > { %3446 = vst.msk [vmem:[#allocation2 + $0x18] sm:$0xf] %vm3439_vm3, %v3356_v55  ;;  %3447 = vst.msk [vmem:[#allocation2 + $0x1c] sm:$0xf] %vm3439_vm3, %v3358_v0  ;;  %4110 = vperm.xlu1 %5650, %v3556_v24  }
 0x4a0   : > { %4062 = vperm.xlu0 %5654, %v7614_v32   ;;  %v3496_v32 = vld [vmem:[%s8281_s3 + $0xc0] sm:$0xff] }
 0x4a1   : > { %v3360_v59 = vpop.permute.xlu1 %3359  ;;  %v3362_v48 = vpop.permute.xlu0 %3361  ;;  %vm3528_vm6 = vcmp.gt.f32.partialorder %v3496_v32, 0.5 }
 0x4a2   : > { %3448 = vst.msk [vmem:[#allocation2 + $0x20] sm:$0xf] %vm3439_vm3, %v3360_v59  ;;  %3449 = vst.msk [vmem:[#allocation2 + $0x24] sm:$0xf] %vm3439_vm3, %v3362_v48  ;;  %4068 = vperm.xlu1 %5650, %v7649_v54   ;;  %v3544_v54 = vsel %vm3512_vm5, 1, %v8599_v7  ;;  %v3560_v24 = vsel %vm3528_vm6, 1, %v8599_v7 }
 0x4a3   : > { %v3982_v59 = vld [vmem:[%s8281_s3 + $0xe8] sm:$0xff] }
 0x4a4   : > { %4113 = vperm.xlu0 %5654, %v3557_v63   ;;  %v3483_v63 = vld [vmem:[%s8281_s3 + $0x58] sm:$0xff]  ;;  %vm4014_vm9 = vcmp.gt.f32.partialorder %v3982_v59, 0.5 }
 0x4a5   : > { %v3364_v27 = vpop.permute.xlu1 %3363  ;;  %v3366_v37 = vpop.permute.xlu0 %3365  ;;  %vm3515_vm8 = vcmp.gt.f32.partialorder %v3483_v63, 0.5 }
 0x4a6   : > { %3450 = vst.msk [vmem:[#allocation2 + $0x28] sm:$0xf] %vm3439_vm3, %v3364_v27  ;;  %3451 = vst.msk [vmem:[#allocation2 + $0x2c] sm:$0xf] %vm3439_vm3, %v3366_v37  ;;  %4116 = vperm.xlu1 %5650, %v7657_v5   ;;  %v3497_v5 = vld [vmem:[%s8281_s3 + $0xc8] sm:$0xff]  ;;  %v4029_v27 = vsel %vm3997_vm0, 1, %v8599_v7 }
 0x4a7   : > { %vm3529_vm7 = vcmp.gt.f32.partialorder %v3497_v5, 0.5  ;;  %v3968_v37 = vld [vmem:[%s8281_s3 + $0x78] sm:$0xff] }
 0x4a8   : > { %4071 = vperm.xlu0 %5654, %v3543_v22   ;;  %v3561_v50 = vsel %vm3529_vm7, 1, %v8599_v7  ;;  %vm4000_vm10 = vcmp.gt.f32.partialorder %v3968_v37, 0.5 }
 0x4a9   : > { %v3368_v1 = vpop.permute.xlu1 %3367  ;;  %v3370_v46 = vpop.permute.xlu0 %3369 }
 0x4aa   : > { %3452 = vst.msk [vmem:[#allocation2 + $0x30] sm:$0xf] %vm3439_vm3, %v3368_v1  ;;  %3453 = vst.msk [vmem:[#allocation2 + $0x34] sm:$0xf] %vm3439_vm3, %v3370_v46  ;;  %5651 = vset.pattern.permute.xlu1 %v5780_v53  ;;  %v4046_v1 = vsel %vm4014_vm9, 1, %v8599_v7  ;;  %v3984_v46 = vld [vmem:[%s8281_s3 + $0xf8] sm:$0xff] }
 0x4ab   : > { %3593 = vperm.xlu1 %5651, %v3544_v54   ;;  %vm4016_vm11 = vcmp.gt.f32.partialorder %v3984_v46, 0.5 }
 0x4ac   : > { %4119 = vperm.xlu0 %5654, %v3559_v44   ;;  %v3547_v44 = vsel %vm3515_vm8, 1, %v8599_v7 }
 0x4ad   : > { %v3372_v39 = vpop.permute.xlu1 %3371  ;;  %v3374_v60 = vpop.permute.xlu0 %3373 }
 0x4ae   : > { %3454 = vst.msk [vmem:[#allocation2 + $0x38] sm:$0xf] %vm3439_vm3, %v3372_v39  ;;  %3455 = vst.msk [vmem:[#allocation2 + $0x3c] sm:$0xf] %vm3439_vm3, %v3374_v60 }
 0x4af   : > { %3641 = vperm.xlu1 %5651, %v3560_v24  }
 0x4b0   : > { %4074 = vperm.xlu0 %5654, %v3544_v54  }
 0x4b1   : > { %v3376_v18 = vpop.permute.xlu1 %3375  ;;  %v3378_v22 = vpop.permute.xlu0 %3377 }
 0x4b2   : > { %3456 = vst.msk [vmem:[#allocation2 + $0x40] sm:$0xf] %vm3439_vm3, %v3376_v18  ;;  %3457 = vst.msk [vmem:[#allocation2 + $0x44] sm:$0xf] %vm3439_vm3, %v3378_v22 }
 0x4b3   : > { %3644 = vperm.xlu1 %5651, %v3561_v50  }
 0x4b4   : > { %4125 = vperm.xlu0 %5654, %v3561_v50   ;;  %v4048_v50 = vsel %vm4016_vm11, 1, %v8599_v7 }
 0x4b5   : > { %v3380_v10 = vpop.permute.xlu1 %3379  ;;  %v3382_v4 = vpop.permute.xlu0 %3381 }
 0x4b6   : > { %3458 = vst.msk [vmem:[#allocation2 + $0x48] sm:$0xf] %vm3439_vm3, %v3380_v10  ;;  %3459 = vst.msk [vmem:[#allocation2 + $0x4c] sm:$0xf] %vm3439_vm3, %v3382_v4 }
 0x4b7   : > { %3602 = vperm.xlu1 %5651, %v3547_v44  }
 0x4b8   : > { %4083 = vperm.xlu0 %5654, %v3547_v44   ;;  %v8600_v44 = vld [vmem:[#allocation12_spill] sm:$0xff] }
 0x4b9   : > { %v3384_v55 = vpop.permute.xlu1 %3383  ;;  %v3386_v0 = vpop.permute.xlu0 %3385 }
 0x4ba   : > { %3460 = vst.msk [vmem:[#allocation2 + $0x50] sm:$0xf] %vm3439_vm3, %v3384_v55  ;;  %3461 = vst.msk [vmem:[#allocation2 + $0x54] sm:$0xf] %vm3439_vm3, %v3386_v0 }
 0x4bb   : > { %3650 = vperm.xlu1 %5651, %v3563_v15  }
 0x4bc   : > { %4131 = vperm.xlu0 %5654, %v3563_v15  }
 0x4bd   : > { %v3388_v48 = vpop.permute.xlu1 %3387  ;;  %v3390_v31 = vpop.permute.xlu0 %3389 }
 0x4be   : > { %3462 = vst.msk [vmem:[#allocation2 + $0x58] sm:$0xf] %vm3439_vm3, %v3388_v48  ;;  %3463 = vst.msk [vmem:[#allocation2 + $0x5c] sm:$0xf] %vm3439_vm3, %v3390_v31  ;;  %v8602_v48 = vld [vmem:[#allocation17_spill] sm:$0xff] }
 0x4bf   : > { %5652 = vset.pattern.permute.xlu1 %v5782_v29 }
 0x4c0   : > { %4077 = vperm.xlu1 %5652, %v7664_v35   ;;  %4086 = vperm.xlu0 %5654, %v4029_v27   ;;  %v4032_v35 = vsel %vm4000_vm10, 1, %v8599_v7 }
 0x4c1   : > { %v3392_v32 = vpop.permute.xlu1 %3391  ;;  %v3394_v54 = vpop.permute.xlu0 %3393 }
 0x4c2   : > { %3464 = vst.msk [vmem:[#allocation2 + $0x60] sm:$0xf] %vm3439_vm3, %v3392_v32  ;;  %3465 = vst.msk [vmem:[#allocation2 + $0x64] sm:$0xf] %vm3439_vm3, %v3394_v54  ;;  %v8603_v54 = vld [vmem:[#allocation48_spill] sm:$0xff] }
 0x4c4   : > { %4122 = vperm.xlu1 %5652, %v3560_v24   ;;  %4137 = vperm.xlu0 %5654, %v4046_v1   ;;  %v3500_v24 = vld [vmem:[%s8281_s3 + $0xe0] sm:$0xff] }
 0x4c5   : > { %v3396_v5 = vpop.permute.xlu1 %3395  ;;  %v3398_v39 = vpop.permute.xlu0 %3397  ;;  %vm3532_vm12 = vcmp.gt.f32.partialorder %v3500_v24, 0.5 }
 0x4c6   : > { %3466 = vst.msk [vmem:[#allocation2 + $0x68] sm:$0xf] %vm3439_vm3, %v3396_v5  ;;  %3467 = vst.msk [vmem:[#allocation2 + $0x6c] sm:$0xf] %vm3439_vm3, %v3398_v39 }
 0x4c8   : > { %4080 = vperm.xlu1 %5652, %v7671_v14   ;;  %4095 = vperm.xlu0 %5654, %v4032_v35   ;;  %v3564_v14 = vsel %vm3532_vm12, 1, %v8599_v7  ;;  %v8601_v7 = vld [vmem:[#allocation45_spill] sm:$0xff] }
 0x4c9   : > { %v3400_v60 = vpop.permute.xlu1 %3399  ;;  %v3402_v63 = vpop.permute.xlu0 %3401 }
 0x4ca   : > { %3468 = vst.msk [vmem:[#allocation2 + $0x70] sm:$0xf] %vm3439_vm3, %v3400_v60  ;;  %3469 = vst.msk [vmem:[#allocation2 + $0x74] sm:$0xf] %vm3439_vm3, %v3402_v63 }
 0x4cc   : > { %4128 = vperm.xlu1 %5652, %v7678_v11   ;;  %4143 = vperm.xlu0 %5654, %v4048_v50  }
 0x4cd   : > { %v3404_v18 = vpop.permute.xlu1 %3403  ;;  %v3406_v22 = vpop.permute.xlu0 %3405 }
 0x4ce   : > { %3470 = vst.msk [vmem:[#allocation2 + $0x78] sm:$0xf] %vm3439_vm3, %v3404_v18  ;;  %3471 = vst.msk [vmem:[#allocation2 + $0x7c] sm:$0xf] %vm3439_vm3, %v3406_v22  ;;  %v8605_v18 = vld [vmem:[#allocation44_spill] sm:$0xff] }
 0x4d0   : > { %5653 = vset.pattern.permute.xlu1 %v5780_v53 }
 0x4d1   : > { %3605 = vperm.xlu1 %5653, %v4029_v27  }
 0x4d5   : > { %3653 = vperm.xlu1 %5653, %v3564_v14  }
 0x4d9   : > { %3656 = vperm.xlu1 %5653, %v4046_v1  }
 0x4da   : > { %v3570_v11 = vpop.permute.xlu1 %3569  ;;  %v3573_v36 = vpop.permute.xlu0 %3572 }
 0x4db   : > { %vm3665_vm13 = vcmp.eq.s32.totalorder %v3573_v36, 1  ;;  %vm3664_vm3 = vcmp.eq.s32.totalorder %v3570_v11, 1  ;;  %v8606_v36 = vld [vmem:[#allocation15_spill] sm:$0xff] }
 0x4dc   : > { %v3697_v10 = vsel %vm3665_vm13, %v8600_v44, 0.0 }
 0x4dd   : > { %v5449_v4 = vpack.c.bf16 %v3697_v10, %v3697_v10  ;;  %3614 = vperm.xlu1 %5653, %v4032_v35   ;;  %v8604_v35 = vld [vmem:[#allocation11_spill] sm:$0xff] }
 0x4de   : > { %v3576_v9 = vpop.permute.xlu1 %3575  ;;  %v7804_v15 = vpop.permute.xlu0 %3581  ;;  %v3696_v60 = vsel %vm3664_vm3, %v8604_v35, 0.0 }
 0x4df   : > { %3826 = vrot.lane.b32.xlu0 %v5449_v4, %s5783_s8  ;;  %v5448_v24 = vpack.c.bf16 %v3696_v60, %v3696_v60  ;;  %vm3666_vm5 = vcmp.eq.s32.totalorder %v3576_v9, 1  ;;  %vm3668_vm12 = vcmp.eq.s32.totalorder %v7804_v15, 1 }
 0x4e0   : > { %v3698_v44 = vsel %vm3666_vm5, %v8606_v36, 0.0 }
 0x4e1   : > { %3662 = vperm.xlu1 %5653, %v4048_v50   ;;  %v5450_v4 = vpack.c.bf16 %v3698_v44, %v3698_v44 }
 0x4e2   : > { %v3579_v53 = vpop.permute.xlu1 %3578  ;;  %v3621_v55 = vpop.permute.xlu0 %3620 }
 0x4e3   : > { %vm3667_vm14 = vcmp.eq.s32.totalorder %v3579_v53, 1  ;;  %vm3681_vm15 = vcmp.eq.s32.totalorder %v3621_v55, 1  ;;  %v8607_v53 = vld [vmem:[#allocation47_spill] sm:$0xff] }
 0x4e4   : > { %v3713_v0 = vsel %vm3681_vm15, %v8601_v7, 0.0  ;;  %v3699_v31 = vsel %vm3667_vm14, %v8602_v48, 0.0 }
 0x4e5   : > { %v5465_v59 = vpack.c.bf16 %v3713_v0, %v3713_v0  ;;  %5655 = vset.pattern.permute.xlu1 %v5782_v29  ;;  %v5451_v32 = vpack.c.bf16 %v3699_v31, %v3699_v31 }
 0x4e6   : > { %4089 = vperm.xlu1 %5655, %v7688_v6   ;;  %v3618_v27 = vpop.permute.xlu1 %3617  ;;  %v3627_v37 = vpop.permute.xlu0 %3626 }
 0x4e7   : > { %vm3683_vm2 = vcmp.eq.s32.totalorder %v3627_v37, 1  ;;  %3858 = vrot.lane.b32.xlu0 %v5465_v59, %s5783_s8  ;;  %vm3680_vm4 = vcmp.eq.s32.totalorder %v3618_v27, 1 }
 0x4e8   : > { %v3715_v1 = vsel %vm3683_vm2, %v8603_v54, 0.0  ;;  %v3712_v22 = vsel %vm3680_vm4, %v8605_v18, 0.0  ;;  %v5659_v18 = vld [vmem:[%s8279_s1] sm:$0xff]  }
 0x4e9   : > { %v5467_v39 = vpack.c.bf16 %v3715_v1, %v3715_v1  ;;  %v5464_v11 = vpack.c.bf16 %v3712_v22, %v3712_v22 }
 0x4ea   : > { %4134 = vperm.xlu1 %5655, %v3564_v14   ;;  %v3624_v46 = vpop.permute.xlu1 %3623  ;;  %v7813_v5 = vpop.permute.xlu0 %3584 }
 0x4eb   : > { %3830 = vrot.lane.b32.xlu0 %v5451_v32, %s5783_s8  ;;  %vm3682_vm6 = vcmp.eq.s32.totalorder %v3624_v46, 1  ;;  %v5656_v46 = vld [vmem:[%s8279_s1 + $0x10] ss:$0 sps:$4 sm:$0x33]   ;;  %vm3669_vm15 = vcmp.eq.s32.totalorder %v7813_v5, 1 }
 0x4ec   : > { %v3714_v55 = vsel %vm3682_vm6, %v8607_v53, 0.0  ;;  %5576 = vmatprep.subr.msk.bf16.mxu0 %vm4647_vm1, %v5656_v46  ;;  %5577 = vmatprep.subr.msk.bf16.mxu1 %vm4647_vm1, %v5656_v46 }
 0x4ed   : > { %v5466_v0 = vpack.c.bf16 %v3714_v55, %v3714_v55 }
 0x4ee   : > { %4092 = vperm.xlu1 %5655, %v7700_v25   ;;  %v7817_v29 = vpop.permute.xlu0 %3587 }
 0x4ef   : > { %v4051_v6 = vpop.permute.xlu1 %4050  ;;  %3862 = vrot.lane.b32.xlu0 %v5467_v39, %s5783_s8  ;;  %vm3670_vm3 = vcmp.eq.s32.totalorder %v7817_v29, 1 }
 0x4f0   : > { %vm4145_vm7 = vcmp.eq.s32.totalorder %v4051_v6, 1  ;;  %v5657_v6 = vld [vmem:[%s8279_s1 + $0x8] sm:$0xff]  }
 0x4f1   : > { %v4177_v59 = vsel %vm4145_vm7, %v6743_v61, 0.0 }
 0x4f2   : > { %4140 = vperm.xlu1 %5655, %v7708_v49   ;;  %v7822_v63 = vpop.permute.xlu0 %3635  ;;  %v5480_v31 = vpack.c.bf16 %v4177_v59, %v4177_v59 }
 0x4f3   : > { %v4099_v50 = vpop.permute.xlu1 %4098  ;;  %vm3686_vm5 = vcmp.eq.s32.totalorder %v7822_v63, 1 }
 0x4f4   : > { %vm4161_vm8 = vcmp.eq.s32.totalorder %v4099_v50, 1 }
 0x4f5   : > { %v4193_v37 = vsel %vm4161_vm8, %v6838_v43, 0.0  ;;  %v4649_v43 = vsel %vm4647_vm1, %v5656_v46, 0  ;;  %v8610_v46 = vld [vmem:[#allocation53_spill] sm:$0xff] }
 0x4f6   : > { %3824 = vrot.lane.b32.xlu1 %v5448_v24, %s5783_s8  ;;  %v7826_v25 = vpop.permute.xlu0 %3596  ;;  %v5496_v54 = vpack.c.bf16 %v4193_v37, %v4193_v37  ;;  %5533 = vmatpush3.bf16.msra.mxu0 %v4649_v43 }
 0x4f7   : > { %v4102_v14 = vpop.permute.xlu1 %4101  ;;  %5573 = vmatpush3.bf16.msra.mxu1 %v4649_v43  ;;  %5534 = vmatprep.subr.bf16.mxu0 %v5657_v6 }
 0x4f8   : > { %vm4162_vm0 = vcmp.eq.s32.totalorder %v4102_v14, 1  ;;  %5571 = vmatprep.subr.bf16.mxu1 %v5657_v6 }
 0x4f9   : > { %v4194_v22 = vsel %vm4162_vm0, %v6856_v40, 0.0 }
 0x4fa   : > { %3856 = vrot.lane.b32.xlu1 %v5464_v11, %s5783_s8  ;;  %v7830_v10 = vpop.permute.xlu0 %3599  ;;  %5535 = vmatpush3.bf16.msra.mxu0 %v5657_v6 }
 0x4fb   : > { %v4060_v49 = vpop.permute.xlu1 %4059  ;;  %5574 = vmatpush3.bf16.msra.mxu1 %v5657_v6  ;;  %5536 = vmatprep.subr.bf16.mxu0 %v5659_v18 }
 0x4fc   : > { %vm4148_vm10 = vcmp.eq.s32.totalorder %v4060_v49, 1  ;;  %5572 = vmatprep.subr.bf16.mxu1 %v5659_v18 }
 0x4fe   : > { %3828 = vrot.lane.b32.xlu1 %v5450_v4, %s5783_s8  ;;  %v7834_v9 = vpop.permute.xlu0 %3647  ;;  %5537 = vmatpush3.bf16.msra.mxu0 %v5659_v18  ;;  %v4180_v4 = vsel %vm4148_vm10, %v6772_v26, 0.0 }
 0x4ff   : > { %v4108_v7 = vpop.permute.xlu1 %4107  ;;  %5575 = vmatpush3.bf16.msra.mxu1 %v5659_v18  ;;  %v5483_v49 = vpack.c.bf16 %v4180_v4, %v4180_v4 }
 0x500   : > { %vm4164_vm13 = vcmp.eq.s32.totalorder %v4108_v7, 1 }
 0x502   : > { %3860 = vrot.lane.b32.xlu1 %v5466_v0, %s5783_s8  ;;  %v7838_v48 = vpop.permute.xlu0 %3608  ;;  %v8608_v0 = vld [vmem:[#allocation20_spill] sm:$0xff] }
 0x503   : > { %v3700_v59 = vsel %vm3668_vm12, %v8608_v0, 0.0 }
 0x504   : > { %v7840_v27 = vpop.permute.xlu1 %3629  ;;  %v5452_v15 = vpack.c.bf16 %v3700_v59, %v3700_v59 }
 0x505   : > { %vm3684_vm2 = vcmp.eq.s32.totalorder %v7840_v27, 1 }
 0x506   : > { %4305 = vrot.lane.b32.xlu1 %v5480_v31, %s5784_s9  ;;  %v7844_v32 = vpop.permute.xlu0 %3611  ;;  %v4196_v31 = vsel %vm4164_vm13, %v6868_v2, 0.0  ;;  %v3716_v43 = vsel %vm3684_vm2, %v8610_v46, 0.0 }
 0x507   : > { %v5499_v7 = vpack.c.bf16 %v4196_v31, %v4196_v31  ;;  %v5468_v27 = vpack.c.bf16 %v3716_v43, %v3716_v43 }
 0x508   : > { %v7846_v1 = vpop.permute.xlu1 %3632 }
 0x509   : > { %vm3685_vm4 = vcmp.eq.s32.totalorder %v7846_v1, 1 }
 0x50a   : > { %4337 = vrot.lane.b32.xlu1 %v5496_v54, %s5784_s9  ;;  %v7849_v61 = vpop.permute.xlu0 %3659 }
 0x50c   : > { %v7854_v39 = vpop.permute.xlu1 %3590 }
 0x50d   : > { %vm3671_vm6 = vcmp.eq.s32.totalorder %v7854_v39, 1 }
 0x50f   : > { %v4054_v35 = vpop.permute.xlu0 %4053 }
 0x510   : > { %vm4146_vm9 = vcmp.eq.s32.totalorder %v4054_v35, 1  ;;  %v7859_v60 = vpop.permute.xlu1 %3638  ;;  %v8611_v35 = vld [vmem:[#allocation23_spill] sm:$0xff] }
 0x511   : > { %v4178_v50 = vsel %vm4146_vm9, %v6760_v45, 0.0  ;;  %v5497_v45 = vpack.c.bf16 %v4194_v22, %v4194_v22  ;;  %vm3687_vm7 = vcmp.eq.s32.totalorder %v7859_v60, 1 }
 0x512   : > { %v5481_v24 = vpack.c.bf16 %v4178_v50, %v4178_v50  ;;  %v3702_v50 = vsel %vm3670_vm3, %v8611_v35, 0.0  ;;  %vm3674_vm3 = vcmp.eq.s32.totalorder %v7830_v10, 1 }
 0x513   : > { %v4057_v11 = vpop.permute.xlu0 %4056  ;;  %v5454_v29 = vpack.c.bf16 %v3702_v50, %v3702_v50 }
 0x514   : > { %vm4147_vm11 = vcmp.eq.s32.totalorder %v4057_v11, 1  ;;  %4307 = vrot.lane.b32.xlu0 %v5481_v24, %s5784_s9  ;;  %v8612_v24 = vld [vmem:[#allocation54_spill] sm:$0xff] }
 0x515   : > { %v4179_v14 = vsel %vm4147_vm11, %v6753_v19, 0.0  ;;  %v7868_v36 = vpop.permute.xlu1 %4065  ;;  %v3717_v18 = vsel %vm3685_vm4, %v8612_v24, 0.0 }
 0x516   : > { %v5482_v44 = vpack.c.bf16 %v4179_v14, %v4179_v14  ;;  %v5469_v1 = vpack.c.bf16 %v3717_v18, %v3717_v18  ;;  %v8613_v14 = vld [vmem:[#allocation55_spill] sm:$0xff]  ;;  %vm4150_vm1 = vcmp.eq.s32.totalorder %v7868_v36, 1 }
 0x517   : > { %v4105_v53 = vpop.permute.xlu0 %4104 }
 0x518   : > { %vm4163_vm14 = vcmp.eq.s32.totalorder %v4105_v53, 1  ;;  %4339 = vrot.lane.b32.xlu0 %v5497_v45, %s5784_s9  ;;  %4309 = vrot.lane.b32.xlu1 %v5482_v44, %s5784_s9  ;;  %v3718_v45 = vsel %vm3686_vm5, %v8613_v14, 0.0  ;;  %v8614_v44 = vld [vmem:[#allocation25_spill] sm:$0xff]  ;;  %vm3690_vm5 = vcmp.eq.s32.totalorder %v7834_v9, 1 }
 0x519   : > { %v4195_v19 = vsel %vm4163_vm14, %v6848_v51, 0.0  ;;  %v4111_v40 = vpop.permute.xlu1 %4110  ;;  %v8609_v51 = vld [vmem:[#allocation22_spill] sm:$0xff]  ;;  %v3703_v4 = vsel %vm3671_vm6, %v8614_v44, 0.0  ;;  %v5470_v63 = vpack.c.bf16 %v3718_v45, %v3718_v45  ;;  %v8619_v44 = vld [vmem:[#allocation31_spill] sm:$0xff] }
 0x51a   : > { %v5498_v55 = vpack.c.bf16 %v4195_v19, %v4195_v19  ;;  %v3701_v54 = vsel %vm3669_vm15, %v8609_v51, 0.0  ;;  %v5455_v39 = vpack.c.bf16 %v3703_v4, %v3703_v4  ;;  %vm4165_vm0 = vcmp.eq.s32.totalorder %v4111_v40, 1 }
 0x51b   : > { %v4063_v37 = vpop.permute.xlu0 %4062  ;;  %v5453_v5 = vpack.c.bf16 %v3701_v54, %v3701_v54  ;;  %vm3673_vm15 = vcmp.eq.s32.totalorder %v7826_v25, 1  ;;  %v3706_v4 = vsel %vm3674_vm3, %v8619_v44, 0.0  ;;  %v8627_v44 = vld [vmem:[#allocation39_spill] sm:$0xff] }
 0x51c   : > { %4311 = vrot.lane.b32.xlu0 %v5483_v49, %s5784_s9  ;;  %4341 = vrot.lane.b32.xlu1 %v5498_v55, %s5784_s9  ;;  %vm4149_vm8 = vcmp.eq.s32.totalorder %v4063_v37, 1  ;;  %v8615_v49 = vld [vmem:[#allocation56_spill] sm:$0xff]  ;;  %v5458_v10 = vpack.c.bf16 %v3706_v4, %v3706_v4 }
 0x51d   : > { %v4069_v26 = vpop.permute.xlu1 %4068  ;;  %v3719_v55 = vsel %vm3687_vm7, %v8615_v49, 0.0  ;;  %v4181_v0 = vsel %vm4149_vm8, %v6766_v8, 0.0  ;;  %v8621_v49 = vld [vmem:[#allocation65_spill] sm:$0xff] }
 0x51e   : > { %v5471_v60 = vpack.c.bf16 %v3719_v55, %v3719_v55  ;;  %v5484_v31 = vpack.c.bf16 %v4181_v0, %v4181_v0  ;;  %vm4151_vm9 = vcmp.eq.s32.totalorder %v4069_v26, 1  ;;  %v3722_v55 = vsel %vm3690_vm5, %v8621_v49, 0.0  ;;  %v8622_v0 = vld [vmem:[#allocation32_spill] sm:$0xff] }
 0x51f   : > { %v4114_v6 = vpop.permute.xlu0 %4113  ;;  %v4183_v54 = vsel %vm4151_vm9, %v6776_v62, 0.0  ;;  %v5474_v9 = vpack.c.bf16 %v3722_v55, %v3722_v55  ;;  %vm3920_vm9 = vcmask 257248   ;;  %v8630_v55 = vld [vmem:[#allocation41_spill] sm:$0xff] }
 0x520   : > { %4343 = vrot.lane.b32.xlu0 %v5499_v7, %s5784_s9  ;;  %3832 = vrot.lane.b32.xlu1 %v5452_v15, %s5783_s8  ;;  %v4182_v15 = vsel %vm4150_vm1, %v6784_v52, 0.0  ;;  %v4197_v7 = vsel %vm4165_vm0, %v6862_v12, 0.0  ;;  %vm4166_vm10 = vcmp.eq.s32.totalorder %v4114_v6, 1  ;;  %v5486_v52 = vpack.c.bf16 %v4183_v54, %v4183_v54 }
 0x521   : > { %v4117_v2 = vpop.permute.xlu1 %4116  ;;  %v5485_v8 = vpack.c.bf16 %v4182_v15, %v4182_v15  ;;  %v5500_v36 = vpack.c.bf16 %v4197_v7, %v4197_v7  ;;  %v4198_v46 = vsel %vm4166_vm10, %v6880_v21, 0.0 }
 0x522   : > { %vm4167_vm11 = vcmp.eq.s32.totalorder %v4117_v2, 1  ;;  %v5501_v12 = vpack.c.bf16 %v4198_v46, %v4198_v46  ;;  %v8616_v2 = vld [vmem:[#allocation27_spill] sm:$0xff] }
 0x523   : > { %v4072_v22 = vpop.permute.xlu0 %4071  ;;  %v4199_v6 = vsel %vm4167_vm11, %v6872_v38, 0.0 }
 0x524   : > { %3834 = vrot.lane.b32.xlu0 %v5453_v5, %s5783_s8  ;;  %3864 = vrot.lane.b32.xlu1 %v5468_v27, %s5783_s8  ;;  %vm4152_vm12 = vcmp.eq.s32.totalorder %v4072_v22, 1  ;;  %v5502_v62 = vpack.c.bf16 %v4199_v6, %v4199_v6  ;;  %v8617_v22 = vld [vmem:[#allocation28_spill] sm:$0xff] }
 0x525   : > { %v4184_v5 = vsel %vm4152_vm12, %v6796_v16, 0.0 }
 0x526   : > { %v3594_v11 = vpop.permute.xlu1 %3593  ;;  %v5487_v21 = vpack.c.bf16 %v4184_v5, %v4184_v5 }
 0x527   : > { %v4120_v53 = vpop.permute.xlu0 %4119  ;;  %vm3672_vm13 = vcmp.eq.s32.totalorder %v3594_v11, 1 }
 0x528   : > { %3866 = vrot.lane.b32.xlu0 %v5469_v1, %s5783_s8  ;;  %3836 = vrot.lane.b32.xlu1 %v5454_v29, %s5783_s8  ;;  %vm4168_vm14 = vcmp.eq.s32.totalorder %v4120_v53, 1  ;;  %v3704_v35 = vsel %vm3672_vm13, %v8616_v2, 0.0  ;;  %v3705_v29 = vsel %vm3673_vm15, %v8617_v22, 0.0  ;;  %v8618_v1 = vld [vmem:[#allocation59_spill] sm:$0xff]  ;;  %v8620_v53 = vld [vmem:[#allocation60_spill] sm:$0xff] }
 0x529   : > { %v4200_v50 = vsel %vm4168_vm14, %v6891_v56, 0.0  ;;  %v5456_v38 = vpack.c.bf16 %v3704_v35, %v3704_v35  ;;  %v5457_v25 = vpack.c.bf16 %v3705_v29, %v3705_v29  ;;  %v8625_v29 = vld [vmem:[#allocation38_spill] sm:$0xff] }
 0x52a   : > { %v3642_v19 = vpop.permute.xlu1 %3641  ;;  %v5503_v16 = vpack.c.bf16 %v4200_v50, %v4200_v50 }
 0x52b   : > { %v7900_v59 = vpop.permute.xlu0 %4074  ;;  %vm3688_vm2 = vcmp.eq.s32.totalorder %v3642_v19, 1 }
 0x52c   : > { %3838 = vrot.lane.b32.xlu0 %v5455_v39, %s5783_s8  ;;  %3868 = vrot.lane.b32.xlu1 %v5470_v63, %s5783_s8  ;;  %v3720_v11 = vsel %vm3688_vm2, %v8618_v1, 0.0  ;;  %vm4153_vm7 = vcmp.eq.s32.totalorder %v7900_v59, 1  ;;  %vm3677_vm2 = vcmp.eq.s32.totalorder %v7838_v48, 1 }
 0x52d   : > { %v5472_v45 = vpack.c.bf16 %v3720_v11, %v3720_v11  ;;  %v4185_v7 = vsel %vm4153_vm7, %v6790_v47, 0.0  ;;  %v3709_v1 = vsel %vm3677_vm2, %v8625_v29, 0.0  ;;  %v8626_v11 = vld [vmem:[#allocation9_spill] sm:$0xff]  ;;  %vm4401_vm2 = vcmask 290048  }
 0x52e   : > { %v3645_v37 = vpop.permute.xlu1 %3644  ;;  %v5488_v59 = vpack.c.bf16 %v4185_v7, %v4185_v7 }
 0x52f   : > { %v7907_v51 = vpop.permute.xlu0 %4125  ;;  %vm3689_vm4 = vcmp.eq.s32.totalorder %v3645_v37, 1 }
 0x530   : > { %3870 = vrot.lane.b32.xlu0 %v5471_v60, %s5783_s8  ;;  %4313 = vrot.lane.b32.xlu1 %v5484_v31, %s5784_s9  ;;  %v3721_v63 = vsel %vm3689_vm4, %v8620_v53, 0.0  ;;  %vm4170_vm10 = vcmp.eq.s32.totalorder %v7907_v51, 1  ;;  %vm3678_vm4 = vcmp.eq.s32.totalorder %v7844_v32, 1  ;;  %v8628_v53 = vld [vmem:[#allocation7_spill] sm:$0xff] }
 0x531   : > { %v5473_v19 = vpack.c.bf16 %v3721_v63, %v3721_v63  ;;  %v3710_v4 = vsel %vm3678_vm4, %v8627_v44, 0.0 }
 0x532   : > { %v3603_v40 = vpop.permute.xlu1 %3602 }
 0x533   : > { %v7913_v43 = vpop.permute.xlu0 %4083  ;;  %vm3675_vm6 = vcmp.eq.s32.totalorder %v3603_v40, 1 }
 0x534   : > { %4315 = vrot.lane.b32.xlu0 %v5485_v8, %s5784_s9  ;;  %4345 = vrot.lane.b32.xlu1 %v5500_v36, %s5784_s9  ;;  %v3707_v60 = vsel %vm3675_vm6, %v8622_v0, 0.0  ;;  %v8623_v8 = vld [vmem:[#allocation8_spill] sm:$0xff]  ;;  %vm4156_vm12 = vcmp.eq.s32.totalorder %v7913_v43, 1  ;;  %vm3694_vm6 = vcmp.eq.s32.totalorder %v7849_v61, 1 }
 0x535   : > { %v5459_v15 = vpack.c.bf16 %v3707_v60, %v3707_v60  ;;  %v4188_v2 = vsel %vm4156_vm12, %v6820_v20, 0.0 }
 0x536   : > { %v3651_v26 = vpop.permute.xlu1 %3650  ;;  %v5491_v43 = vpack.c.bf16 %v4188_v2, %v4188_v2 }
 0x537   : > { %v7919_v27 = vpop.permute.xlu0 %4131  ;;  %vm3691_vm8 = vcmp.eq.s32.totalorder %v3651_v26, 1 }
 0x538   : > { %4317 = vrot.lane.b32.xlu1 %v5486_v52, %s5784_s9  ;;  %4347 = vrot.lane.b32.xlu0 %v5501_v12, %s5784_s9  ;;  %v3723_v36 = vsel %vm3691_vm8, %v8623_v8, 0.0  ;;  %vm4172_vm14 = vcmp.eq.s32.totalorder %v7919_v27, 1 }
 0x539   : > { %v5475_v46 = vpack.c.bf16 %v3723_v36, %v3723_v36 }
 0x53b   : > { %v4078_v24 = vpop.permute.xlu1 %4077  ;;  %v7925_v18 = vpop.permute.xlu0 %4086 }
 0x53c   : > { %4349 = vrot.lane.b32.xlu1 %v5502_v62, %s5784_s9  ;;  %4319 = vrot.lane.b32.xlu0 %v5487_v21, %s5784_s9  ;;  %vm4154_vm1 = vcmp.eq.s32.totalorder %v4078_v24, 1  ;;  %v4202_v62 = vsel %vm4170_vm10, %v6903_v23, 0.0  ;;  %v4204_v24 = vsel %vm4172_vm14, %v6687_v57, 0.0  ;;  %vm4157_vm8 = vcmp.eq.s32.totalorder %v7925_v18, 1 }
 0x53d   : > { %v4186_v52 = vsel %vm4154_vm1, %v6808_v13, 0.0  ;;  %v5505_v51 = vpack.c.bf16 %v4202_v62, %v4202_v62  ;;  %v5507_v27 = vpack.c.bf16 %v4204_v24, %v4204_v24  ;;  %v8633_v62 = vld [vmem:[#allocation86_spill] sm:$0xff] }
 0x53e   : > { %v5489_v6 = vpack.c.bf16 %v4186_v52, %v4186_v52 }
 0x53f   : > { %v4123_v14 = vpop.permute.xlu1 %4122  ;;  %v7935_v56 = vpop.permute.xlu0 %4137 }
 0x540   : > { %3840 = vrot.lane.b32.xlu1 %v5456_v38, %s5783_s8  ;;  %4351 = vrot.lane.b32.xlu0 %v5503_v16, %s5784_s9  ;;  %vm4169_vm0 = vcmp.eq.s32.totalorder %v4123_v14, 1  ;;  %v8624_v38 = vld [vmem:[#allocation36_spill] sm:$0xff] }
 0x541   : > { %v4201_v12 = vsel %vm4169_vm0, %v6884_v3, 0.0 }
 0x542   : > { %v5504_v5 = vpack.c.bf16 %v4201_v12, %v4201_v12 }
 0x543   : > { %v4081_v39 = vpop.permute.xlu1 %4080  ;;  %v7944_v31 = vpop.permute.xlu0 %4095 }
 0x544   : > { %3872 = vrot.lane.b32.xlu1 %v5472_v45, %s5783_s8  ;;  %3842 = vrot.lane.b32.xlu0 %v5457_v25, %s5783_s8  ;;  %vm4155_vm11 = vcmp.eq.s32.totalorder %v4081_v39, 1  ;;  %v5461_v25 = vpack.c.bf16 %v3709_v1, %v3709_v1  ;;  %v5462_v39 = vpack.c.bf16 %v3710_v4, %v3710_v4 }
 0x545   : > { %v4187_v13 = vsel %vm4155_vm11, %v6800_v41, 0.0  ;;  %vm4174_vm11 = vcmp.eq.s32.totalorder %v7935_v56, 1 }
 0x546   : > { %v5490_v21 = vpack.c.bf16 %v4187_v13, %v4187_v13  ;;  %v4206_v12 = vsel %vm4174_vm11, %v8557_v33, 0.0 }
 0x547   : > { %v4129_v37 = vpop.permute.xlu1 %4128  ;;  %v7953_v54 = vpop.permute.xlu0 %4143 }
 0x548   : > { %3844 = vrot.lane.b32.xlu1 %v5458_v10, %s5783_s8  ;;  %3874 = vrot.lane.b32.xlu0 %v5473_v19, %s5783_s8  ;;  %vm4171_vm13 = vcmp.eq.s32.totalorder %v4129_v37, 1  ;;  %v8629_v19 = vld [vmem:[#allocation6_spill] sm:$0xff] }
 0x549   : > { %v4203_v35 = vsel %vm4171_vm13, %v6897_v17, 0.0  ;;  %v3726_v49 = vsel %vm3694_vm6, %v8629_v19, 0.0  ;;  %vm4160_vm13 = vcmp.eq.s32.totalorder %v7944_v31, 1 }
 0x54a   : > { %v5506_v50 = vpack.c.bf16 %v4203_v35, %v4203_v35  ;;  %v5478_v60 = vpack.c.bf16 %v3726_v49, %v3726_v49 }
 0x54c   : > { %v3606_v40 = vpop.permute.xlu1 %3605  ;;  %3876 = vrot.lane.b32.xlu1 %v5474_v9, %s5783_s8  ;;  %3846 = vrot.lane.b32.xlu0 %v5459_v15, %s5783_s8  ;;  %v4189_v9 = vsel %vm4157_vm8, %v6814_v34, 0.0  ;;  %v8631_v15 = vld [vmem:[#allocation10_spill] sm:$0xff] }
 0x54d   : > { %vm3676_vm15 = vcmp.eq.s32.totalorder %v3606_v40, 1  ;;  %v5492_v18 = vpack.c.bf16 %v4189_v9, %v4189_v9 }
 0x54e   : > { %v3708_v16 = vsel %vm3676_vm15, %v8624_v38, 0.0  ;;  %vm4176_vm15 = vcmp.eq.s32.totalorder %v7953_v54, 1 }
 0x54f   : > { %v5460_v22 = vpack.c.bf16 %v3708_v16, %v3708_v16  ;;  %v4208_v13 = vsel %vm4176_vm15, %v8633_v62, 0.0 }
 0x550   : > { %v3654_v47 = vpop.permute.xlu1 %3653  ;;  %3878 = vrot.lane.b32.xlu0 %v5475_v46, %s5783_s8  ;;  %4321 = vrot.lane.b32.xlu1 %v5488_v59, %s5784_s9 }
 0x551   : > { %v3827_v26 = vpop.permute.xlu0 %3826  ;;  %vm3692_vm3 = vcmp.eq.s32.totalorder %v3654_v47, 1 }
 0x552   : > { %3922 = vst.msk [vmem:[#allocation2 + $0x4] sm:$0xf] %vm3920_vm9, %v3827_v26  ;;  %v3724_v14 = vsel %vm3692_vm3, %v8626_v11, 0.0  ;;  %v4192_v26 = vsel %vm4160_vm13, %v6844_v30, 0.0  ;;  %vm4598_vm3 = vcmask 293888  }
 0x553   : > { %v5476_v45 = vpack.c.bf16 %v3724_v14, %v3724_v14  ;;  %v5495_v33 = vpack.c.bf16 %v4192_v26, %v4192_v26 }
 0x554   : > { %v3657_v3 = vpop.permute.xlu1 %3656  ;;  %4323 = vrot.lane.b32.xlu0 %v5489_v6, %s5784_s9  ;;  %4353 = vrot.lane.b32.xlu1 %v5504_v5, %s5784_s9  ;;  %v8632_v6 = vld [vmem:[#allocation85_spill] sm:$0xff] }
 0x555   : > { %vm3693_vm5 = vcmp.eq.s32.totalorder %v3657_v3, 1  ;;  %v5511_v3 = vpack.c.bf16 %v4208_v13, %v4208_v13 }
 0x556   : > { %v3725_v63 = vsel %vm3693_vm5, %v8628_v53, 0.0 }
 0x557   : > { %v5477_v10 = vpack.c.bf16 %v3725_v63, %v3725_v63 }
 0x558   : > { %v3615_v23 = vpop.permute.xlu1 %3614  ;;  %4325 = vrot.lane.b32.xlu1 %v5490_v21, %s5784_s9  ;;  %4355 = vrot.lane.b32.xlu0 %v5505_v51, %s5784_s9 }
 0x559   : > { %v3859_v41 = vpop.permute.xlu0 %3858  ;;  %vm3679_vm7 = vcmp.eq.s32.totalorder %v3615_v23, 1 }
 0x55a   : > { %3938 = vst.msk [vmem:[#allocation2 + $0x44] sm:$0xf] %vm3920_vm9, %v3859_v41  ;;  %v3711_v0 = vsel %vm3679_vm7, %v8630_v55, 0.0 }
 0x55b   : > { %v5463_v37 = vpack.c.bf16 %v3711_v0, %v3711_v0 }
 0x55c   : > { %v3663_v20 = vpop.permute.xlu1 %3662  ;;  %4357 = vrot.lane.b32.xlu1 %v5506_v50, %s5784_s9  ;;  %4327 = vrot.lane.b32.xlu0 %v5491_v43, %s5784_s9 }
 0x55d   : > { %v3831_v17 = vpop.permute.xlu0 %3830  ;;  %vm3695_vm1 = vcmp.eq.s32.totalorder %v3663_v20, 1 }
 0x55e   : > { %3924 = vst.msk [vmem:[#allocation2 + $0xc] sm:$0xf] %vm3920_vm9, %v3831_v17  ;;  %v3727_v7 = vsel %vm3695_vm1, %v8631_v15, 0.0 }
 0x55f   : > { %v5479_v36 = vpack.c.bf16 %v3727_v7, %v3727_v7 }
 0x560   : > { %3848 = vrot.lane.b32.xlu1 %v5460_v22, %s5783_s8  ;;  %4359 = vrot.lane.b32.xlu0 %v5507_v27, %s5784_s9 }
 0x561   : > { %v4090_v57 = vpop.permute.xlu1 %4089  ;;  %v3863_v48 = vpop.permute.xlu0 %3862 }
 0x562   : > { %3940 = vst.msk [vmem:[#allocation2 + $0x4c] sm:$0xf] %vm3920_vm9, %v3863_v48  ;;  %vm4158_vm0 = vcmp.eq.s32.totalorder %v4090_v57, 1 }
 0x563   : > { %v4190_v40 = vsel %vm4158_vm0, %v6832_v58, 0.0 }
 0x564   : > { %3880 = vrot.lane.b32.xlu1 %v5476_v45, %s5783_s8  ;;  %3850 = vrot.lane.b32.xlu0 %v5461_v25, %s5783_s8  ;;  %v5493_v46 = vpack.c.bf16 %v4190_v40, %v4190_v40 }
 0x565   : > { %v4135_v32 = vpop.permute.xlu1 %4134 }
 0x566   : > { %vm4173_vm10 = vcmp.eq.s32.totalorder %v4135_v32, 1 }
 0x567   : > { %v4205_v59 = vsel %vm4173_vm10, %v8556_v42, 0.0  ;;  %v5509_v42 = vpack.c.bf16 %v4206_v12, %v4206_v12 }
 0x568   : > { %3852 = vrot.lane.b32.xlu1 %v5462_v39, %s5783_s8  ;;  %3882 = vrot.lane.b32.xlu0 %v5477_v10, %s5783_s8  ;;  %v5508_v52 = vpack.c.bf16 %v4205_v59, %v4205_v59 }
 0x569   : > { %v4093_v61 = vpop.permute.xlu1 %4092 }
 0x56a   : > { %vm4159_vm12 = vcmp.eq.s32.totalorder %v4093_v61, 1 }
 0x56b   : > { %v4191_v47 = vsel %vm4159_vm12, %v6824_v28, 0.0 }
 0x56c   : > { %3884 = vrot.lane.b32.xlu1 %v5478_v60, %s5783_s8  ;;  %3854 = vrot.lane.b32.xlu0 %v5463_v37, %s5783_s8  ;;  %v5494_v56 = vpack.c.bf16 %v4191_v47, %v4191_v47 }
 0x56d   : > { %v4141_v8 = vpop.permute.xlu1 %4140 }
 0x56e   : > { %vm4175_vm14 = vcmp.eq.s32.totalorder %v4141_v8, 1 }
 0x56f   : > { %v4207_v5 = vsel %vm4175_vm14, %v8632_v6, 0.0 }
 0x570   : > { %3886 = vrot.lane.b32.xlu0 %v5479_v36, %s5783_s8  ;;  %4329 = vrot.lane.b32.xlu1 %v5492_v18, %s5784_s9  ;;  %v5510_v31 = vpack.c.bf16 %v4207_v5, %v4207_v5 }
 0x571   : > { %v3825_v34 = vpop.permute.xlu1 %3824 }
 0x572   : > { %3921 = vst.msk [vmem:[#allocation2] sm:$0xf] %vm3920_vm9, %v3825_v34 }
 0x574   : > { %4331 = vrot.lane.b32.xlu0 %v5493_v46, %s5784_s9  ;;  %4361 = vrot.lane.b32.xlu1 %v5508_v52, %s5784_s9 }
 0x575   : > { %v3857_v58 = vpop.permute.xlu1 %3856 }
 0x576   : > { %3937 = vst.msk [vmem:[#allocation2 + $0x40] sm:$0xf] %vm3920_vm9, %v3857_v58 }
 0x578   : > { %4333 = vrot.lane.b32.xlu1 %v5494_v56, %s5784_s9  ;;  %4363 = vrot.lane.b32.xlu0 %v5509_v42, %s5784_s9 }
 0x579   : > { %v3829_v28 = vpop.permute.xlu1 %3828 }
 0x57a   : > { %3923 = vst.msk [vmem:[#allocation2 + $0x8] sm:$0xf] %vm3920_vm9, %v3829_v28 }
 0x57c   : > { %4365 = vrot.lane.b32.xlu1 %v5510_v31, %s5784_s9  ;;  %4335 = vrot.lane.b32.xlu0 %v5495_v33, %s5784_s9 }
 0x57d   : > { %v3861_v30 = vpop.permute.xlu1 %3860 }
 0x57e   : > { %3939 = vst.msk [vmem:[#allocation2 + $0x48] sm:$0xf] %vm3920_vm9, %v3861_v30 }
 0x580   : > { %4367 = vrot.lane.b32.xlu0 %v5511_v3, %s5784_s9 }
 0x581   : > { %v4306_v54 = vpop.permute.xlu1 %4305 }
 0x582   : > { %4402 = vst.msk [vmem:[#allocation2] sm:$0xf] %vm4401_vm2, %v4306_v54 }
 0x585   : > { %v4338_v51 = vpop.permute.xlu1 %4337 }
 0x586   : > { %4418 = vst.msk [vmem:[#allocation2 + $0x40] sm:$0xf] %vm4401_vm2, %v4338_v51  ;;  %v4308_v21 = vpop.permute.xlu0 %4307 }
 0x587   : > { %4403 = vst.msk [vmem:[#allocation2 + $0x4] sm:$0xf] %vm4401_vm2, %v4308_v21 }
 0x58a   : > { %v4310_v2 = vpop.permute.xlu1 %4309  ;;  %v4340_v35 = vpop.permute.xlu0 %4339 }
 0x58b   : > { %4404 = vst.msk [vmem:[#allocation2 + $0x8] sm:$0xf] %vm4401_vm2, %v4310_v2  ;;  %4419 = vst.msk [vmem:[#allocation2 + $0x44] sm:$0xf] %vm4401_vm2, %v4340_v35 }
 0x58e   : > { %v4342_v23 = vpop.permute.xlu1 %4341  ;;  %v4312_v41 = vpop.permute.xlu0 %4311  ;;  %v5658_v43 = vld [vmem:[#allocation2] sm:$0xff]  }
 0x58f   : > { %4420 = vst.msk [vmem:[#allocation2 + $0x48] sm:$0xf] %vm4401_vm2, %v4342_v23  ;;  %4405 = vst.msk [vmem:[#allocation2 + $0xc] sm:$0xf] %vm4401_vm2, %v4312_v41  ;;  %5538 = vmatprep.mubr.msk.bf16.mxu0 %vm4598_vm3, %v5658_v43 }
 0x592   : > { %v3833_v50 = vpop.permute.xlu1 %3832  ;;  %v4344_v24 = vpop.permute.xlu0 %4343  ;;  %v5660_v38 = vld [vmem:[#allocation2 + $0x40] sm:$0xff]  }
 0x593   : > { %3925 = vst.msk [vmem:[#allocation2 + $0x10] sm:$0xf] %vm3920_vm9, %v3833_v50  ;;  %5554 = vmatprep.mubr.msk.bf16.mxu1 %vm4598_vm3, %v5660_v38  ;;  %v4473_v50 = vld [vmem:[%s8280_s2 + $0x10] sm:$0xff]  ;;  %v4471_v38 = vld [vmem:[%s8280_s2] sm:$0xff] }
 0x594   : > { %4421 = vst.msk [vmem:[#allocation2 + $0x4c] sm:$0xf] %vm4401_vm2, %v4344_v24 }
 0x596   : > { %v3865_v16 = vpop.permute.xlu1 %3864  ;;  %v3835_v20 = vpop.permute.xlu0 %3834  ;;  %v5661_v17 = vld [vmem:[#allocation2 + $0x8] sm:$0xff]  }
 0x597   : > { %3941 = vst.msk [vmem:[#allocation2 + $0x50] sm:$0xf] %vm3920_vm9, %v3865_v16  ;;  %3926 = vst.msk [vmem:[#allocation2 + $0x14] sm:$0xf] %vm3920_vm9, %v3835_v20  ;;  %5539 = vmatmul.mubr.msk.bf16.vlgmr.msra.gmra.mxu0 %vm4598_vm3, %v5661_v17  ;;  %v4474_v17 = vld [vmem:[%s8280_s2 + $0x18] sm:$0xff] }
 0x59a   : > { %v3837_v27 = vpop.permute.xlu1 %3836  ;;  %v3867_v22 = vpop.permute.xlu0 %3866 }
 0x59b   : > { %v5662_v29 = vld [vmem:[#allocation2 + $0x48] sm:$0xff]   ;;  %3927 = vst.msk [vmem:[#allocation2 + $0x18] sm:$0xf] %vm3920_vm9, %v3837_v27  ;;  %3942 = vst.msk [vmem:[#allocation2 + $0x54] sm:$0xf] %vm3920_vm9, %v3867_v22  ;;  %v4489_v27 = vld [vmem:[%s8280_s2 + $0x90] sm:$0xff] }
 0x59c   : > { %5555 = vmatmul.mubr.msk.bf16.vlgmr.msra.gmra.mxu1 %vm4598_vm3, %v5662_v29 }
 0x59e   : > { %v3869_v1 = vpop.permute.xlu1 %3868  ;;  %v3839_v11 = vpop.permute.xlu0 %3838 }
 0x59f   : > { %3943 = vst.msk [vmem:[#allocation2 + $0x58] sm:$0xf] %vm3920_vm9, %v3869_v1  ;;  %3928 = vst.msk [vmem:[#allocation2 + $0x1c] sm:$0xf] %vm3920_vm9, %v3839_v11 }
 0x5a2   : > { %v4314_v14 = vpop.permute.xlu1 %4313  ;;  %v3871_v57 = vpop.permute.xlu0 %3870 }
 0x5a3   : > { %4406 = vst.msk [vmem:[#allocation2 + $0x10] sm:$0xf] %vm4401_vm2, %v4314_v14  ;;  %v4472_v14 = vld [vmem:[%s8280_s2 + $0x8] sm:$0xff] }
 0x5a4   : > { %3944 = vst.msk [vmem:[#allocation2 + $0x5c] sm:$0xf] %vm3920_vm9, %v3871_v57  ;;  %v4487_v57 = vld [vmem:[%s8280_s2 + $0x80] sm:$0xff] }
 0x5a6   : > { %v4346_v48 = vpop.permute.xlu1 %4345  ;;  %v4316_v25 = vpop.permute.xlu0 %4315 }
 0x5a7   : > { %4422 = vst.msk [vmem:[#allocation2 + $0x50] sm:$0xf] %vm4401_vm2, %v4346_v48  ;;  %4407 = vst.msk [vmem:[#allocation2 + $0x14] sm:$0xf] %vm4401_vm2, %v4316_v25 }
 0x5aa   : > { %v4318_v45 = vpop.permute.xlu1 %4317  ;;  %v4348_v44 = vpop.permute.xlu0 %4347 }
 0x5ab   : > { %4408 = vst.msk [vmem:[#allocation2 + $0x18] sm:$0xf] %vm4401_vm2, %v4318_v45  ;;  %4423 = vst.msk [vmem:[#allocation2 + $0x54] sm:$0xf] %vm4401_vm2, %v4348_v44 }
 0x5ae   : > { %v4350_v4 = vpop.permute.xlu1 %4349  ;;  %v4320_v53 = vpop.permute.xlu0 %4319  ;;  %v5663_v63 = vld [vmem:[#allocation2 + $0x10] sm:$0xff]  }
 0x5af   : > { %4424 = vst.msk [vmem:[#allocation2 + $0x58] sm:$0xf] %vm4401_vm2, %v4350_v4  ;;  %4409 = vst.msk [vmem:[#allocation2 + $0x1c] sm:$0xf] %vm4401_vm2, %v4320_v53  ;;  %5542 = vmatprep.mubr.msk.bf16.mxu0 %vm4598_vm3, %v5663_v63  ;;  %v4490_v53 = vld [vmem:[%s8280_s2 + $0x98] sm:$0xff] }
 0x5b2   : > { %v3841_v32 = vpop.permute.xlu1 %3840  ;;  %v4352_v39 = vpop.permute.xlu0 %4351  ;;  %v5664_v10 = vld [vmem:[#allocation2 + $0x50] sm:$0xff]  }
 0x5b3   : > { %3929 = vst.msk [vmem:[#allocation2 + $0x20] sm:$0xf] %vm3920_vm9, %v3841_v32  ;;  %5558 = vmatprep.mubr.msk.bf16.mxu1 %vm4598_vm3, %v5664_v10 }
 0x5b4   : > { %4425 = vst.msk [vmem:[#allocation2 + $0x5c] sm:$0xf] %vm4401_vm2, %v4352_v39 }
 0x5b6   : > { %v3873_v19 = vpop.permute.xlu1 %3872  ;;  %v3843_v49 = vpop.permute.xlu0 %3842  ;;  %v5665_v55 = vld [vmem:[#allocation2 + $0x18] sm:$0xff]  }
 0x5b7   : > { %3945 = vst.msk [vmem:[#allocation2 + $0x60] sm:$0xf] %vm3920_vm9, %v3873_v19  ;;  %3930 = vst.msk [vmem:[#allocation2 + $0x24] sm:$0xf] %vm3920_vm9, %v3843_v49  ;;  %5543 = vmatmul.mubr.msk.bf16.gmra.mxu0 %vm4598_vm3, %v5665_v55  ;;  %v4488_v49 = vld [vmem:[%s8280_s2 + $0x88] sm:$0xff] }
 0x5ba   : > { %v3845_v0 = vpop.permute.xlu1 %3844  ;;  %v3875_v61 = vpop.permute.xlu0 %3874 }
 0x5bb   : > { %v5666_v60 = vld [vmem:[#allocation2 + $0x58] sm:$0xff]   ;;  %3931 = vst.msk [vmem:[#allocation2 + $0x28] sm:$0xf] %vm3920_vm9, %v3845_v0  ;;  %3946 = vst.msk [vmem:[#allocation2 + $0x64] sm:$0xf] %vm3920_vm9, %v3875_v61 }
 0x5bc   : > { %5559 = vmatmul.mubr.msk.bf16.gmra.mxu1 %vm4598_vm3, %v5666_v60 }
 0x5be   : > { %v3877_v37 = vpop.permute.xlu1 %3876  ;;  %v3847_v9 = vpop.permute.xlu0 %3846 }
 0x5bf   : > { %3947 = vst.msk [vmem:[#allocation2 + $0x68] sm:$0xf] %vm3920_vm9, %v3877_v37  ;;  %3932 = vst.msk [vmem:[#allocation2 + $0x2c] sm:$0xf] %vm3920_vm9, %v3847_v9 }
 0x5c2   : > { %v4322_v15 = vpop.permute.xlu1 %4321  ;;  %v3879_v7 = vpop.permute.xlu0 %3878 }
 0x5c3   : > { %4410 = vst.msk [vmem:[#allocation2 + $0x20] sm:$0xf] %vm4401_vm2, %v4322_v15 }
 0x5c4   : > { %3948 = vst.msk [vmem:[#allocation2 + $0x6c] sm:$0xf] %vm3920_vm9, %v3879_v7  ;;  %v4477_v7 = vld [vmem:[%s8280_s2 + $0x30] sm:$0xff] }
 0x5c6   : > { %v4354_v8 = vpop.permute.xlu1 %4353  ;;  %v4324_v18 = vpop.permute.xlu0 %4323 }
 0x5c7   : > { %4426 = vst.msk [vmem:[#allocation2 + $0x60] sm:$0xf] %vm4401_vm2, %v4354_v8  ;;  %4411 = vst.msk [vmem:[#allocation2 + $0x24] sm:$0xf] %vm4401_vm2, %v4324_v18  ;;  %v4475_v18 = vld [vmem:[%s8280_s2 + $0x20] sm:$0xff] }
 0x5ca   : > { %v4326_v36 = vpop.permute.xlu1 %4325  ;;  %v4356_v40 = vpop.permute.xlu0 %4355 }
 0x5cb   : > { %4412 = vst.msk [vmem:[#allocation2 + $0x28] sm:$0xf] %vm4401_vm2, %v4326_v36  ;;  %4427 = vst.msk [vmem:[#allocation2 + $0x64] sm:$0xf] %vm4401_vm2, %v4356_v40 }
 0x5ce   : > { %v4358_v59 = vpop.permute.xlu1 %4357  ;;  %v4328_v34 = vpop.permute.xlu0 %4327  ;;  %v5667_v46 = vld [vmem:[#allocation2 + $0x20] sm:$0xff]  }
 0x5cf   : > { %4428 = vst.msk [vmem:[#allocation2 + $0x68] sm:$0xf] %vm4401_vm2, %v4358_v59  ;;  %4413 = vst.msk [vmem:[#allocation2 + $0x2c] sm:$0xf] %vm4401_vm2, %v4328_v34  ;;  %5546 = vmatprep.mubr.msk.bf16.mxu0 %vm4598_vm3, %v5667_v46  ;;  %v4478_v59 = vld [vmem:[%s8280_s2 + $0x38] sm:$0xff]  ;;  %v4493_v34 = vld [vmem:[%s8280_s2 + $0xb0] sm:$0xff] }
 0x5d2   : > { %v3849_v52 = vpop.permute.xlu1 %3848  ;;  %v4360_v12 = vpop.permute.xlu0 %4359  ;;  %v5668_v47 = vld [vmem:[#allocation2 + $0x60] sm:$0xff]  }
 0x5d3   : > { %3933 = vst.msk [vmem:[#allocation2 + $0x30] sm:$0xf] %vm3920_vm9, %v3849_v52  ;;  %5562 = vmatprep.mubr.msk.bf16.mxu1 %vm4598_vm3, %v5668_v47 }
 0x5d4   : > { %4429 = vst.msk [vmem:[#allocation2 + $0x6c] sm:$0xf] %vm4401_vm2, %v4360_v12 }
 0x5d6   : > { %v3881_v58 = vpop.permute.xlu1 %3880  ;;  %v3851_v42 = vpop.permute.xlu0 %3850  ;;  %v5669_v56 = vld [vmem:[#allocation2 + $0x28] sm:$0xff]  }
 0x5d7   : > { %3949 = vst.msk [vmem:[#allocation2 + $0x70] sm:$0xf] %vm3920_vm9, %v3881_v58  ;;  %3934 = vst.msk [vmem:[#allocation2 + $0x34] sm:$0xf] %vm3920_vm9, %v3851_v42  ;;  %5547 = vmatmul.mubr.msk.bf16.gmra.mxu0 %vm4598_vm3, %v5669_v56  ;;  %v4476_v58 = vld [vmem:[%s8280_s2 + $0x28] sm:$0xff]  ;;  %v4491_v42 = vld [vmem:[%s8280_s2 + $0xa0] sm:$0xff] }
 0x5da   : > { %v3853_v26 = vpop.permute.xlu1 %3852  ;;  %v3883_v6 = vpop.permute.xlu0 %3882 }
 0x5db   : > { %v5670_v5 = vld [vmem:[#allocation2 + $0x68] sm:$0xff]   ;;  %3935 = vst.msk [vmem:[#allocation2 + $0x38] sm:$0xf] %vm3920_vm9, %v3853_v26  ;;  %3950 = vst.msk [vmem:[#allocation2 + $0x74] sm:$0xf] %vm3920_vm9, %v3883_v6 }
 0x5dc   : > { %5563 = vmatmul.mubr.msk.bf16.gmra.mxu1 %vm4598_vm3, %v5670_v5 }
 0x5de   : > { %v3885_v28 = vpop.permute.xlu1 %3884  ;;  %v3855_v33 = vpop.permute.xlu0 %3854 }
 0x5df   : > { %3951 = vst.msk [vmem:[#allocation2 + $0x78] sm:$0xf] %vm3920_vm9, %v3885_v28  ;;  %3936 = vst.msk [vmem:[#allocation2 + $0x3c] sm:$0xf] %vm3920_vm9, %v3855_v33  ;;  %v4494_v33 = vld [vmem:[%s8280_s2 + $0xb8] sm:$0xff] }
 0x5e2   : > { %v4330_v31 = vpop.permute.xlu1 %4329  ;;  %v3887_v62 = vpop.permute.xlu0 %3886 }
 0x5e3   : > { %4414 = vst.msk [vmem:[#allocation2 + $0x30] sm:$0xf] %vm4401_vm2, %v4330_v31 }
 0x5e4   : > { %3952 = vst.msk [vmem:[#allocation2 + $0x7c] sm:$0xf] %vm3920_vm9, %v3887_v62 }
 0x5e6   : > { %v4362_v13 = vpop.permute.xlu1 %4361  ;;  %v4332_v30 = vpop.permute.xlu0 %4331 }
 0x5e7   : > { %4430 = vst.msk [vmem:[#allocation2 + $0x70] sm:$0xf] %vm4401_vm2, %v4362_v13  ;;  %4415 = vst.msk [vmem:[#allocation2 + $0x34] sm:$0xf] %vm4401_vm2, %v4332_v30 }
 0x5ea   : > { %v4334_v3 = vpop.permute.xlu1 %4333  ;;  %v4364_v54 = vpop.permute.xlu0 %4363 }
 0x5eb   : > { %4416 = vst.msk [vmem:[#allocation2 + $0x38] sm:$0xf] %vm4401_vm2, %v4334_v3  ;;  %4431 = vst.msk [vmem:[#allocation2 + $0x74] sm:$0xf] %vm4401_vm2, %v4364_v54  ;;  %v4492_v54 = vld [vmem:[%s8280_s2 + $0xa8] sm:$0xff] }
 0x5ee   : > { %v4366_v51 = vpop.permute.xlu1 %4365  ;;  %v4336_v21 = vpop.permute.xlu0 %4335  ;;  %v5671_v2 = vld [vmem:[#allocation2 + $0x30] sm:$0xff]  }
 0x5ef   : > { %4432 = vst.msk [vmem:[#allocation2 + $0x78] sm:$0xf] %vm4401_vm2, %v4366_v51  ;;  %4417 = vst.msk [vmem:[#allocation2 + $0x3c] sm:$0xf] %vm4401_vm2, %v4336_v21  ;;  %5550 = vmatprep.mubr.msk.bf16.mxu0 %vm4598_vm3, %v5671_v2 }
 0x5f2   : > { %v4368_v35 = vpop.permute.xlu0 %4367  ;;  %v5672_v23 = vld [vmem:[#allocation2 + $0x70] sm:$0xff]  }
 0x5f3   : > { %4433 = vst.msk [vmem:[#allocation2 + $0x7c] sm:$0xf] %vm4401_vm2, %v4368_v35  ;;  %5566 = vmatprep.mubr.msk.bf16.mxu1 %vm4598_vm3, %v5672_v23 }
 0x5f6   : > { %v5673_v41 = vld [vmem:[#allocation2 + $0x38] sm:$0xff]  }
 0x5f7   : > { %5551 = vmatmul.mubr.msk.bf16.gmra.mxu0 %vm4598_vm3, %v5673_v41 }
 0x5fa   : > { %v5674_v43 = vld [vmem:[#allocation2 + $0x78] sm:$0xff]  }
 0x5fb   : > { %5567 = vmatmul.mubr.msk.bf16.gmra.mxu1 %vm4598_vm3, %v5674_v43 }
 0x657   : > { %v5540_v24 = vpop.f32.mrf.mxu0 }
 0x658   : > { %v4694_v16 = vadd.f32 %v5540_v24, %v4473_v50  ;;  %v4481_v50 = vld [vmem:[%s8280_s2 + $0x50] sm:$0xff] }
 0x659   : > { %v4685_v20 = vpop.f32.mrf.mxu0 }
 0x65a   : > { %v4814_v22 = vmax.f32 %v4694_v16, 0.0  ;;  %v4686_v29 = vadd.f32 %v4685_v20, %v4471_v38  ;;  %v4479_v38 = vld [vmem:[%s8280_s2 + $0x40] sm:$0xff] }
 0x65b   : > { %v5541_v1 = vpop.f32.mrf.mxu0 }
 0x65c   : > { %v5556_v11 = vpop.f32.mrf.mxu1  ;;  %4846 = vst [vmem:[%s8114_s14 + $0x10] sm:$0xff] %v4814_v22  ;;  %v4812_v48 = vmax.f32 %v4686_v29, 0.0  ;;  %v4697_v25 = vadd.f32 %v5541_v1, %v4474_v17  ;;  %v4482_v17 = vld [vmem:[%s8280_s2 + $0x58] sm:$0xff] }
 0x65d   : > { %v4758_v45 = vadd.f32 %v5556_v11, %v4489_v27  ;;  %v4688_v44 = vpop.f32.mrf.mxu0  ;;  %v4497_v27 = vld [vmem:[%s8280_s2 + $0xd0] sm:$0xff] }
 0x65e   : > { %v4749_v4 = vpop.f32.mrf.mxu1  ;;  %4844 = vst [vmem:[%s8114_s14] sm:$0xff] %v4812_v48  ;;  %v4815_v63 = vmax.f32 %v4697_v25, 0.0  ;;  %v4689_v39 = vadd.f32 %v4688_v44, %v4472_v14  ;;  %v4480_v14 = vld [vmem:[%s8280_s2 + $0x48] sm:$0xff] }
 0x65f   : > { %v4830_v32 = vmax.f32 %v4758_v45, 0.0  ;;  %v4750_v10 = vadd.f32 %v4749_v4, %v4487_v57  ;;  %v4495_v57 = vld [vmem:[%s8280_s2 + $0xc0] sm:$0xff] }
 0x660   : > { %v5557_v19 = vpop.f32.mrf.mxu1  ;;  %4847 = vst [vmem:[%s8114_s14 + $0x18] sm:$0xff] %v4815_v63  ;;  %v4813_v55 = vmax.f32 %v4689_v39, 0.0 }
 0x661   : > { %4862 = vst [vmem:[%s8114_s14 + $0x90] sm:$0xff] %v4830_v32  ;;  %v4828_v0 = vmax.f32 %v4750_v10, 0.0  ;;  %v4761_v61 = vadd.f32 %v5557_v19, %v4490_v53  ;;  %v4498_v53 = vld [vmem:[%s8280_s2 + $0xd8] sm:$0xff] }
 0x662   : > { %v4752_v60 = vpop.f32.mrf.mxu1  ;;  %4845 = vst [vmem:[%s8114_s14 + $0x8] sm:$0xff] %v4813_v55 }
 0x663   : > { %4860 = vst [vmem:[%s8114_s14 + $0x80] sm:$0xff] %v4828_v0  ;;  %v4831_v37 = vmax.f32 %v4761_v61, 0.0  ;;  %v4753_v9 = vadd.f32 %v4752_v60, %v4488_v49  ;;  %v4496_v49 = vld [vmem:[%s8280_s2 + $0xc8] sm:$0xff] }
 0x665   : > { %4863 = vst [vmem:[%s8114_s14 + $0x98] sm:$0xff] %v4831_v37  ;;  %v4829_v15 = vmax.f32 %v4753_v9, 0.0 }
 0x667   : > { %4861 = vst [vmem:[%s8114_s14 + $0x88] sm:$0xff] %v4829_v15 }
 0x677   : > { %v5544_v8 = vpop.f32.mrf.mxu0 }
 0x678   : > { %v4710_v36 = vadd.f32 %v5544_v8, %v4477_v7  ;;  %v4485_v7 = vld [vmem:[%s8280_s2 + $0x70] sm:$0xff] }
 0x679   : > { %v4701_v40 = vpop.f32.mrf.mxu0 }
 0x67a   : > { %v4818_v46 = vmax.f32 %v4710_v36, 0.0  ;;  %v4702_v52 = vadd.f32 %v4701_v40, %v4475_v18  ;;  %v4483_v18 = vld [vmem:[%s8280_s2 + $0x60] sm:$0xff] }
 0x67b   : > { %v5545_v12 = vpop.f32.mrf.mxu0 }
 0x67c   : > { %v5560_v47 = vpop.f32.mrf.mxu1  ;;  %4850 = vst [vmem:[%s8114_s14 + $0x30] sm:$0xff] %v4818_v46  ;;  %v4816_v56 = vmax.f32 %v4702_v52, 0.0  ;;  %v4713_v26 = vadd.f32 %v5545_v12, %v4478_v59  ;;  %v4486_v59 = vld [vmem:[%s8280_s2 + $0x78] sm:$0xff] }
 0x67d   : > { %v4774_v6 = vadd.f32 %v5560_v47, %v4493_v34  ;;  %v4704_v5 = vpop.f32.mrf.mxu0  ;;  %v4501_v34 = vld [vmem:[%s8280_s2 + $0xf0] sm:$0xff] }
 0x67e   : > { %v4765_v28 = vpop.f32.mrf.mxu1  ;;  %4848 = vst [vmem:[%s8114_s14 + $0x20] sm:$0xff] %v4816_v56  ;;  %v4819_v31 = vmax.f32 %v4713_v26, 0.0  ;;  %v4705_v13 = vadd.f32 %v4704_v5, %v4476_v58  ;;  %v4484_v58 = vld [vmem:[%s8280_s2 + $0x68] sm:$0xff] }
 0x67f   : > { %v4834_v62 = vmax.f32 %v4774_v6, 0.0  ;;  %v4766_v30 = vadd.f32 %v4765_v28, %v4491_v42  ;;  %v4499_v42 = vld [vmem:[%s8280_s2 + $0xe0] sm:$0xff] }
 0x680   : > { %v5561_v3 = vpop.f32.mrf.mxu1  ;;  %4851 = vst [vmem:[%s8114_s14 + $0x38] sm:$0xff] %v4819_v31  ;;  %v4817_v51 = vmax.f32 %v4705_v13, 0.0 }
 0x681   : > { %4866 = vst [vmem:[%s8114_s14 + $0xb0] sm:$0xff] %v4834_v62  ;;  %v4832_v21 = vmax.f32 %v4766_v30, 0.0  ;;  %v4777_v2 = vadd.f32 %v5561_v3, %v4494_v33  ;;  %v4502_v33 = vld [vmem:[%s8280_s2 + $0xf8] sm:$0xff] }
 0x682   : > { %v4768_v35 = vpop.f32.mrf.mxu1  ;;  %4849 = vst [vmem:[%s8114_s14 + $0x28] sm:$0xff] %v4817_v51 }
 0x683   : > { %4864 = vst [vmem:[%s8114_s14 + $0xa0] sm:$0xff] %v4832_v21  ;;  %v4835_v23 = vmax.f32 %v4777_v2, 0.0  ;;  %v4769_v41 = vadd.f32 %v4768_v35, %v4492_v54  ;;  %v4500_v54 = vld [vmem:[%s8280_s2 + $0xe8] sm:$0xff] }
 0x685   : > { %4867 = vst [vmem:[%s8114_s14 + $0xb8] sm:$0xff] %v4835_v23  ;;  %v4833_v43 = vmax.f32 %v4769_v41, 0.0 }
 0x687   : > { %4865 = vst [vmem:[%s8114_s14 + $0xa8] sm:$0xff] %v4833_v43 }
 0x697   : > { %v5548_v24 = vpop.f32.mrf.mxu0 }
 0x698   : > { %v4726_v16 = vadd.f32 %v5548_v24, %v4481_v50 }
 0x699   : > { %v4717_v20 = vpop.f32.mrf.mxu0 }
 0x69a   : > { %v4822_v22 = vmax.f32 %v4726_v16, 0.0  ;;  %v4718_v29 = vadd.f32 %v4717_v20, %v4479_v38 }
 0x69b   : > { %v5549_v1 = vpop.f32.mrf.mxu0 }
 0x69c   : > { %v5564_v11 = vpop.f32.mrf.mxu1  ;;  %4854 = vst [vmem:[%s8114_s14 + $0x50] sm:$0xff] %v4822_v22  ;;  %v4820_v48 = vmax.f32 %v4718_v29, 0.0  ;;  %v4729_v25 = vadd.f32 %v5549_v1, %v4482_v17 }
 0x69d   : > { %v4790_v45 = vadd.f32 %v5564_v11, %v4497_v27  ;;  %v4720_v44 = vpop.f32.mrf.mxu0 }
 0x69e   : > { %v4781_v4 = vpop.f32.mrf.mxu1  ;;  %4852 = vst [vmem:[%s8114_s14 + $0x40] sm:$0xff] %v4820_v48  ;;  %v4823_v63 = vmax.f32 %v4729_v25, 0.0  ;;  %v4721_v39 = vadd.f32 %v4720_v44, %v4480_v14 }
 0x69f   : > { %v4838_v32 = vmax.f32 %v4790_v45, 0.0  ;;  %v4782_v10 = vadd.f32 %v4781_v4, %v4495_v57 }
 0x6a0   : > { %v5565_v19 = vpop.f32.mrf.mxu1  ;;  %4855 = vst [vmem:[%s8114_s14 + $0x58] sm:$0xff] %v4823_v63  ;;  %v4821_v55 = vmax.f32 %v4721_v39, 0.0 }
 0x6a1   : > { %4870 = vst [vmem:[%s8114_s14 + $0xd0] sm:$0xff] %v4838_v32  ;;  %v4836_v0 = vmax.f32 %v4782_v10, 0.0  ;;  %v4793_v61 = vadd.f32 %v5565_v19, %v4498_v53 }
 0x6a2   : > { %v4784_v60 = vpop.f32.mrf.mxu1  ;;  %4853 = vst [vmem:[%s8114_s14 + $0x48] sm:$0xff] %v4821_v55 }
 0x6a3   : > { %4868 = vst [vmem:[%s8114_s14 + $0xc0] sm:$0xff] %v4836_v0  ;;  %v4839_v37 = vmax.f32 %v4793_v61, 0.0  ;;  %v4785_v9 = vadd.f32 %v4784_v60, %v4496_v49 }
 0x6a5   : > { %4871 = vst [vmem:[%s8114_s14 + $0xd8] sm:$0xff] %v4839_v37  ;;  %v4837_v15 = vmax.f32 %v4785_v9, 0.0 }
 0x6a7   : > { %4869 = vst [vmem:[%s8114_s14 + $0xc8] sm:$0xff] %v4837_v15 }
 0x6b7   : > { %v5552_v8 = vpop.f32.mrf.mxu0 }
 0x6b8   : > { %v4742_v36 = vadd.f32 %v5552_v8, %v4485_v7 }
 0x6b9   : > { %v4733_v40 = vpop.f32.mrf.mxu0 }
 0x6ba   : > { %v4826_v46 = vmax.f32 %v4742_v36, 0.0  ;;  %v4734_v52 = vadd.f32 %v4733_v40, %v4483_v18 }
 0x6bb   : > { %v5553_v12 = vpop.f32.mrf.mxu0  ;;  %v5568_v47 = vpop.f32.mrf.mxu1 }
 0x6bc   : > { %4858 = vst [vmem:[%s8114_s14 + $0x70] sm:$0xff] %v4826_v46  ;;  %v4824_v56 = vmax.f32 %v4734_v52, 0.0  ;;  %v4745_v26 = vadd.f32 %v5553_v12, %v4486_v59  ;;  %v4806_v6 = vadd.f32 %v5568_v47, %v4501_v34 }
 0x6bd   : > { %v4736_v5 = vpop.f32.mrf.mxu0  ;;  %v4797_v28 = vpop.f32.mrf.mxu1 }
 0x6be   : > { %4856 = vst [vmem:[%s8114_s14 + $0x60] sm:$0xff] %v4824_v56  ;;  %v4827_v31 = vmax.f32 %v4745_v26, 0.0  ;;  %v4842_v62 = vmax.f32 %v4806_v6, 0.0  ;;  %v4737_v13 = vadd.f32 %v4736_v5, %v4484_v58  ;;  %v4798_v30 = vadd.f32 %v4797_v28, %v4499_v42 }
 0x6bf   : > { %v5569_v3 = vpop.f32.mrf.mxu1 }
 0x6c0   : > { %4859 = vst [vmem:[%s8114_s14 + $0x78] sm:$0xff] %v4827_v31  ;;  %4874 = vst [vmem:[%s8114_s14 + $0xf0] sm:$0xff] %v4842_v62  ;;  %v4825_v51 = vmax.f32 %v4737_v13, 0.0  ;;  %v4840_v21 = vmax.f32 %v4798_v30, 0.0  ;;  %v4809_v2 = vadd.f32 %v5569_v3, %v4502_v33 }
 0x6c1   : > { %v4800_v35 = vpop.f32.mrf.mxu1 }
 0x6c2   : > { %4857 = vst [vmem:[%s8114_s14 + $0x68] sm:$0xff] %v4825_v51  ;;  %4872 = vst [vmem:[%s8114_s14 + $0xe0] sm:$0xff] %v4840_v21  ;;  %v4843_v23 = vmax.f32 %v4809_v2, 0.0  ;;  %v4801_v41 = vadd.f32 %v4800_v35, %v4500_v54 }
 0x6c4   : > { %4875 = vst [vmem:[%s8114_s14 + $0xf8] sm:$0xff] %v4843_v23  ;;  %v4841_v43 = vmax.f32 %v4801_v41, 0.0 }
 0x6c6   : > { %4873 = vst [vmem:[%s8114_s14 + $0xe8] sm:$0xff] %v4841_v43 }
 0x6c7   : > { %5720 = shalt.err (!%p5717_p3)
}
 0x6c8   : > { %s5721_s27 = scalar_lea.hbm %s8229_s20, 4096  ;;  %s5725_s6 = scalar_lea.hbm %s8282_s4, 8192 }
 0x6c9   : > { %p5722_p4 = scmp.ne.s32.totalorder %s8229_s20, %s5721_s27  ;;  %p5726_p9 = scmp.lt.s32.totalorder %s8229_s20, %s8282_s4 }
 0x6ca   : > { %p5727_p10 = scmp.lt.s32.totalorder %s5725_s6, %s5721_s27 }
 0x6cb   : > { %p5723_p7 = pnand %p5722_p4, %p5850_p5 }
 0x6cc   : > { %p5728_p11 = por %p5727_p10, %p5726_p9 }
 0x6cd   : > { %p5724_p8 = pneg %p5723_p7 }
 0x6cf   : > { %p5729_p12 = pnand %p5728_p11, %p5724_p8 }
 0x6d1   : > { %5732 = shalt.err (!%p5729_p12)
}
 0x6d2   : > { %s5786_s9 = smov 128  }
 0x6d3   : > { %5578 = dma.vmem_to_hbm [thread:$0]  (%p5850_p5), %s8232_s11, 4096, %s8229_s20, %s8237_s19, %s5786_s9, %s5786_s9, %s5774_s29  }
 0x6d4 PF: > { %p5584_p13 = scmp.ge.s32.totalorder %s5767_s18, 2  ;;  %s4905_s10 = sand.u32 1, %s5755_s15  }
 0x6d5   : > { %s4906_s12 = scalar_lea.sflag [#allocation4], %s4905_s10 }
 0x6d6   : > { %p5581_p0 = pnand %p5584_p13, %p5854_p6 }
 0x6d8   : > { %p5582_p1 = pneg %p5581_p0 }
 0x6da   : > { %5750 = dma.done.wait (%p5582_p1), %s4906_s12, 4096  }
 0x6db   : > { %5752 = vsyncadd (%p5582_p1), %s4906_s12, 4294963200  ;;  %p14_p2 = scmp.ge.s32.totalorder %s5837_s21, 4   ;;  %s8634_s15 = smov %s5759_s16 }
 0x6dc   : > { %s8635_s16 = smov %s5763_s17  ;;  %s8636_s17 = smov %s5848_s24 }
 0x6dd   : > { %s8637_s18 = smov %s5837_s21  ;;  %16 = sbr.rel (!%p14_p2) target bundleno = 3 (0x3), region = 71 }
 0x6e2   :  { %4911 = vsyncpa [#allocation4], 1 }
 0x6e3   :  { %4913 = vsyncpa [#allocation4 + $0x1], 1 }

</bundles_post_ra>
